<compile_context>
chip_gen: v5e
topology: v5e:2x2
jax: 0.10.0
libtpu: 0.0.40
codegen_flags: <defaults>
</compile_context>

<pallas_src>
import functools

import jax
import jax.numpy as jnp
from jax.experimental import pallas as pl
from jax.experimental.pallas import tpu as pltpu


NEG_SLOPE = 0.01          # nn.LeakyReLU default
BN_EPS = 1e-5             # nn.BatchNorm1d default
EMB_DIM = 128             # layer3 output width (the embedding)
LOGITS_PAD = 128          # pad logits lane width to a full vreg lane count
BATCH_PAD = 8             # sublane-align the batch axis (f32 tiles are (8, 128))


def _leaky_relu(v):
    return jnp.where(v >= 0, v, NEG_SLOPE * v)


def mlp_kernel(x_ref,
               w1_ref, c1_ref,
               w2_ref, c2_ref,
               w3_ref, c3_ref,
               wo_ref, bo_ref,
               out_ref):
    """Whole-network forward in one invocation (everything fits in VMEM).

    Weight refs are pre-processed host-side:
      * eval-mode BatchNorm scale folded into the weight columns, shift kept in c*.
      * for layers followed by MaxPool1d(2) the output columns are permuted so
        even pooling partners occupy the first half: pooling is a lane-aligned
        max of the two contiguous halves (no one-hot matmuls, no XLU shuffles).
      * weights are bf16 (MXU-native); biases/shifts are f32; accumulation is f32.

    Output layout: out_ref[:, :128] = embedding (y3), out_ref[:, 128:] = padded y4.
    """
    x = x_ref[...]                                              # (Bp, 1024) bf16

    # ---- layer1: Linear(1024->1024) + BN + LeakyReLU, MaxPool1d(2) -> (Bp, 512)
    h1 = _leaky_relu(
        jnp.dot(x, w1_ref[...], preferred_element_type=jnp.float32) + c1_ref[...])
    half1 = h1.shape[1] // 2
    p1 = jnp.maximum(h1[:, :half1], h1[:, half1:])
    # Dropout(0.25): identity in eval mode.

    # ---- layer2: Linear(512->256) + BN + LeakyReLU, MaxPool1d(2) -> (Bp, 128)
    h2 = _leaky_relu(
        jnp.dot(p1.astype(jnp.bfloat16), w2_ref[...],
                preferred_element_type=jnp.float32) + c2_ref[...])
    half2 = h2.shape[1] // 2
    p2 = jnp.maximum(h2[:, :half2], h2[:, half2:])

    # ---- layer3: Linear(128->128) + BN + LeakyReLU  (this is `self.embedding`)
    h3 = _leaky_relu(
        jnp.dot(p2.astype(jnp.bfloat16), w3_ref[...],
                preferred_element_type=jnp.float32) + c3_ref[...])

    # ---- out_layer: Linear(128->output_size) (y4: computed, discarded by forward)
    y4 = jnp.dot(h3.astype(jnp.bfloat16), wo_ref[...],
                 preferred_element_type=jnp.float32) + bo_ref[...]

    # Single lane-dense (Bp, 256) output: [embedding | padded logits].
    out_ref[:, :EMB_DIM] = h3
    out_ref[:, EMB_DIM:] = y4


# ----------------------------- host-side parameter prep -----------------------------

def _linear_params(key, fan_in, fan_out):
    """Deterministic nn.Linear-style init: U(-1/sqrt(fan_in), 1/sqrt(fan_in))."""
    kw, kb = jax.random.split(key)
    bound = 1.0 / jnp.sqrt(jnp.float32(fan_in))
    w_t = jax.random.uniform(kw, (fan_in, fan_out), jnp.float32, -bound, bound)
    b = jax.random.uniform(kb, (fan_out,), jnp.float32, -bound, bound)
    return w_t, b


def _fold_bn(w_t, b):
    """Fold eval-mode BatchNorm1d (fresh stats, identity affine) into W / bias."""
    scale = 1.0 / jnp.sqrt(1.0 + BN_EPS)      # gamma=1, var=1, mean=0, beta=0
    return w_t * scale, (b * scale).reshape(1, -1)


def _pool_permute(w_t, c):
    """Permute output columns so MaxPool1d(2) partners land in contiguous halves."""
    f = w_t.shape[1]
    perm = jnp.concatenate([jnp.arange(0, f, 2), jnp.arange(1, f, 2)])
    return w_t[:, perm], c[:, perm]


def init_raw_params(input_size, output_size, seed=0):
    key = jax.random.PRNGKey(seed)
    k1, k2, k3, k4 = jax.random.split(key, 4)
    return (
        _linear_params(k1, input_size, 1024),
        _linear_params(k2, 512, 256),
        _linear_params(k3, 128, 128),
        _linear_params(k4, 128, output_size),
    )


def make_kernel_params(raw, output_size):
    """BN-fold, pool-permute, pad the out layer to 128 lanes, and store weights
    in bf16 (weight-only; biases/shifts stay f32, accumulation stays f32)."""
    (w1, b1), (w2, b2), (w3, b3), (wo, bo) = raw
    w1f, c1 = _pool_permute(*_fold_bn(w1, b1))
    w2f, c2 = _pool_permute(*_fold_bn(w2, b2))
    w3f, c3 = _fold_bn(w3, b3)
    pad = LOGITS_PAD - output_size
    wo_p = jnp.pad(wo, ((0, 0), (0, pad)))
    bo_p = jnp.pad(bo, ((0, pad),)).reshape(1, -1)
    bf16 = lambda a: a.astype(jnp.bfloat16)
    return (bf16(w1f), c1, bf16(w2f), c2, bf16(w3f), c3, bf16(wo_p), bo_p)


# ----------------------------------- forward ----------------------------------------

@functools.partial(jax.jit, static_argnames=("input_size", "output_size"))
def neural_net_forward(x, params, *, input_size, output_size):
    """Returns (x_flat, embedding, logits).  PyTorch forward() returns x_flat;
    `embedding` corresponds to getEmbedding(); `logits` is the discarded y4."""
    batch = x.shape[0]
    x_flat = x.reshape(batch, -1).astype(jnp.float32)
    assert x_flat.shape[1] == input_size == 1024  # layer2 hard-codes Linear(512, 256)

    # Pad batch to a multiple of 8 sublanes (unmasked stores, clean vreg tiles)
    # and feed the MXU bf16 activations.  Padded rows are zero and sliced off.
    bp = ((batch + BATCH_PAD - 1) // BATCH_PAD) * BATCH_PAD
    x_in = jnp.zeros((bp, input_size), jnp.bfloat16).at[:batch, :].set(
        x_flat.astype(jnp.bfloat16))

    # Advisory cost hint: this kernel is bound by the weight DMA, let XLA know.
    weight_bytes = sum(int(p.size) * p.dtype.itemsize for p in params)
    cost = pl.CostEstimate(
        flops=2 * bp * (1024 * 1024 + 512 * 256 + 128 * 128 + 128 * LOGITS_PAD),
        transcendentals=0,
        bytes_accessed=weight_bytes + x_in.size * 2 + bp * (EMB_DIM + LOGITS_PAD) * 4,
    )

    out = pl.pallas_call(
        mlp_kernel,
        out_shape=jax.ShapeDtypeStruct((bp, EMB_DIM + LOGITS_PAD), jnp.float32),
        compiler_params=pltpu.CompilerParams(vmem_limit_bytes=8 * 1024 * 1024),
        cost_estimate=cost,
    )(x_in, *params)

    emb = out[:batch, :EMB_DIM]
    logits = out[:batch, EMB_DIM:EMB_DIM + output_size]
    # forward() returns the flattened input; no need to round-trip it through VMEM.
    return x_flat, emb, logits


# -------------------------------- pure-JAX reference --------------------------------

def reference_forward(x, raw, output_size):
    (w1, b1), (w2, b2), (w3, b3), (wo, bo) = raw
    b = x.shape[0]
    xf = x.reshape(b, -1).astype(jnp.float32)
    s = 1.0 / jnp.sqrt(1.0 + BN_EPS)

    def block(h, w, bias, pool):
        z = _leaky_relu((h @ w + bias) * s)
        if pool:
            z = jnp.max(z.reshape(b, z.shape[1] // 2, 2), axis=-1)
        return z

    y1 = block(xf, w1, b1, True)
    y2 = block(y1, w2, b2, True)
    y3 = block(y2, w3, b3, False)
    y4 = y3 @ wo + bo
    return xf, y3, y4


if __name__ == "__main__":
    # Small deterministic example: NCHW input (2, 4, 16, 16) -> input_size = 1024.
    batch, channels, height, width = 2, 4, 16, 16
    input_size = channels * height * width           # 1024 (matches Linear(512,...) chain)
    output_size = 10

    key = jax.random.PRNGKey(0)
    x = jax.random.normal(key, (batch, channels, height, width), dtype=jnp.float32)

    raw = init_raw_params(input_size, output_size, seed=0)
    params = make_kernel_params(raw, output_size)

    x_flat, embedding, logits = neural_net_forward(
        x, params, input_size=input_size, output_size=output_size
    )
    jax.block_until_ready((x_flat, embedding, logits))

    assert x_flat.shape == (batch, input_size)
    assert embedding.shape == (batch, EMB_DIM)
    assert logits.shape == (batch, output_size)

    # Cross-check against a pure-JAX eval-mode f32 reference (loose tolerance:
    # kernel stores weights/activations in bf16 for the MXU; accumulation is f32).
    xf_ref, emb_ref, log_ref = reference_forward(x, raw, output_size)
    assert jnp.array_equal(x_flat, xf_ref)
    assert jnp.allclose(embedding, emb_ref, atol=5e-2, rtol=5e-2)
    assert jnp.allclose(logits, log_ref, atol=5e-2, rtol=5e-2)

    print("KERNEL_OK")
</pallas_src>

<mosaic_0001>
module attributes {stable_mosaic.version = 11 : i64} {
  func.func @mlp_kernel(%arg0: memref<8x1024xbf16, #tpu.memory_space<vmem>>, %arg1: memref<1024x1024xbf16, #tpu.memory_space<vmem>>, %arg2: memref<1x1024xf32, #tpu.memory_space<vmem>>, %arg3: memref<512x256xbf16, #tpu.memory_space<vmem>>, %arg4: memref<1x256xf32, #tpu.memory_space<vmem>>, %arg5: memref<128x128xbf16, #tpu.memory_space<vmem>>, %arg6: memref<1x128xf32, #tpu.memory_space<vmem>>, %arg7: memref<128x128xbf16, #tpu.memory_space<vmem>>, %arg8: memref<1x128xf32, #tpu.memory_space<vmem>>, %arg9: memref<8x256xf32, #tpu.memory_space<vmem>>) attributes {dimension_semantics = [], scalar_prefetch = 0 : i64, scratch_operands = 0 : i64, tpu.core_type = #tpu.core_type<tc>} {
    %c0 = arith.constant 0 : index
    %c0_0 = arith.constant 0 : index
    %0 = vector.load %arg0[%c0, %c0_0] : memref<8x1024xbf16, #tpu.memory_space<vmem>>, vector<8x1024xbf16>
    %c0_1 = arith.constant 0 : index
    %c0_2 = arith.constant 0 : index
    %1 = vector.load %arg1[%c0_1, %c0_2] : memref<1024x1024xbf16, #tpu.memory_space<vmem>>, vector<1024x1024xbf16>
    %cst = arith.constant dense<0.000000e+00> : vector<8x1024xf32>
    %2 = tpu.matmul %0, %1, %cst {dimension_numbers = #tpu.dot_dimension_numbers<[1], [0], [0], [1], [0, 0, 1, 1], [], []>} : vector<8x1024xbf16>, vector<1024x1024xbf16>, vector<8x1024xf32> -> vector<8x1024xf32>
    %c0_3 = arith.constant 0 : index
    %c0_4 = arith.constant 0 : index
    %3 = vector.load %arg2[%c0_3, %c0_4] : memref<1x1024xf32, #tpu.memory_space<vmem>>, vector<1x1024xf32>
    %4 = vector.broadcast %3 : vector<1x1024xf32> to vector<8x1024xf32>
    %5 = arith.addf %2, %4 : vector<8x1024xf32>
    %cst_5 = arith.constant 0.000000e+00 : f32
    %6 = vector.broadcast %cst_5 : f32 to vector<8x1024xf32>
    %7 = arith.cmpf oge, %5, %6 : vector<8x1024xf32>
    %cst_6 = arith.constant 0.00999999977 : f32
    %8 = vector.broadcast %cst_6 : f32 to vector<8x1024xf32>
    %9 = arith.mulf %8, %5 : vector<8x1024xf32>
    %10 = arith.select %7, %5, %9 : vector<8x1024xi1>, vector<8x1024xf32>
    %11 = vector.extract_strided_slice %10 {offsets = [0, 0], sizes = [8, 512], strides = [1, 1]} : vector<8x1024xf32> to vector<8x512xf32>
    %12 = vector.extract_strided_slice %10 {offsets = [0, 512], sizes = [8, 512], strides = [1, 1]} : vector<8x1024xf32> to vector<8x512xf32>
    %13 = arith.maximumf %11, %12 : vector<8x512xf32>
    %14 = arith.truncf %13 : vector<8x512xf32> to vector<8x512xbf16>
    %c0_7 = arith.constant 0 : index
    %c0_8 = arith.constant 0 : index
    %15 = vector.load %arg3[%c0_7, %c0_8] : memref<512x256xbf16, #tpu.memory_space<vmem>>, vector<512x256xbf16>
    %cst_9 = arith.constant dense<0.000000e+00> : vector<8x256xf32>
    %16 = tpu.matmul %14, %15, %cst_9 {dimension_numbers = #tpu.dot_dimension_numbers<[1], [0], [0], [1], [0, 0, 1, 1], [], []>} : vector<8x512xbf16>, vector<512x256xbf16>, vector<8x256xf32> -> vector<8x256xf32>
    %c0_10 = arith.constant 0 : index
    %c0_11 = arith.constant 0 : index
    %17 = vector.load %arg4[%c0_10, %c0_11] : memref<1x256xf32, #tpu.memory_space<vmem>>, vector<1x256xf32>
    %18 = vector.broadcast %17 : vector<1x256xf32> to vector<8x256xf32>
    %19 = arith.addf %16, %18 : vector<8x256xf32>
    %cst_12 = arith.constant 0.000000e+00 : f32
    %20 = vector.broadcast %cst_12 : f32 to vector<8x256xf32>
    %21 = arith.cmpf oge, %19, %20 : vector<8x256xf32>
    %cst_13 = arith.constant 0.00999999977 : f32
    %22 = vector.broadcast %cst_13 : f32 to vector<8x256xf32>
    %23 = arith.mulf %22, %19 : vector<8x256xf32>
    %24 = arith.select %21, %19, %23 : vector<8x256xi1>, vector<8x256xf32>
    %25 = vector.extract_strided_slice %24 {offsets = [0, 0], sizes = [8, 128], strides = [1, 1]} : vector<8x256xf32> to vector<8x128xf32>
    %26 = vector.extract_strided_slice %24 {offsets = [0, 128], sizes = [8, 128], strides = [1, 1]} : vector<8x256xf32> to vector<8x128xf32>
    %27 = arith.maximumf %25, %26 : vector<8x128xf32>
    %28 = arith.truncf %27 : vector<8x128xf32> to vector<8x128xbf16>
    %c0_14 = arith.constant 0 : index
    %c0_15 = arith.constant 0 : index
    %29 = vector.load %arg5[%c0_14, %c0_15] : memref<128x128xbf16, #tpu.memory_space<vmem>>, vector<128x128xbf16>
    %cst_16 = arith.constant dense<0.000000e+00> : vector<8x128xf32>
    %30 = tpu.matmul %28, %29, %cst_16 {dimension_numbers = #tpu.dot_dimension_numbers<[1], [0], [0], [1], [0, 0, 1, 1], [], []>} : vector<8x128xbf16>, vector<128x128xbf16>, vector<8x128xf32> -> vector<8x128xf32>
    %c0_17 = arith.constant 0 : index
    %c0_18 = arith.constant 0 : index
    %31 = vector.load %arg6[%c0_17, %c0_18] : memref<1x128xf32, #tpu.memory_space<vmem>>, vector<1x128xf32>
    %32 = vector.broadcast %31 : vector<1x128xf32> to vector<8x128xf32>
    %33 = arith.addf %30, %32 : vector<8x128xf32>
    %cst_19 = arith.constant 0.000000e+00 : f32
    %34 = vector.broadcast %cst_19 : f32 to vector<8x128xf32>
    %35 = arith.cmpf oge, %33, %34 : vector<8x128xf32>
    %cst_20 = arith.constant 0.00999999977 : f32
    %36 = vector.broadcast %cst_20 : f32 to vector<8x128xf32>
    %37 = arith.mulf %36, %33 : vector<8x128xf32>
    %38 = arith.select %35, %33, %37 : vector<8x128xi1>, vector<8x128xf32>
    %39 = arith.truncf %38 : vector<8x128xf32> to vector<8x128xbf16>
    %c0_21 = arith.constant 0 : index
    %c0_22 = arith.constant 0 : index
    %40 = vector.load %arg7[%c0_21, %c0_22] : memref<128x128xbf16, #tpu.memory_space<vmem>>, vector<128x128xbf16>
    %cst_23 = arith.constant dense<0.000000e+00> : vector<8x128xf32>
    %41 = tpu.matmul %39, %40, %cst_23 {dimension_numbers = #tpu.dot_dimension_numbers<[1], [0], [0], [1], [0, 0, 1, 1], [], []>} : vector<8x128xbf16>, vector<128x128xbf16>, vector<8x128xf32> -> vector<8x128xf32>
    %c0_24 = arith.constant 0 : index
    %c0_25 = arith.constant 0 : index
    %42 = vector.load %arg8[%c0_24, %c0_25] : memref<1x128xf32, #tpu.memory_space<vmem>>, vector<1x128xf32>
    %43 = vector.broadcast %42 : vector<1x128xf32> to vector<8x128xf32>
    %44 = arith.addf %41, %43 : vector<8x128xf32>
    %c0_26 = arith.constant 0 : index
    %c0_27 = arith.constant 0 : index
    %45 = vector.load %arg9[%c0_26, %c0_27] : memref<8x256xf32, #tpu.memory_space<vmem>>, vector<8x128xf32>
    tpu.vector_store %arg9[%c0_26, %c0_27], %38 {strides = array<i32>} : memref<8x256xf32, #tpu.memory_space<vmem>>, vector<8x128xf32>,
    %c0_28 = arith.constant 0 : index
    %c128 = arith.constant 128 : index
    %46 = vector.load %arg9[%c0_28, %c128] : memref<8x256xf32, #tpu.memory_space<vmem>>, vector<8x128xf32>
    tpu.vector_store %arg9[%c0_28, %c128], %44 {strides = array<i32>} : memref<8x256xf32, #tpu.memory_space<vmem>>, vector<8x128xf32>,
    return
  }
}

</mosaic_0001>

<bundles_post_ra>
// kernel: neural_net_forward.1
= control target key start
LH: loop header
LB: loop body
LE: loop exit
PB: predicated region body
PF: predicated region fallthrough
CT: control target
= control target key end

     0   :  { %14 = vsyncpa [#allocation3], 0  ;;  %s8261_s0 = inlined_call_operand.vmem [shape: bf16[8,1024], index: 0, kind: input, shape index: {}]   ;;  %s8262_s1 = inlined_call_operand.hbm [shape: bf16[1024,1024], index: 1, kind: input, shape index: {}]   ;;  %s8263_s2 = inlined_call_operand.hbm [shape: f32[1,1024], index: 2, kind: input, shape index: {}]   ;;  %s8264_s3 = inlined_call_operand.hbm [shape: bf16[512,256], index: 3, kind: input, shape index: {}]   ;;  %s8265_s4 = inlined_call_operand.hbm [shape: f32[1,256], index: 4, kind: input, shape index: {}]   ;;  %s8266_s5 = inlined_call_operand.hbm [shape: bf16[128,128], index: 5, kind: input, shape index: {}]   ;;  %s8267_s6 = inlined_call_operand.hbm [shape: f32[1,128], index: 6, kind: input, shape index: {}]   ;;  %s8268_s7 = inlined_call_operand.hbm [shape: bf16[128,128], index: 7, kind: input, shape index: {}]   ;;  %s8269_s8 = inlined_call_operand.hbm [shape: f32[1,128], index: 8, kind: input, shape index: {}]   ;;  %s8270_s9 = inlined_call_operand.vmem [shape: f32[8,256], index: 9, kind: output, shape index: {}]  }
   0x1   :  { %15 = vsyncpa [#allocation5], 0 }
   0x2   :  { %16 = vsyncpa [#allocation8], 0 }
   0x3   :  { %17 = vsyncpa [#allocation11], 0  ;;  %s39_s11 = sshll.u32 %s8263_s2, 4  ;;  %s40_s11 = int_to_ptr.hbm [resolvable:$true] %s39_s11 }
   0x4   :  { %18 = vsyncpa [#allocation14], 0  ;;  %s7995_s12 = smov [#allocation4]   ;;  %s63_s16 = sshll.u32 %s8265_s4, 4  ;;  %s64_s16 = int_to_ptr.hbm [resolvable:$true] %s63_s16 }
   0x5   :  { %s41_s13 = sshll.u32 %s7995_s12, 4  ;;  %s7996_s17 = smov [#allocation7]   ;;  %s42_s13 = int_to_ptr.vmem [resolvable:$true] %s41_s13 }
   0x6   :  { %44 = dma.hbm_to_vmem [thread:$0]  %s40_s11, 128, %s42_s13, [#allocation5]  }
   0x7   :  { %s65_s18 = sshll.u32 %s7996_s17, 4  ;;  %s87_s21 = sshll.u32 %s8267_s6, 4  ;;  %s66_s18 = int_to_ptr.vmem [resolvable:$true] %s65_s18  ;;  %s88_s21 = int_to_ptr.hbm [resolvable:$true] %s87_s21 }
   0x8   :  { %68 = dma.hbm_to_vmem [thread:$0]  %s64_s16, 32, %s66_s18, [#allocation8]  }
   0x9   :  { %s25_s23 = sshll.u32 %s8262_s1, 4  ;;  %s7997_s24 = smov [#allocation10]   ;;  %s26_s23 = int_to_ptr.hbm [resolvable:$true] %s25_s23 }
   0xa   :  { %s89_s25 = sshll.u32 %s7997_s24, 4  ;;  %s7998_s4 = smov [#allocation2]   ;;  %s90_s25 = int_to_ptr.vmem [resolvable:$true] %s89_s25 }
   0xb   :  { %92 = dma.hbm_to_vmem [thread:$0]  %s88_s21, 16, %s90_s25, [#allocation11]  }
   0xc   :  { %s27_s26 = sshll.u32 %s7998_s4, 4  ;;  %s7999_s27 = smov 512   ;;  %s28_s26 = int_to_ptr.vmem [resolvable:$true] %s27_s26 }
   0xd   :  { %s8000_s28 = smov 32   ;;  %s49_s30 = sshll.u32 %s8264_s3, 4  ;;  %s50_s30 = int_to_ptr.hbm [resolvable:$true] %s49_s30 }
   0xe   :  { %33 = dma.hbm_to_vmem [thread:$0]  %s26_s23, 65536, %s28_s26, [#allocation3], %s7999_s27, %s7999_s27, %s8000_s28  }
   0xf   :  { %s8001_s10 = smov [#allocation6]   ;;  %s73_s13 = sshll.u32 %s8266_s5, 4  ;;  %s74_s13 = int_to_ptr.hbm [resolvable:$true] %s73_s13 }
  0x10   :  { %s51_s11 = sshll.u32 %s8001_s10, 4  ;;  %s8002_s14 = smov 128   ;;  %s52_s11 = int_to_ptr.vmem [resolvable:$true] %s51_s11 }
  0x11   :  { %s8003_s15 = smov 8   ;;  %s8004_s16 = smov [#allocation9]  }
  0x12   :  { %57 = dma.hbm_to_vmem [thread:$0]  %s50_s30, 8192, %s52_s11, [#allocation5], %s8002_s14, %s8002_s14, %s8003_s15  }
  0x13   :  { %s75_s17 = sshll.u32 %s8004_s16, 4  ;;  %s8005_s18 = smov 64   ;;  %s76_s17 = int_to_ptr.vmem [resolvable:$true] %s75_s17 }
  0x14   :  { %s8006_s19 = smov 4   ;;  %s97_s21 = sshll.u32 %s8268_s7, 4  ;;  %s98_s21 = int_to_ptr.hbm [resolvable:$true] %s97_s21 }
  0x15   :  { %81 = dma.hbm_to_vmem [thread:$0]  %s74_s13, 1024, %s76_s17, [#allocation8], %s8005_s18, %s8005_s18, %s8006_s19  }
  0x16   :  { %s8007_s2 = smov [#allocation12]   ;;  %s111_s24 = sshll.u32 %s8269_s8, 4  ;;  %s112_s24 = int_to_ptr.hbm [resolvable:$true] %s111_s24 }
  0x17   :  { %s99_s22 = sshll.u32 %s8007_s2, 4  ;;  %s8008_s25 = smov [#allocation13]   ;;  %s100_s22 = int_to_ptr.vmem [resolvable:$true] %s99_s22 }
  0x18   :  { %105 = dma.hbm_to_vmem [thread:$0]  %s98_s21, 1024, %s100_s22, [#allocation11], %s8005_s18, %s8005_s18, %s8006_s19  }
  0x19   :  { %s113_s4 = sshll.u32 %s8008_s25, 4  ;;  %s114_s4 = int_to_ptr.vmem [resolvable:$true] %s113_s4 }
  0x1a   :  { %116 = dma.hbm_to_vmem [thread:$0]  %s112_s24, 16, %s114_s4, [#allocation14]  }
  0x1b   :  { %7985 = dma.done.wait [#allocation3], 65536  }
  0x1c   :  { %7986 = vsyncadd [#allocation3], 4294901760 }
  0x1d   :  { %7987 = dma.done.wait [#allocation5], 8320  }
  0x1e   :  { %7988 = vsyncadd [#allocation5], 4294958976 }
  0x1f   :  { %7989 = dma.done.wait [#allocation8], 1056  }
  0x20   :  { %7990 = vsyncadd [#allocation8], 4294966240 }
  0x21   :  { %7991 = dma.done.wait [#allocation11], 1040  }
  0x22   :  { %7992 = vsyncadd [#allocation11], 4294966256 }
  0x23   :  { %7993 = dma.done.wait [#allocation14], 16  }
  0x24   :  { %7994 = vsyncadd [#allocation14], 4294967280  ;;  %v5040_v0 = vld [vmem:[#allocation2 + $0x1c0] sm:$0xf] }
  0x25   :  { %v7242_v1 = vld [vmem:[#allocation2 + $0x1dc] sm:$0xf0] }
  0x26   :  { %v5296_v2 = vld [vmem:[#allocation2 + $0x3c0] sm:$0xf]  ;;  %v5041_v3 = vor.u32 %v7242_v1, %v5040_v0 }
  0x27   :  { %v7306_v4 = vld [vmem:[#allocation2 + $0x3dc] sm:$0xf0] }
  0x28   :  { %v5552_v5 = vld [vmem:[#allocation2 + $0x5c0] sm:$0xf]  ;;  %v5297_v7 = vor.u32 %v7306_v4, %v5296_v2  ;;  %3271 = vmatpush.bf16.msra.mxu0 %v5041_v3 }
  0x29   :  { %v7370_v6 = vld [vmem:[#allocation2 + $0x5dc] sm:$0xf0] }
  0x2a   :  { %v5553_v8 = vor.u32 %v7370_v6, %v5552_v5  ;;  %v5808_v9 = vld [vmem:[#allocation2 + $0x7c0] sm:$0xf]  ;;  %3284 = vmatpush.bf16.msra.mxu1 %v5297_v7 }
  0x2b   :  { %v7434_v10 = vld [vmem:[#allocation2 + $0x7dc] sm:$0xf0] }
  0x2c   :  { %v5008_v11 = vld [vmem:[#allocation2 + $0x180] sm:$0xf]  ;;  %v5809_v12 = vor.u32 %v7434_v10, %v5808_v9  ;;  %3297 = vmatpush.bf16.msra.mxu2 %v5553_v8 }
  0x2d   :  { %v7234_v13 = vld [vmem:[#allocation2 + $0x19c] sm:$0xf0] }
  0x2e   :  { %v5264_v14 = vld [vmem:[#allocation2 + $0x380] sm:$0xf]  ;;  %v5009_v16 = vor.u32 %v7234_v13, %v5008_v11  ;;  %3310 = vmatpush.bf16.msra.mxu3 %v5809_v12 }
  0x2f   :  { %v7298_v15 = vld [vmem:[#allocation2 + $0x39c] sm:$0xf0] }
  0x30   :  { %v5265_v17 = vor.u32 %v7298_v15, %v5264_v14  ;;  %v5520_v18 = vld [vmem:[#allocation2 + $0x580] sm:$0xf]  ;;  %3272 = vmatpush.bf16.msra.mxu0 %v5009_v16 }
  0x31   :  { %v7362_v19 = vld [vmem:[#allocation2 + $0x59c] sm:$0xf0] }
  0x32   :  { %v5776_v20 = vld [vmem:[#allocation2 + $0x780] sm:$0xf]  ;;  %v5521_v21 = vor.u32 %v7362_v19, %v5520_v18  ;;  %3285 = vmatpush.bf16.msra.mxu1 %v5265_v17 }
  0x33   :  { %v7426_v22 = vld [vmem:[#allocation2 + $0x79c] sm:$0xf0] }
  0x34   :  { %v4976_v23 = vld [vmem:[#allocation2 + $0x140] sm:$0xf]  ;;  %v5777_v25 = vor.u32 %v7426_v22, %v5776_v20  ;;  %3298 = vmatpush.bf16.msra.mxu2 %v5521_v21 }
  0x35   :  { %v7226_v24 = vld [vmem:[#allocation2 + $0x15c] sm:$0xf0] }
  0x36   :  { %v5232_v26 = vld [vmem:[#allocation2 + $0x340] sm:$0xf]  ;;  %v4977_v29 = vor.u32 %v7226_v24, %v4976_v23  ;;  %3311 = vmatpush.bf16.msra.mxu3 %v5777_v25 }
  0x37   :  { %v7290_v27 = vld [vmem:[#allocation2 + $0x35c] sm:$0xf0] }
  0x38   :  { %v5488_v28 = vld [vmem:[#allocation2 + $0x540] sm:$0xf]  ;;  %v5233_v33 = vor.u32 %v7290_v27, %v5232_v26  ;;  %3273 = vmatpush.bf16.msra.mxu0 %v4977_v29 }
  0x39   :  { %v7354_v30 = vld [vmem:[#allocation2 + $0x55c] sm:$0xf0] }
  0x3a   :  { %v5744_v31 = vld [vmem:[#allocation2 + $0x740] sm:$0xf]  ;;  %v5489_v34 = vor.u32 %v7354_v30, %v5488_v28  ;;  %3286 = vmatpush.bf16.msra.mxu1 %v5233_v33 }
  0x3b   :  { %v7418_v32 = vld [vmem:[#allocation2 + $0x75c] sm:$0xf0] }
  0x3c   :  { %v4944_v35 = vld [vmem:[#allocation2 + $0x100] sm:$0xf]  ;;  %v5745_v38 = vor.u32 %v7418_v32, %v5744_v31  ;;  %3299 = vmatpush.bf16.msra.mxu2 %v5489_v34 }
  0x3d   :  { %v7218_v36 = vld [vmem:[#allocation2 + $0x11c] sm:$0xf0] }
  0x3e   :  { %v5200_v37 = vld [vmem:[#allocation2 + $0x300] sm:$0xf]  ;;  %v4945_v44 = vor.u32 %v7218_v36, %v4944_v35  ;;  %3312 = vmatpush.bf16.msra.mxu3 %v5745_v38 }
  0x3f   :  { %v7282_v39 = vld [vmem:[#allocation2 + $0x31c] sm:$0xf0] }
  0x40   :  { %v5456_v40 = vld [vmem:[#allocation2 + $0x500] sm:$0xf]  ;;  %v5201_v45 = vor.u32 %v7282_v39, %v5200_v37  ;;  %3274 = vmatpush.bf16.msra.mxu0 %v4945_v44 }
  0x41   :  { %v7346_v41 = vld [vmem:[#allocation2 + $0x51c] sm:$0xf0] }
  0x42   :  { %v5712_v42 = vld [vmem:[#allocation2 + $0x700] sm:$0xf]  ;;  %v5457_v46 = vor.u32 %v7346_v41, %v5456_v40  ;;  %3287 = vmatpush.bf16.msra.mxu1 %v5201_v45 }
  0x43   :  { %v7410_v43 = vld [vmem:[#allocation2 + $0x71c] sm:$0xf0] }
  0x44   :  { %v4912_v47 = vld [vmem:[#allocation2 + $0xc0] sm:$0xf]  ;;  %v5713_v50 = vor.u32 %v7410_v43, %v5712_v42  ;;  %3300 = vmatpush.bf16.msra.mxu2 %v5457_v46 }
  0x45   :  { %v7210_v48 = vld [vmem:[#allocation2 + $0xdc] sm:$0xf0] }
  0x46   :  { %v5168_v49 = vld [vmem:[#allocation2 + $0x2c0] sm:$0xf]  ;;  %v4913_v56 = vor.u32 %v7210_v48, %v4912_v47  ;;  %3313 = vmatpush.bf16.msra.mxu3 %v5713_v50 }
  0x47   :  { %v7274_v51 = vld [vmem:[#allocation2 + $0x2dc] sm:$0xf0] }
  0x48   :  { %v5424_v52 = vld [vmem:[#allocation2 + $0x4c0] sm:$0xf]  ;;  %v5169_v57 = vor.u32 %v7274_v51, %v5168_v49  ;;  %3275 = vmatpush.bf16.msra.mxu0 %v4913_v56 }
  0x49   :  { %v7338_v53 = vld [vmem:[#allocation2 + $0x4dc] sm:$0xf0] }
  0x4a   :  { %v5680_v54 = vld [vmem:[#allocation2 + $0x6c0] sm:$0xf]  ;;  %v5425_v58 = vor.u32 %v7338_v53, %v5424_v52  ;;  %3288 = vmatpush.bf16.msra.mxu1 %v5169_v57 }
  0x4b   :  { %v7402_v55 = vld [vmem:[#allocation2 + $0x6dc] sm:$0xf0] }
  0x4c   :  { %v4880_v59 = vld [vmem:[#allocation2 + $0x80] sm:$0xf]  ;;  %v5681_v62 = vor.u32 %v7402_v55, %v5680_v54  ;;  %3301 = vmatpush.bf16.msra.mxu2 %v5425_v58  ;;  %v150_v58 = vld [vmem:[%s8261_s0 + $0x8] sm:$0xff] }
  0x4d   :  { %v7202_v60 = vld [vmem:[#allocation2 + $0x9c] sm:$0xf0] }
  0x4e   :  { %v5136_v61 = vld [vmem:[#allocation2 + $0x280] sm:$0xf]  ;;  %v4881_v4 = vor.u32 %v7202_v60, %v4880_v59  ;;  %3314 = vmatpush.bf16.msra.mxu3 %v5681_v62 }
  0x4f   :  { %v7266_v63 = vld [vmem:[#allocation2 + $0x29c] sm:$0xf0] }
  0x50   :  { %v5392_v0 = vld [vmem:[#allocation2 + $0x480] sm:$0xf]  ;;  %v5137_v5 = vor.u32 %v7266_v63, %v5136_v61  ;;  %3276 = vmatpush.bf16.msra.mxu0 %v4881_v4  ;;  %v689_v63 = vunpack.c.l.b16 %v150_v58 }
  0x51   :  { %v7330_v1 = vld [vmem:[#allocation2 + $0x49c] sm:$0xf0] }
  0x52   :  { %v5648_v2 = vld [vmem:[#allocation2 + $0x680] sm:$0xf]  ;;  %v5393_v6 = vor.u32 %v7330_v1, %v5392_v0  ;;  %3289 = vmatpush.bf16.msra.mxu1 %v5137_v5  ;;  %v690_v0 = vunpack.c.h.b16 %v150_v58  ;;  %v8086_v4 = vpack.c.b16 %v689_v63, %v689_v63 }
  0x53   :  { %v7394_v3 = vld [vmem:[#allocation2 + $0x69c] sm:$0xf0] }
  0x54   :  { %v4848_v7 = vld [vmem:[#allocation2 + $0x40] sm:$0xf]  ;;  %v5649_v10 = vor.u32 %v7394_v3, %v5648_v2  ;;  %3302 = vmatpush.bf16.msra.mxu2 %v5393_v6  ;;  %v8091_v6 = vpack.c.b16 %v690_v0, %v690_v0 }
  0x55   :  { %v7194_v8 = vld [vmem:[#allocation2 + $0x5c] sm:$0xf0] }
  0x56   :  { %v5104_v9 = vld [vmem:[#allocation2 + $0x240] sm:$0xf]  ;;  %v4849_v16 = vor.u32 %v7194_v8, %v4848_v7  ;;  %3315 = vmatpush.bf16.msra.mxu3 %v5649_v10 }
  0x57   :  { %v7258_v11 = vld [vmem:[#allocation2 + $0x25c] sm:$0xf0] }
  0x58   :  { %v5360_v12 = vld [vmem:[#allocation2 + $0x440] sm:$0xf]  ;;  %v5105_v19 = vor.u32 %v7258_v11, %v5104_v9  ;;  %3277 = vmatpush.bf16.msra.mxu0 %v4849_v16 }
  0x59   :  { %v7322_v13 = vld [vmem:[#allocation2 + $0x45c] sm:$0xf0] }
  0x5a   :  { %v5616_v14 = vld [vmem:[#allocation2 + $0x640] sm:$0xf]  ;;  %v5361_v20 = vor.u32 %v7322_v13, %v5360_v12  ;;  %3290 = vmatpush.bf16.msra.mxu1 %v5105_v19 }
  0x5b   :  { %v7386_v15 = vld [vmem:[#allocation2 + $0x65c] sm:$0xf0] }
  0x5c   :  { %v4816_v17 = vld [vmem:[#allocation2] sm:$0xf]  ;;  %v5617_v24 = vor.u32 %v7386_v15, %v5616_v14  ;;  %3303 = vmatpush.bf16.msra.mxu2 %v5361_v20 }
  0x5d   :  { %v7186_v18 = vld [vmem:[#allocation2 + $0x1c] sm:$0xf0] }
  0x5e   :  { %v5072_v21 = vld [vmem:[#allocation2 + $0x200] sm:$0xf]  ;;  %v4817_v31 = vor.u32 %v7186_v18, %v4816_v17  ;;  %3316 = vmatpush.bf16.msra.mxu3 %v5617_v24 }
  0x5f   :  { %v7250_v22 = vld [vmem:[#allocation2 + $0x21c] sm:$0xf0] }
  0x60   :  { %v5328_v23 = vld [vmem:[#allocation2 + $0x400] sm:$0xf]  ;;  %v5073_v35 = vor.u32 %v7250_v22, %v5072_v21  ;;  %3278 = vmatpush.bf16.msra.mxu0 %v4817_v31 }
  0x61   :  { %v7314_v25 = vld [vmem:[#allocation2 + $0x41c] sm:$0xf0] }
  0x62   :  { %v5584_v26 = vld [vmem:[#allocation2 + $0x600] sm:$0xf]  ;;  %v5329_v36 = vor.u32 %v7314_v25, %v5328_v23  ;;  %3291 = vmatpush.bf16.msra.mxu1 %v5073_v35 }
  0x63   :  { %v7378_v27 = vld [vmem:[#allocation2 + $0x61c] sm:$0xf0] }
  0x64   :  { %v6064_v28 = vld [vmem:[#allocation2 + $0x9c0] sm:$0xf]  ;;  %v5585_v39 = vor.u32 %v7378_v27, %v5584_v26  ;;  %3304 = vmatpush.bf16.msra.mxu2 %v5329_v36 }
  0x65   :  { %v7498_v29 = vld [vmem:[#allocation2 + $0x9dc] sm:$0xf0] }
  0x66   :  { %v6320_v30 = vld [vmem:[#allocation2 + $0xbc0] sm:$0xf]  ;;  %v6065_v40 = vor.u32 %v7498_v29, %v6064_v28  ;;  %3317 = vmatpush.bf16.msra.mxu3 %v5585_v39 }
  0x67   :  { %v7562_v32 = vld [vmem:[#allocation2 + $0xbdc] sm:$0xf0]  ;;  %3305 = vmatmul.bf16.vlgmr.msra.gmra.mxu2 %v8086_v4 }
  0x68   :  { %v6576_v33 = vld [vmem:[#allocation2 + $0xdc0] sm:$0xf]  ;;  %v6321_v41 = vor.u32 %v7562_v32, %v6320_v30  ;;  %3323 = vmatpush.bf16.msrb.mxu0 %v6065_v40 }
  0x69   :  { %v7626_v34 = vld [vmem:[#allocation2 + $0xddc] sm:$0xf0]  ;;  %3318 = vmatmul.bf16.vlgmr.msra.gmra.mxu3 %v8091_v6 }
  0x6a   :  { %v6832_v37 = vld [vmem:[#allocation2 + $0xfc0] sm:$0xf]  ;;  %v6577_v42 = vor.u32 %v7626_v34, %v6576_v33  ;;  %3336 = vmatpush.bf16.msrb.mxu1 %v6321_v41 }
  0x6b   :  { %v7690_v38 = vld [vmem:[#allocation2 + $0xfdc] sm:$0xf0] }
  0x6c   :  { %v6032_v43 = vld [vmem:[#allocation2 + $0x980] sm:$0xf]  ;;  %v6833_v46 = vor.u32 %v7690_v38, %v6832_v37  ;;  %3349 = vmatpush.bf16.msrb.mxu2 %v6577_v42 }
  0x6d   :  { %v7490_v44 = vld [vmem:[#allocation2 + $0x99c] sm:$0xf0] }
  0x6e   :  { %v6288_v45 = vld [vmem:[#allocation2 + $0xb80] sm:$0xf]  ;;  %v6033_v52 = vor.u32 %v7490_v44, %v6032_v43  ;;  %3362 = vmatpush.bf16.msrb.mxu3 %v6833_v46 }
  0x6f   :  { %v7554_v47 = vld [vmem:[#allocation2 + $0xb9c] sm:$0xf0] }
  0x70   :  { %v6544_v48 = vld [vmem:[#allocation2 + $0xd80] sm:$0xf]  ;;  %v6289_v54 = vor.u32 %v7554_v47, %v6288_v45  ;;  %3324 = vmatpush.bf16.msrb.mxu0 %v6033_v52 }
  0x71   :  { %v7618_v49 = vld [vmem:[#allocation2 + $0xd9c] sm:$0xf0] }
  0x72   :  { %v6800_v50 = vld [vmem:[#allocation2 + $0xf80] sm:$0xf]  ;;  %v6545_v55 = vor.u32 %v7618_v49, %v6544_v48  ;;  %3337 = vmatpush.bf16.msrb.mxu1 %v6289_v54 }
  0x73   :  { %v7682_v51 = vld [vmem:[#allocation2 + $0xf9c] sm:$0xf0] }
  0x74   :  { %v6000_v53 = vld [vmem:[#allocation2 + $0x940] sm:$0xf]  ;;  %v6801_v59 = vor.u32 %v7682_v51, %v6800_v50  ;;  %3350 = vmatpush.bf16.msrb.mxu2 %v6545_v55 }
  0x75   :  { %v7482_v56 = vld [vmem:[#allocation2 + $0x95c] sm:$0xf0] }
  0x76   :  { %v6256_v57 = vld [vmem:[#allocation2 + $0xb40] sm:$0xf]  ;;  %v6001_v3 = vor.u32 %v7482_v56, %v6000_v53  ;;  %3363 = vmatpush.bf16.msrb.mxu3 %v6801_v59 }
  0x77   :  { %v7546_v60 = vld [vmem:[#allocation2 + $0xb5c] sm:$0xf0] }
  0x78   :  { %v6512_v61 = vld [vmem:[#allocation2 + $0xd40] sm:$0xf]  ;;  %v6257_v7 = vor.u32 %v7546_v60, %v6256_v57  ;;  %3325 = vmatpush.bf16.msrb.mxu0 %v6001_v3  ;;  %v152_v3 = vld [vmem:[%s8261_s0 + $0x18] sm:$0xff] }
  0x79   :  { %v7610_v62 = vld [vmem:[#allocation2 + $0xd5c] sm:$0xf0] }
  0x7a   :  { %v6768_v1 = vld [vmem:[#allocation2 + $0xf40] sm:$0xf]  ;;  %v6513_v8 = vor.u32 %v7610_v62, %v6512_v61  ;;  %3338 = vmatpush.bf16.msrb.mxu1 %v6257_v7 }
  0x7b   :  { %v7674_v2 = vld [vmem:[#allocation2 + $0xf5c] sm:$0xf0] }
  0x7c   :  { %v149_v5 = vld [vmem:[%s8261_s0] sm:$0xff]  ;;  %v6769_v14 = vor.u32 %v7674_v2, %v6768_v1  ;;  %3351 = vmatpush.bf16.msrb.mxu2 %v6513_v8 }
  0x7d   :  { %v5968_v9 = vld [vmem:[#allocation2 + $0x900] sm:$0xf]  ;;  %v687_v12 = vunpack.c.l.b16 %v149_v5  ;;  %v688_v13 = vunpack.c.h.b16 %v149_v5 }
  0x7e   :  { %v7474_v10 = vld [vmem:[#allocation2 + $0x91c] sm:$0xf0]  ;;  %3364 = vmatpush.bf16.msrb.mxu3 %v6769_v14  ;;  %v5298_v14 = vld [vmem:[#allocation2 + $0x3e0] sm:$0xf0] }
  0x7f   :  { %v6224_v11 = vld [vmem:[#allocation2 + $0xb00] sm:$0xf]  ;;  %v8094_v20 = vpack.c.b16 %v687_v12, %v687_v12  ;;  %v8097_v21 = vpack.c.b16 %v688_v13, %v688_v13  ;;  %v5969_v22 = vor.u32 %v7474_v10, %v5968_v9  ;;  %v151_v9 = vld [vmem:[%s8261_s0 + $0x10] sm:$0xff]  ;;  %v7238_v10 = vld [vmem:[#allocation2 + $0x1c4] sm:$0xf] }
  0x80   :  { %v7538_v15 = vld [vmem:[#allocation2 + $0xb1c] sm:$0xf0]  ;;  %v7302_v12 = vld [vmem:[#allocation2 + $0x3c4] sm:$0xf] }
  0x81   :  { %v6480_v16 = vld [vmem:[#allocation2 + $0xd00] sm:$0xf]  ;;  %v6225_v23 = vor.u32 %v7538_v15, %v6224_v11  ;;  %3279 = vmatmul.bf16.vlgmr.msra.gmra.mxu0 %v8094_v20  ;;  %3292 = vmatmul.bf16.vlgmr.msra.gmra.mxu1 %v8097_v21  ;;  %v5042_v11 = vld [vmem:[#allocation2 + $0x1e0] sm:$0xf0] }
  0x82   :  { %v7602_v17 = vld [vmem:[#allocation2 + $0xd1c] sm:$0xf0]  ;;  %3326 = vmatpush.bf16.msrb.mxu0 %v5969_v22  ;;  %v7366_v15 = vld [vmem:[#allocation2 + $0x5c4] sm:$0xf] }
  0x83   :  { %v6736_v18 = vld [vmem:[#allocation2 + $0xf00] sm:$0xf]  ;;  %v6481_v24 = vor.u32 %v7602_v17, %v6480_v16  ;;  %3339 = vmatpush.bf16.msrb.mxu1 %v6225_v23  ;;  %v5554_v16 = vld [vmem:[#allocation2 + $0x5e0] sm:$0xf0]  ;;  %v693_v17 = vunpack.c.l.b16 %v152_v3 }
  0x84   :  { %v7666_v19 = vld [vmem:[#allocation2 + $0xf1c] sm:$0xf0]  ;;  %v7430_v22 = vld [vmem:[#allocation2 + $0x7c4] sm:$0xf] }
  0x85   :  { %v5936_v25 = vld [vmem:[#allocation2 + $0x8c0] sm:$0xf]  ;;  %v6737_v28 = vor.u32 %v7666_v19, %v6736_v18  ;;  %3352 = vmatpush.bf16.msrb.mxu2 %v6481_v24  ;;  %v5810_v23 = vld [vmem:[#allocation2 + $0x7e0] sm:$0xf0]  ;;  %v691_v24 = vunpack.c.l.b16 %v151_v9 }
  0x86   :  { %v7466_v26 = vld [vmem:[#allocation2 + $0x8dc] sm:$0xf0] }
  0x87   :  { %v6192_v27 = vld [vmem:[#allocation2 + $0xac0] sm:$0xf]  ;;  %v5937_v34 = vor.u32 %v7466_v26, %v5936_v25  ;;  %3365 = vmatpush.bf16.msrb.mxu3 %v6737_v28  ;;  %v694_v25 = vunpack.c.h.b16 %v152_v3  ;;  %v692_v28 = vunpack.c.h.b16 %v151_v9  ;;  %v5714_v3 = vld [vmem:[#allocation2 + $0x720] sm:$0xf0] }
  0x88   :  { %v7530_v29 = vld [vmem:[#allocation2 + $0xadc] sm:$0xf0]  ;;  %v7206_v9 = vld [vmem:[#allocation2 + $0xc4] sm:$0xf] }
  0x89   :  { %v6448_v30 = vld [vmem:[#allocation2 + $0xcc0] sm:$0xf]  ;;  %v6193_v35 = vor.u32 %v7530_v29, %v6192_v27  ;;  %3327 = vmatpush.bf16.msrb.mxu0 %v5937_v34  ;;  %v5045_v27 = vor.u32 %v7238_v10, %v5042_v11  ;;  %v5301_v29 = vor.u32 %v7302_v12, %v5298_v14  ;;  %v5813_v34 = vor.u32 %v7430_v22, %v5810_v23  ;;  %v4914_v10 = vld [vmem:[#allocation2 + $0xe0] sm:$0xf0] }
  0x8a   :  { %v7594_v31 = vld [vmem:[#allocation2 + $0xcdc] sm:$0xf0]  ;;  %v7270_v11 = vld [vmem:[#allocation2 + $0x2c4] sm:$0xf] }
  0x8b   :  { %v6704_v32 = vld [vmem:[#allocation2 + $0xec0] sm:$0xf]  ;;  %v6449_v36 = vor.u32 %v7594_v31, %v6448_v30  ;;  %3340 = vmatpush.bf16.msrb.mxu1 %v6193_v35  ;;  %v5557_v30 = vor.u32 %v7366_v15, %v5554_v16  ;;  %v7230_v31 = vld [vmem:[#allocation2 + $0x184] sm:$0xf] }
  0x8c   :  { %v7658_v33 = vld [vmem:[#allocation2 + $0xedc] sm:$0xf0]  ;;  %v5266_v35 = vld [vmem:[#allocation2 + $0x3a0] sm:$0xf0] }
  0x8d   :  { %v5904_v37 = vld [vmem:[#allocation2 + $0x880] sm:$0xf]  ;;  %v6705_v40 = vor.u32 %v7658_v33, %v6704_v32  ;;  %3353 = vmatpush.bf16.msrb.mxu2 %v6449_v36  ;;  %v5010_v32 = vld [vmem:[#allocation2 + $0x1a0] sm:$0xf0] }
  0x8e   :  { %v7458_v38 = vld [vmem:[#allocation2 + $0x89c] sm:$0xf0]  ;;  %v7294_v33 = vld [vmem:[#allocation2 + $0x384] sm:$0xf] }
  0x8f   :  { %v6160_v39 = vld [vmem:[#allocation2 + $0xa80] sm:$0xf]  ;;  %v5905_v46 = vor.u32 %v7458_v38, %v5904_v37  ;;  %3366 = vmatpush.bf16.msrb.mxu3 %v6705_v40  ;;  %v7358_v36 = vld [vmem:[#allocation2 + $0x584] sm:$0xf]  ;;  %v8107_v38 = vpack.c.b16 %v693_v17, %v693_v17 }
  0x90   :  { %v7522_v41 = vld [vmem:[#allocation2 + $0xa9c] sm:$0xf0]  ;;  %v5522_v37 = vld [vmem:[#allocation2 + $0x5a0] sm:$0xf0] }
  0x91   :  { %v6416_v42 = vld [vmem:[#allocation2 + $0xc80] sm:$0xf]  ;;  %v6161_v47 = vor.u32 %v7522_v41, %v6160_v39  ;;  %3328 = vmatpush.bf16.msrb.mxu0 %v5905_v46  ;;  %v7422_v39 = vld [vmem:[#allocation2 + $0x784] sm:$0xf]  ;;  %v8109_v41 = vpack.c.b16 %v691_v24, %v691_v24  ;;  %v5525_v46 = vor.u32 %v7358_v36, %v5522_v37 }
  0x92   :  { %v7586_v43 = vld [vmem:[#allocation2 + $0xc9c] sm:$0xf0]  ;;  %v5778_v40 = vld [vmem:[#allocation2 + $0x7a0] sm:$0xf0] }
  0x93   :  { %v6672_v44 = vld [vmem:[#allocation2 + $0xe80] sm:$0xf]  ;;  %v6417_v48 = vor.u32 %v7586_v43, %v6416_v42  ;;  %3341 = vmatpush.bf16.msrb.mxu1 %v6161_v47  ;;  %v8111_v42 = vpack.c.b16 %v694_v25, %v694_v25  ;;  %v5013_v43 = vor.u32 %v7230_v31, %v5010_v32  ;;  %v7222_v47 = vld [vmem:[#allocation2 + $0x144] sm:$0xf] }
  0x94   :  { %v7650_v45 = vld [vmem:[#allocation2 + $0xe9c] sm:$0xf0]  ;;  %v7334_v14 = vld [vmem:[#allocation2 + $0x4c4] sm:$0xf] }
  0x95   :  { %v5872_v49 = vld [vmem:[#allocation2 + $0x840] sm:$0xf]  ;;  %v6673_v52 = vor.u32 %v7650_v45, %v6672_v44  ;;  %3354 = vmatpush.bf16.msrb.mxu2 %v6417_v48  ;;  %v8113_v44 = vpack.c.b16 %v692_v28, %v692_v28  ;;  %v5269_v45 = vor.u32 %v7294_v33, %v5266_v35  ;;  %v4978_v48 = vld [vmem:[#allocation2 + $0x160] sm:$0xf0] }
  0x96   :  { %v7450_v50 = vld [vmem:[#allocation2 + $0x85c] sm:$0xf0]  ;;  %v5426_v15 = vld [vmem:[#allocation2 + $0x4e0] sm:$0xf0] }
  0x97   :  { %v6128_v51 = vld [vmem:[#allocation2 + $0xa40] sm:$0xf]  ;;  %v5873_v59 = vor.u32 %v7450_v50, %v5872_v49  ;;  %3367 = vmatpush.bf16.msrb.mxu3 %v6673_v52  ;;  %v7286_v49 = vld [vmem:[#allocation2 + $0x344] sm:$0xf]  ;;  %v5781_v50 = vor.u32 %v7422_v39, %v5778_v40  ;;  %v5429_v22 = vor.u32 %v7334_v14, %v5426_v15 }
  0x98   :  { %v7514_v53 = vld [vmem:[#allocation2 + $0xa5c] sm:$0xf0]  ;;  %v7350_v52 = vld [vmem:[#allocation2 + $0x544] sm:$0xf] }
  0x99   :  { %v6384_v54 = vld [vmem:[#allocation2 + $0xc40] sm:$0xf]  ;;  %v6129_v63 = vor.u32 %v7514_v53, %v6128_v51  ;;  %3329 = vmatpush.bf16.msrb.mxu0 %v5873_v59  ;;  %v5234_v51 = vld [vmem:[#allocation2 + $0x360] sm:$0xf0] }
  0x9a   :  { %v7578_v55 = vld [vmem:[#allocation2 + $0xc5c] sm:$0xf0]  ;;  %v5490_v53 = vld [vmem:[#allocation2 + $0x560] sm:$0xf0] }
  0x9b   :  { %v6640_v56 = vld [vmem:[#allocation2 + $0xe40] sm:$0xf]  ;;  %v6385_v0 = vor.u32 %v7578_v55, %v6384_v54  ;;  %3342 = vmatpush.bf16.msrb.mxu1 %v6129_v63  ;;  %v7414_v54 = vld [vmem:[#allocation2 + $0x744] sm:$0xf] }
  0x9c   :  { %v7642_v57 = vld [vmem:[#allocation2 + $0xe5c] sm:$0xf0]  ;;  %v5746_v55 = vld [vmem:[#allocation2 + $0x760] sm:$0xf0] }
  0x9d   :  { %v5840_v58 = vld [vmem:[#allocation2 + $0x800] sm:$0xf]  ;;  %v6641_v5 = vor.u32 %v7642_v57, %v6640_v56  ;;  %3355 = vmatpush.bf16.msrb.mxu2 %v6385_v0  ;;  %v4981_v56 = vor.u32 %v7222_v47, %v4978_v48  ;;  %v5237_v57 = vor.u32 %v7286_v49, %v5234_v51  ;;  %v7214_v59 = vld [vmem:[#allocation2 + $0x104] sm:$0xf] }
  0x9e   :  { %v7442_v60 = vld [vmem:[#allocation2 + $0x81c] sm:$0xf0]  ;;  %v5202_v63 = vld [vmem:[#allocation2 + $0x320] sm:$0xf0] }
  0x9f   :  { %v6096_v61 = vld [vmem:[#allocation2 + $0xa00] sm:$0xf]  ;;  %v5841_v13 = vor.u32 %v7442_v60, %v5840_v58  ;;  %3368 = vmatpush.bf16.msrb.mxu3 %v6641_v5  ;;  %v5493_v58 = vor.u32 %v7350_v52, %v5490_v53  ;;  %v4946_v60 = vld [vmem:[#allocation2 + $0x120] sm:$0xf0] }
  0xa0   :  { %v7506_v62 = vld [vmem:[#allocation2 + $0xa1c] sm:$0xf0]  ;;  %v7342_v0 = vld [vmem:[#allocation2 + $0x504] sm:$0xf]  ;;  %v4949_v5 = vor.u32 %v7214_v59, %v4946_v60 }
  0xa1   :  { %v6352_v1 = vld [vmem:[#allocation2 + $0xc00] sm:$0xf]  ;;  %v6097_v18 = vor.u32 %v7506_v62, %v6096_v61  ;;  %3330 = vmatpush.bf16.msrb.mxu0 %v5841_v13  ;;  %v7278_v61 = vld [vmem:[#allocation2 + $0x304] sm:$0xf]  ;;  %v5749_v62 = vor.u32 %v7414_v54, %v5746_v55 }
  0xa2   :  { %v7570_v2 = vld [vmem:[#allocation2 + $0xc1c] sm:$0xf0]  ;;  %v5170_v13 = vld [vmem:[#allocation2 + $0x2e0] sm:$0xf0] }
  0xa3   :  { %v6608_v7 = vld [vmem:[#allocation2 + $0xe00] sm:$0xf]  ;;  %v6353_v19 = vor.u32 %v7570_v2, %v6352_v1  ;;  %3343 = vmatpush.bf16.msrb.mxu1 %v6097_v18  ;;  %v5458_v1 = vld [vmem:[#allocation2 + $0x520] sm:$0xf0]  ;;  %v4917_v18 = vor.u32 %v7206_v9, %v4914_v10 }
  0xa4   :  { %v7634_v8 = vld [vmem:[#allocation2 + $0xe1c] sm:$0xf0]  ;;  %3331 = vmatmul.bf16.vlgmr.msrb.gmra.mxu0 %v8109_v41  ;;  %v7406_v2 = vld [vmem:[#allocation2 + $0x704] sm:$0xf] }
  0xa5   :  { %v6609_v26 = vor.u32 %v7634_v8, %v6608_v7  ;;  %3356 = vmatpush.bf16.msrb.mxu2 %v6353_v19  ;;  %3375 = vmatpush.bf16.msra.mxu0 %v5045_v27  ;;  %v5205_v7 = vor.u32 %v7278_v61, %v5202_v63  ;;  %v5461_v8 = vor.u32 %v7342_v0, %v5458_v1  ;;  %v7398_v16 = vld [vmem:[#allocation2 + $0x6c4] sm:$0xf] }
  0xa6   :  { %3344 = vmatmul.bf16.vlgmr.msrb.gmra.mxu1 %v8113_v44  ;;  %v5717_v12 = vor.u32 %v7406_v2, %v5714_v3  ;;  %v5682_v17 = vld [vmem:[#allocation2 + $0x6e0] sm:$0xf0]  ;;  %v5173_v19 = vor.u32 %v7270_v11, %v5170_v13 }
  0xa7   :  { %3369 = vmatpush.bf16.msrb.mxu3 %v6609_v26  ;;  %3388 = vmatpush.bf16.msra.mxu1 %v5301_v29  ;;  %v7198_v23 = vld [vmem:[#allocation2 + $0x84] sm:$0xf]  ;;  %v5685_v26 = vor.u32 %v7398_v16, %v5682_v17 }
  0xa8   :  { %3357 = vmatmul.bf16.vlgmr.msrb.gmra.mxu2 %v8107_v38  ;;  %v4882_v24 = vld [vmem:[#allocation2 + $0xa0] sm:$0xf0] }
  0xa9   :  { %3401 = vmatpush.bf16.msra.mxu2 %v5557_v30  ;;  %3376 = vmatpush.bf16.msra.mxu0 %v5013_v43  ;;  %v7262_v25 = vld [vmem:[#allocation2 + $0x284] sm:$0xf]  ;;  %v4885_v32 = vor.u32 %v7198_v23, %v4882_v24 }
  0xaa   :  { %3370 = vmatmul.bf16.vlgmr.msrb.gmra.mxu3 %v8111_v42  ;;  %v5138_v27 = vld [vmem:[#allocation2 + $0x2a0] sm:$0xf0] }
  0xab   :  { %3414 = vmatpush.bf16.msra.mxu3 %v5813_v34  ;;  %3389 = vmatpush.bf16.msra.mxu1 %v5269_v45  ;;  %v7326_v28 = vld [vmem:[#allocation2 + $0x484] sm:$0xf]  ;;  %v5141_v33 = vor.u32 %v7262_v25, %v5138_v27 }
  0xac   :  { %v5394_v29 = vld [vmem:[#allocation2 + $0x4a0] sm:$0xf0] }
  0xad   :  { %3402 = vmatpush.bf16.msra.mxu2 %v5525_v46  ;;  %3377 = vmatpush.bf16.msra.mxu0 %v4981_v56  ;;  %v7390_v30 = vld [vmem:[#allocation2 + $0x684] sm:$0xf]  ;;  %v5397_v34 = vor.u32 %v7326_v28, %v5394_v29 }
  0xae   :  { %v5650_v31 = vld [vmem:[#allocation2 + $0x6a0] sm:$0xf0] }
  0xaf   :  { %3415 = vmatpush.bf16.msra.mxu3 %v5781_v50  ;;  %3390 = vmatpush.bf16.msra.mxu1 %v5237_v57  ;;  %v7190_v35 = vld [vmem:[#allocation2 + $0x44] sm:$0xf]  ;;  %v5653_v39 = vor.u32 %v7390_v30, %v5650_v31 }
  0xb0   :  { %v4850_v36 = vld [vmem:[#allocation2 + $0x60] sm:$0xf0] }
  0xb1   :  { %3403 = vmatpush.bf16.msra.mxu2 %v5493_v58  ;;  %3378 = vmatpush.bf16.msra.mxu0 %v4949_v5  ;;  %v7254_v37 = vld [vmem:[#allocation2 + $0x244] sm:$0xf]  ;;  %v4853_v48 = vor.u32 %v7190_v35, %v4850_v36 }
  0xb2   :  { %v5106_v40 = vld [vmem:[#allocation2 + $0x260] sm:$0xf0] }
  0xb3   :  { %3416 = vmatpush.bf16.msra.mxu3 %v5749_v62  ;;  %3391 = vmatpush.bf16.msra.mxu1 %v5205_v7  ;;  %v7318_v43 = vld [vmem:[#allocation2 + $0x444] sm:$0xf]  ;;  %v5109_v51 = vor.u32 %v7254_v37, %v5106_v40 }
  0xb4   :  { %v5362_v45 = vld [vmem:[#allocation2 + $0x460] sm:$0xf0] }
  0xb5   :  { %3404 = vmatpush.bf16.msra.mxu2 %v5461_v8  ;;  %3379 = vmatpush.bf16.msra.mxu0 %v4917_v18  ;;  %v7382_v46 = vld [vmem:[#allocation2 + $0x644] sm:$0xf]  ;;  %v5365_v52 = vor.u32 %v7318_v43, %v5362_v45 }
  0xb6   :  { %v5618_v47 = vld [vmem:[#allocation2 + $0x660] sm:$0xf0] }
  0xb7   :  { %3417 = vmatpush.bf16.msra.mxu3 %v5717_v12  ;;  %3392 = vmatpush.bf16.msra.mxu1 %v5173_v19  ;;  %v7182_v49 = vld [vmem:[#allocation2 + $0x4] sm:$0xf]  ;;  %v5621_v56 = vor.u32 %v7382_v46, %v5618_v47 }
  0xb8   :  { %v4818_v50 = vld [vmem:[#allocation2 + $0x20] sm:$0xf0] }
  0xb9   :  { %3405 = vmatpush.bf16.msra.mxu2 %v5429_v22  ;;  %3380 = vmatpush.bf16.msra.mxu0 %v4885_v32  ;;  %v7246_v53 = vld [vmem:[#allocation2 + $0x204] sm:$0xf]  ;;  %v4821_v63 = vor.u32 %v7182_v49, %v4818_v50 }
  0xba   :  { %v5074_v54 = vld [vmem:[#allocation2 + $0x220] sm:$0xf0] }
  0xbb   :  { %3418 = vmatpush.bf16.msra.mxu3 %v5685_v26  ;;  %3393 = vmatpush.bf16.msra.mxu1 %v5141_v33  ;;  %v7310_v55 = vld [vmem:[#allocation2 + $0x404] sm:$0xf]  ;;  %v5077_v3 = vor.u32 %v7246_v53, %v5074_v54 }
  0xbc   :  { %v5330_v57 = vld [vmem:[#allocation2 + $0x420] sm:$0xf0] }
  0xbd   :  { %3406 = vmatpush.bf16.msra.mxu2 %v5397_v34  ;;  %v7374_v58 = vld [vmem:[#allocation2 + $0x604] sm:$0xf]  ;;  %3381 = vmatpush.bf16.msra.mxu0 %v4853_v48  ;;  %v5333_v5 = vor.u32 %v7310_v55, %v5330_v57 }
  0xbe   :  { %v5586_v59 = vld [vmem:[#allocation2 + $0x620] sm:$0xf0] }
  0xbf   :  { %3419 = vmatpush.bf16.msra.mxu3 %v5653_v39  ;;  %v7494_v60 = vld [vmem:[#allocation2 + $0x9c4] sm:$0xf]  ;;  %3394 = vmatpush.bf16.msra.mxu1 %v5109_v51  ;;  %v5589_v9 = vor.u32 %v7374_v58, %v5586_v59 }
  0xc0   :  { %v6066_v61 = vld [vmem:[#allocation2 + $0x9e0] sm:$0xf0] }
  0xc1   :  { %v7558_v62 = vld [vmem:[#allocation2 + $0xbc4] sm:$0xf]  ;;  %3407 = vmatpush.bf16.msra.mxu2 %v5365_v52  ;;  %v6069_v10 = vor.u32 %v7494_v60, %v6066_v61  ;;  %3382 = vmatpush.bf16.msra.mxu0 %v4821_v63 }
  0xc2   :  { %v6322_v0 = vld [vmem:[#allocation2 + $0xbe0] sm:$0xf0] }
  0xc3   :  { %v7622_v1 = vld [vmem:[#allocation2 + $0xdc4] sm:$0xf]  ;;  %3420 = vmatpush.bf16.msra.mxu3 %v5621_v56  ;;  %v6325_v11 = vor.u32 %v7558_v62, %v6322_v0  ;;  %3395 = vmatpush.bf16.msra.mxu1 %v5077_v3 }
  0xc4   :  { %v6578_v2 = vld [vmem:[#allocation2 + $0xde0] sm:$0xf0]  ;;  %3383 = vmatmul.bf16.vlgmr.msra.gmra.mxu0 %v8094_v20 }
  0xc5   :  { %v7686_v7 = vld [vmem:[#allocation2 + $0xfc4] sm:$0xf]  ;;  %v6581_v12 = vor.u32 %v7622_v1, %v6578_v2  ;;  %3408 = vmatpush.bf16.msra.mxu2 %v5333_v5  ;;  %3427 = vmatpush.bf16.msrb.mxu0 %v6069_v10 }
  0xc6   :  { %v6834_v8 = vld [vmem:[#allocation2 + $0xfe0] sm:$0xf0]  ;;  %3396 = vmatmul.bf16.vlgmr.msra.gmra.mxu1 %v8097_v21 }
  0xc7   :  { %v7486_v13 = vld [vmem:[#allocation2 + $0x984] sm:$0xf]  ;;  %v6837_v16 = vor.u32 %v7686_v7, %v6834_v8  ;;  %3421 = vmatpush.bf16.msra.mxu3 %v5589_v9  ;;  %3440 = vmatpush.bf16.msrb.mxu1 %v6325_v11 }
  0xc8   :  { %v6034_v14 = vld [vmem:[#allocation2 + $0x9a0] sm:$0xf0]  ;;  %3409 = vmatmul.bf16.vlgmr.msra.gmra.mxu2 %v8086_v4 }
  0xc9   :  { %v7550_v15 = vld [vmem:[#allocation2 + $0xb84] sm:$0xf]  ;;  %v6037_v24 = vor.u32 %v7486_v13, %v6034_v14  ;;  %3453 = vmatpush.bf16.msrb.mxu2 %v6581_v12 }
  0xca   :  { %v6290_v17 = vld [vmem:[#allocation2 + $0xba0] sm:$0xf0]  ;;  %3422 = vmatmul.bf16.vlgmr.msra.gmra.mxu3 %v8091_v6 }
  0xcb   :  { %v7614_v18 = vld [vmem:[#allocation2 + $0xd84] sm:$0xf]  ;;  %v6293_v25 = vor.u32 %v7550_v15, %v6290_v17  ;;  %3466 = vmatpush.bf16.msrb.mxu3 %v6837_v16  ;;  %3428 = vmatpush.bf16.msrb.mxu0 %v6037_v24 }
  0xcc   :  { %v6546_v19 = vld [vmem:[#allocation2 + $0xda0] sm:$0xf0] }
  0xcd   :  { %v7678_v22 = vld [vmem:[#allocation2 + $0xf84] sm:$0xf]  ;;  %v6549_v26 = vor.u32 %v7614_v18, %v6546_v19  ;;  %3441 = vmatpush.bf16.msrb.mxu1 %v6293_v25 }
  0xce   :  { %v6802_v23 = vld [vmem:[#allocation2 + $0xfa0] sm:$0xf0] }
  0xcf   :  { %v7478_v27 = vld [vmem:[#allocation2 + $0x944] sm:$0xf]  ;;  %v6805_v30 = vor.u32 %v7678_v22, %v6802_v23  ;;  %3454 = vmatpush.bf16.msrb.mxu2 %v6549_v26 }
  0xd0   :  { %v6002_v28 = vld [vmem:[#allocation2 + $0x960] sm:$0xf0] }
  0xd1   :  { %v7542_v29 = vld [vmem:[#allocation2 + $0xb44] sm:$0xf]  ;;  %v6005_v36 = vor.u32 %v7478_v27, %v6002_v28  ;;  %3467 = vmatpush.bf16.msrb.mxu3 %v6805_v30 }
  0xd2   :  { %v6258_v31 = vld [vmem:[#allocation2 + $0xb60] sm:$0xf0] }
  0xd3   :  { %v7606_v32 = vld [vmem:[#allocation2 + $0xd44] sm:$0xf]  ;;  %v6261_v37 = vor.u32 %v7542_v29, %v6258_v31  ;;  %3429 = vmatpush.bf16.msrb.mxu0 %v6005_v36 }
  0xd4   :  { %v6514_v33 = vld [vmem:[#allocation2 + $0xd60] sm:$0xf0] }
  0xd5   :  { %v7670_v34 = vld [vmem:[#allocation2 + $0xf44] sm:$0xf]  ;;  %v6517_v39 = vor.u32 %v7606_v32, %v6514_v33  ;;  %3442 = vmatpush.bf16.msrb.mxu1 %v6261_v37 }
  0xd6   :  { %v6770_v35 = vld [vmem:[#allocation2 + $0xf60] sm:$0xf0] }
  0xd7   :  { %v7470_v40 = vld [vmem:[#allocation2 + $0x904] sm:$0xf]  ;;  %v6773_v46 = vor.u32 %v7670_v34, %v6770_v35  ;;  %3455 = vmatpush.bf16.msrb.mxu2 %v6517_v39 }
  0xd8   :  { %v5970_v43 = vld [vmem:[#allocation2 + $0x920] sm:$0xf0] }
  0xd9   :  { %v7534_v45 = vld [vmem:[#allocation2 + $0xb04] sm:$0xf]  ;;  %v5973_v52 = vor.u32 %v7470_v40, %v5970_v43  ;;  %3468 = vmatpush.bf16.msrb.mxu3 %v6773_v46  ;;  %v5048_v43 = vld [vmem:[#allocation2 + $0x1c8] sm:$0xf] }
  0xda   :  { %v6226_v47 = vld [vmem:[#allocation2 + $0xb20] sm:$0xf0]  ;;  %v5304_v46 = vld [vmem:[#allocation2 + $0x3c8] sm:$0xf] }
  0xdb   :  { %v7598_v48 = vld [vmem:[#allocation2 + $0xd04] sm:$0xf]  ;;  %v6229_v53 = vor.u32 %v7534_v45, %v6226_v47  ;;  %3430 = vmatpush.bf16.msrb.mxu0 %v5973_v52  ;;  %v7243_v45 = vld [vmem:[#allocation2 + $0x1e4] sm:$0xf0] }
  0xdc   :  { %v6482_v49 = vld [vmem:[#allocation2 + $0xd20] sm:$0xf0] }
  0xdd   :  { %v7662_v50 = vld [vmem:[#allocation2 + $0xf04] sm:$0xf]  ;;  %v6485_v54 = vor.u32 %v7598_v48, %v6482_v49  ;;  %3443 = vmatpush.bf16.msrb.mxu1 %v6229_v53  ;;  %v7307_v48 = vld [vmem:[#allocation2 + $0x3e4] sm:$0xf0] }
  0xde   :  { %v6738_v51 = vld [vmem:[#allocation2 + $0xf20] sm:$0xf0]  ;;  %v5560_v49 = vld [vmem:[#allocation2 + $0x5c8] sm:$0xf] }
  0xdf   :  { %v7462_v55 = vld [vmem:[#allocation2 + $0x8c4] sm:$0xf]  ;;  %v6741_v58 = vor.u32 %v7662_v50, %v6738_v51  ;;  %3456 = vmatpush.bf16.msrb.mxu2 %v6485_v54  ;;  %v7371_v50 = vld [vmem:[#allocation2 + $0x5e4] sm:$0xf0] }
  0xe0   :  { %v5938_v56 = vld [vmem:[#allocation2 + $0x8e0] sm:$0xf0]  ;;  %v5816_v53 = vld [vmem:[#allocation2 + $0x7c8] sm:$0xf] }
  0xe1   :  { %v7526_v57 = vld [vmem:[#allocation2 + $0xac4] sm:$0xf]  ;;  %v5941_v0 = vor.u32 %v7462_v55, %v5938_v56  ;;  %3469 = vmatpush.bf16.msrb.mxu3 %v6741_v58  ;;  %v7435_v54 = vld [vmem:[#allocation2 + $0x7e4] sm:$0xf0]  ;;  %v5049_v56 = vor.u32 %v7243_v45, %v5048_v43  ;;  %v5561_v58 = vor.u32 %v7371_v50, %v5560_v49 }
  0xe2   :  { %v6194_v59 = vld [vmem:[#allocation2 + $0xae0] sm:$0xf0]  ;;  %v5432_v43 = vld [vmem:[#allocation2 + $0x4c8] sm:$0xf] }
  0xe3   :  { %v7590_v60 = vld [vmem:[#allocation2 + $0xcc4] sm:$0xf]  ;;  %v6197_v1 = vor.u32 %v7526_v57, %v6194_v59  ;;  %3431 = vmatpush.bf16.msrb.mxu0 %v5941_v0  ;;  %v5305_v57 = vor.u32 %v7307_v48, %v5304_v46  ;;  %v5016_v59 = vld [vmem:[#allocation2 + $0x188] sm:$0xf] }
  0xe4   :  { %v6450_v61 = vld [vmem:[#allocation2 + $0xce0] sm:$0xf0]  ;;  %v5528_v0 = vld [vmem:[#allocation2 + $0x588] sm:$0xf] }
  0xe5   :  { %v7654_v62 = vld [vmem:[#allocation2 + $0xec4] sm:$0xf]  ;;  %v6453_v2 = vor.u32 %v7590_v60, %v6450_v61  ;;  %3444 = vmatpush.bf16.msrb.mxu1 %v6197_v1  ;;  %v7235_v60 = vld [vmem:[#allocation2 + $0x1a4] sm:$0xf0] }
  0xe6   :  { %v6706_v63 = vld [vmem:[#allocation2 + $0xee0] sm:$0xf0]  ;;  %v5272_v61 = vld [vmem:[#allocation2 + $0x388] sm:$0xf] }
  0xe7   :  { %v7454_v3 = vld [vmem:[#allocation2 + $0x884] sm:$0xf]  ;;  %v6709_v8 = vor.u32 %v7654_v62, %v6706_v63  ;;  %3457 = vmatpush.bf16.msrb.mxu2 %v6453_v2  ;;  %v5817_v62 = vor.u32 %v7435_v54, %v5816_v53  ;;  %v7299_v63 = vld [vmem:[#allocation2 + $0x3a4] sm:$0xf0] }
  0xe8   :  { %v5906_v5 = vld [vmem:[#allocation2 + $0x8a0] sm:$0xf0]  ;;  %v7363_v1 = vld [vmem:[#allocation2 + $0x5a4] sm:$0xf0] }
  0xe9   :  { %v7518_v7 = vld [vmem:[#allocation2 + $0xa84] sm:$0xf]  ;;  %v5909_v14 = vor.u32 %v7454_v3, %v5906_v5  ;;  %3470 = vmatpush.bf16.msrb.mxu3 %v6709_v8  ;;  %v5784_v2 = vld [vmem:[#allocation2 + $0x788] sm:$0xf]  ;;  %v5017_v5 = vor.u32 %v7235_v60, %v5016_v59  ;;  %v5529_v8 = vor.u32 %v7363_v1, %v5528_v0 }
  0xea   :  { %v6162_v9 = vld [vmem:[#allocation2 + $0xaa0] sm:$0xf0]  ;;  %v7427_v3 = vld [vmem:[#allocation2 + $0x7a4] sm:$0xf0] }
  0xeb   :  { %v7582_v10 = vld [vmem:[#allocation2 + $0xc84] sm:$0xf]  ;;  %v6165_v15 = vor.u32 %v7518_v7, %v6162_v9  ;;  %3432 = vmatpush.bf16.msrb.mxu0 %v5909_v14  ;;  %v5273_v7 = vor.u32 %v7299_v63, %v5272_v61  ;;  %v4984_v9 = vld [vmem:[#allocation2 + $0x148] sm:$0xf] }
  0xec   :  { %v6418_v11 = vld [vmem:[#allocation2 + $0xca0] sm:$0xf0]  ;;  %v5496_v14 = vld [vmem:[#allocation2 + $0x548] sm:$0xf] }
  0xed   :  { %v7646_v12 = vld [vmem:[#allocation2 + $0xe84] sm:$0xf]  ;;  %v6421_v16 = vor.u32 %v7582_v10, %v6418_v11  ;;  %3445 = vmatpush.bf16.msrb.mxu1 %v6165_v15  ;;  %v7227_v10 = vld [vmem:[#allocation2 + $0x164] sm:$0xf0] }
  0xee   :  { %v6674_v13 = vld [vmem:[#allocation2 + $0xea0] sm:$0xf0]  ;;  %v5240_v11 = vld [vmem:[#allocation2 + $0x348] sm:$0xf] }
  0xef   :  { %v7446_v17 = vld [vmem:[#allocation2 + $0x844] sm:$0xf]  ;;  %v6677_v22 = vor.u32 %v7646_v12, %v6674_v13  ;;  %3458 = vmatpush.bf16.msrb.mxu2 %v6421_v16  ;;  %v5785_v12 = vor.u32 %v7427_v3, %v5784_v2  ;;  %v7291_v13 = vld [vmem:[#allocation2 + $0x364] sm:$0xf0] }
  0xf0   :  { %v5874_v18 = vld [vmem:[#allocation2 + $0x860] sm:$0xf0]  ;;  %v7355_v15 = vld [vmem:[#allocation2 + $0x564] sm:$0xf0] }
  0xf1   :  { %v7510_v19 = vld [vmem:[#allocation2 + $0xa44] sm:$0xf]  ;;  %v5877_v28 = vor.u32 %v7446_v17, %v5874_v18  ;;  %3471 = vmatpush.bf16.msrb.mxu3 %v6677_v22  ;;  %v5752_v16 = vld [vmem:[#allocation2 + $0x748] sm:$0xf]  ;;  %v4985_v18 = vor.u32 %v7227_v10, %v4984_v9  ;;  %v5497_v22 = vor.u32 %v7355_v15, %v5496_v14 }
  0xf2   :  { %v6130_v23 = vld [vmem:[#allocation2 + $0xa60] sm:$0xf0]  ;;  %v7419_v17 = vld [vmem:[#allocation2 + $0x764] sm:$0xf0] }
  0xf3   :  { %v7574_v24 = vld [vmem:[#allocation2 + $0xc44] sm:$0xf]  ;;  %v6133_v31 = vor.u32 %v7510_v19, %v6130_v23  ;;  %3433 = vmatpush.bf16.msrb.mxu0 %v5877_v28  ;;  %v5241_v19 = vor.u32 %v7291_v13, %v5240_v11  ;;  %v4952_v23 = vld [vmem:[#allocation2 + $0x108] sm:$0xf] }
  0xf4   :  { %v6386_v25 = vld [vmem:[#allocation2 + $0xc60] sm:$0xf0]  ;;  %v5464_v28 = vld [vmem:[#allocation2 + $0x508] sm:$0xf] }
  0xf5   :  { %v7638_v26 = vld [vmem:[#allocation2 + $0xe44] sm:$0xf]  ;;  %v6389_v32 = vor.u32 %v7574_v24, %v6386_v25  ;;  %3446 = vmatpush.bf16.msrb.mxu1 %v6133_v31  ;;  %v7219_v24 = vld [vmem:[#allocation2 + $0x124] sm:$0xf0] }
  0xf6   :  { %v6642_v27 = vld [vmem:[#allocation2 + $0xe60] sm:$0xf0]  ;;  %v5208_v25 = vld [vmem:[#allocation2 + $0x308] sm:$0xf] }
  0xf7   :  { %v7438_v29 = vld [vmem:[#allocation2 + $0x804] sm:$0xf]  ;;  %v6645_v36 = vor.u32 %v7638_v26, %v6642_v27  ;;  %3459 = vmatpush.bf16.msrb.mxu2 %v6389_v32  ;;  %v5753_v26 = vor.u32 %v7419_v17, %v5752_v16  ;;  %v7283_v27 = vld [vmem:[#allocation2 + $0x324] sm:$0xf0]  ;;  %v4953_v32 = vor.u32 %v7219_v24, %v4952_v23 }
  0xf8   :  { %v5842_v30 = vld [vmem:[#allocation2 + $0x820] sm:$0xf0]  ;;  %v7411_v31 = vld [vmem:[#allocation2 + $0x724] sm:$0xf0] }
  0xf9   :  { %v7502_v33 = vld [vmem:[#allocation2 + $0xa04] sm:$0xf]  ;;  %v5845_v47 = vor.u32 %v7438_v29, %v5842_v30  ;;  %3472 = vmatpush.bf16.msrb.mxu3 %v6645_v36  ;;  %v7347_v29 = vld [vmem:[#allocation2 + $0x524] sm:$0xf0] }
  0xfa   :  { %v6098_v34 = vld [vmem:[#allocation2 + $0xa20] sm:$0xf0]  ;;  %v5720_v30 = vld [vmem:[#allocation2 + $0x708] sm:$0xf] }
  0xfb   :  { %v7566_v35 = vld [vmem:[#allocation2 + $0xc04] sm:$0xf]  ;;  %v6101_v51 = vor.u32 %v7502_v33, %v6098_v34  ;;  %3434 = vmatpush.bf16.msrb.mxu0 %v5845_v47  ;;  %v5209_v33 = vor.u32 %v7283_v27, %v5208_v25  ;;  %v5465_v34 = vor.u32 %v7347_v29, %v5464_v28  ;;  %v7211_v36 = vld [vmem:[#allocation2 + $0xe4] sm:$0xf0] }
  0xfc   :  { %v6354_v37 = vld [vmem:[#allocation2 + $0xc20] sm:$0xf0]  ;;  %v7339_v45 = vld [vmem:[#allocation2 + $0x4e4] sm:$0xf0] }
  0xfd   :  { %v7630_v39 = vld [vmem:[#allocation2 + $0xe04] sm:$0xf]  ;;  %v6357_v52 = vor.u32 %v7566_v35, %v6354_v37  ;;  %3447 = vmatpush.bf16.msrb.mxu1 %v6101_v51  ;;  %v4920_v35 = vld [vmem:[#allocation2 + $0xc8] sm:$0xf]  ;;  %v5433_v50 = vor.u32 %v7339_v45, %v5432_v43 }
  0xfe   :  { %v6610_v40 = vld [vmem:[#allocation2 + $0xe20] sm:$0xf0]  ;;  %3435 = vmatmul.bf16.vlgmr.msrb.gmra.mxu0 %v8109_v41  ;;  %v5176_v37 = vld [vmem:[#allocation2 + $0x2c8] sm:$0xf]  ;;  %v4921_v48 = vor.u32 %v7211_v36, %v4920_v35 }
  0xff   :  { %v6613_v55 = vor.u32 %v7630_v39, %v6610_v40  ;;  %3460 = vmatpush.bf16.msrb.mxu2 %v6357_v52  ;;  %3479 = vmatpush.bf16.msra.mxu0 %v5049_v56  ;;  %v5721_v39 = vor.u32 %v7411_v31, %v5720_v30  ;;  %v7275_v40 = vld [vmem:[#allocation2 + $0x2e4] sm:$0xf0] }
 0x100   :  { %3448 = vmatmul.bf16.vlgmr.msrb.gmra.mxu1 %v8113_v44  ;;  %v5688_v46 = vld [vmem:[#allocation2 + $0x6c8] sm:$0xf]  ;;  %v5177_v49 = vor.u32 %v7275_v40, %v5176_v37 }
 0x101   :  { %3473 = vmatpush.bf16.msrb.mxu3 %v6613_v55  ;;  %3492 = vmatpush.bf16.msra.mxu1 %v5305_v57  ;;  %v7403_v47 = vld [vmem:[#allocation2 + $0x6e4] sm:$0xf0] }
 0x102   :  { %3461 = vmatmul.bf16.vlgmr.msrb.gmra.mxu2 %v8107_v38  ;;  %v4888_v51 = vld [vmem:[#allocation2 + $0x88] sm:$0xf]  ;;  %v5689_v54 = vor.u32 %v7403_v47, %v5688_v46 }
 0x103   :  { %3505 = vmatpush.bf16.msra.mxu2 %v5561_v58  ;;  %3480 = vmatpush.bf16.msra.mxu0 %v5017_v5  ;;  %v7203_v52 = vld [vmem:[#allocation2 + $0xa4] sm:$0xf0] }
 0x104   :  { %3474 = vmatmul.bf16.vlgmr.msrb.gmra.mxu3 %v8111_v42  ;;  %v5144_v53 = vld [vmem:[#allocation2 + $0x288] sm:$0xf]  ;;  %v4889_v60 = vor.u32 %v7203_v52, %v4888_v51 }
 0x105   :  { %3518 = vmatpush.bf16.msra.mxu3 %v5817_v62  ;;  %3493 = vmatpush.bf16.msra.mxu1 %v5273_v7  ;;  %v7267_v55 = vld [vmem:[#allocation2 + $0x2a4] sm:$0xf0] }
 0x106   :  { %v5400_v56 = vld [vmem:[#allocation2 + $0x488] sm:$0xf]  ;;  %v5145_v61 = vor.u32 %v7267_v55, %v5144_v53 }
 0x107   :  { %3506 = vmatpush.bf16.msra.mxu2 %v5529_v8  ;;  %3481 = vmatpush.bf16.msra.mxu0 %v4985_v18  ;;  %v7331_v57 = vld [vmem:[#allocation2 + $0x4a4] sm:$0xf0] }
 0x108   :  { %v5656_v58 = vld [vmem:[#allocation2 + $0x688] sm:$0xf]  ;;  %v5401_v62 = vor.u32 %v7331_v57, %v5400_v56 }
 0x109   :  { %3519 = vmatpush.bf16.msra.mxu3 %v5785_v12  ;;  %3494 = vmatpush.bf16.msra.mxu1 %v5241_v19  ;;  %v7395_v59 = vld [vmem:[#allocation2 + $0x6a4] sm:$0xf0] }
 0x10a   :  { %v4856_v63 = vld [vmem:[#allocation2 + $0x48] sm:$0xf]  ;;  %v5657_v2 = vor.u32 %v7395_v59, %v5656_v58 }
 0x10b   :  { %3507 = vmatpush.bf16.msra.mxu2 %v5497_v22  ;;  %3482 = vmatpush.bf16.msra.mxu0 %v4953_v32  ;;  %v7195_v0 = vld [vmem:[#allocation2 + $0x64] sm:$0xf0] }
 0x10c   :  { %v5112_v1 = vld [vmem:[#allocation2 + $0x248] sm:$0xf]  ;;  %v4857_v10 = vor.u32 %v7195_v0, %v4856_v63 }
 0x10d   :  { %3520 = vmatpush.bf16.msra.mxu3 %v5753_v26  ;;  %3495 = vmatpush.bf16.msra.mxu1 %v5209_v33  ;;  %v7259_v3 = vld [vmem:[#allocation2 + $0x264] sm:$0xf0] }
 0x10e   :  { %v5368_v5 = vld [vmem:[#allocation2 + $0x448] sm:$0xf]  ;;  %v5113_v13 = vor.u32 %v7259_v3, %v5112_v1 }
 0x10f   :  { %3508 = vmatpush.bf16.msra.mxu2 %v5465_v34  ;;  %3483 = vmatpush.bf16.msra.mxu0 %v4921_v48  ;;  %v7323_v7 = vld [vmem:[#allocation2 + $0x464] sm:$0xf0] }
 0x110   :  { %v5624_v8 = vld [vmem:[#allocation2 + $0x648] sm:$0xf]  ;;  %v5369_v14 = vor.u32 %v7323_v7, %v5368_v5 }
 0x111   :  { %3521 = vmatpush.bf16.msra.mxu3 %v5721_v39  ;;  %3496 = vmatpush.bf16.msra.mxu1 %v5177_v49  ;;  %v7387_v9 = vld [vmem:[#allocation2 + $0x664] sm:$0xf0] }
 0x112   :  { %v4824_v11 = vld [vmem:[#allocation2 + $0x8] sm:$0xf]  ;;  %v5625_v18 = vor.u32 %v7387_v9, %v5624_v8 }
 0x113   :  { %3509 = vmatpush.bf16.msra.mxu2 %v5433_v50  ;;  %3484 = vmatpush.bf16.msra.mxu0 %v4889_v60  ;;  %v7187_v12 = vld [vmem:[#allocation2 + $0x24] sm:$0xf0] }
 0x114   :  { %v5080_v15 = vld [vmem:[#allocation2 + $0x208] sm:$0xf]  ;;  %v4825_v27 = vor.u32 %v7187_v12, %v4824_v11 }
 0x115   :  { %3522 = vmatpush.bf16.msra.mxu3 %v5689_v54  ;;  %3497 = vmatpush.bf16.msra.mxu1 %v5145_v61  ;;  %v7251_v16 = vld [vmem:[#allocation2 + $0x224] sm:$0xf0] }
 0x116   :  { %v5336_v17 = vld [vmem:[#allocation2 + $0x408] sm:$0xf]  ;;  %v5081_v31 = vor.u32 %v7251_v16, %v5080_v15 }
 0x117   :  { %3510 = vmatpush.bf16.msra.mxu2 %v5401_v62  ;;  %v7315_v19 = vld [vmem:[#allocation2 + $0x424] sm:$0xf0]  ;;  %3485 = vmatpush.bf16.msra.mxu0 %v4857_v10 }
 0x118   :  { %v5592_v22 = vld [vmem:[#allocation2 + $0x608] sm:$0xf]  ;;  %v5337_v32 = vor.u32 %v7315_v19, %v5336_v17 }
 0x119   :  { %3523 = vmatpush.bf16.msra.mxu3 %v5657_v2  ;;  %v7379_v23 = vld [vmem:[#allocation2 + $0x624] sm:$0xf0]  ;;  %3498 = vmatpush.bf16.msra.mxu1 %v5113_v13 }
 0x11a   :  { %v6072_v24 = vld [vmem:[#allocation2 + $0x9c8] sm:$0xf]  ;;  %v5593_v35 = vor.u32 %v7379_v23, %v5592_v22  ;;  %v8131_v22 = vld [vmem:[#allocation4] sm:$0xff] }
 0x11b   :  { %v7499_v25 = vld [vmem:[#allocation2 + $0x9e4] sm:$0xf0]  ;;  %3511 = vmatpush.bf16.msra.mxu2 %v5369_v14  ;;  %3486 = vmatpush.bf16.msra.mxu0 %v4825_v27 }
 0x11c   :  { %v6328_v26 = vld [vmem:[#allocation2 + $0xbc8] sm:$0xf]  ;;  %v6073_v36 = vor.u32 %v7499_v25, %v6072_v24 }
 0x11d   :  { %v7563_v28 = vld [vmem:[#allocation2 + $0xbe4] sm:$0xf0]  ;;  %3524 = vmatpush.bf16.msra.mxu3 %v5625_v18  ;;  %3499 = vmatpush.bf16.msra.mxu1 %v5081_v31 }
 0x11e   :  { %v6584_v29 = vld [vmem:[#allocation2 + $0xdc8] sm:$0xf]  ;;  %v6329_v37 = vor.u32 %v7563_v28, %v6328_v26  ;;  %3487 = vmatmul.bf16.vlgmr.msra.gmra.mxu0 %v8094_v20 }
 0x11f   :  { %v7627_v30 = vld [vmem:[#allocation2 + $0xde4] sm:$0xf0]  ;;  %3512 = vmatpush.bf16.msra.mxu2 %v5337_v32  ;;  %3531 = vmatpush.bf16.msrb.mxu0 %v6073_v36 }
 0x120   :  { %v6840_v33 = vld [vmem:[#allocation2 + $0xfc8] sm:$0xf]  ;;  %v6585_v39 = vor.u32 %v7627_v30, %v6584_v29  ;;  %3500 = vmatmul.bf16.vlgmr.msra.gmra.mxu1 %v8097_v21  ;;  %v667_v30 = vperm.slane %v8131_v22, 0 }
 0x121   :  { %v7691_v34 = vld [vmem:[#allocation2 + $0xfe4] sm:$0xf0]  ;;  %3525 = vmatpush.bf16.msra.mxu3 %v5593_v35  ;;  %3544 = vmatpush.bf16.msrb.mxu1 %v6329_v37 }
 0x122   :  { %v6040_v40 = vld [vmem:[#allocation2 + $0x988] sm:$0xf]  ;;  %v6841_v46 = vor.u32 %v7691_v34, %v6840_v33  ;;  %3513 = vmatmul.bf16.vlgmr.msra.gmra.mxu2 %v8086_v4 }
 0x123   :  { %v7491_v43 = vld [vmem:[#allocation2 + $0x9a4] sm:$0xf0]  ;;  %3557 = vmatpush.bf16.msrb.mxu2 %v6585_v39 }
 0x124   :  { %v6296_v45 = vld [vmem:[#allocation2 + $0xb88] sm:$0xf]  ;;  %v6041_v52 = vor.u32 %v7491_v43, %v6040_v40  ;;  %3526 = vmatmul.bf16.vlgmr.msra.gmra.mxu3 %v8091_v6 }
 0x125   :  { %v7555_v47 = vld [vmem:[#allocation2 + $0xba4] sm:$0xf0]  ;;  %3570 = vmatpush.bf16.msrb.mxu3 %v6841_v46  ;;  %v3280_v46 = vpop.f32.mrf.mxu0 }
 0x126   :  { %v6552_v48 = vld [vmem:[#allocation2 + $0xd88] sm:$0xf]  ;;  %v6297_v53 = vor.u32 %v7555_v47, %v6296_v45  ;;  %3532 = vmatpush.bf16.msrb.mxu0 %v6041_v52 }
 0x127   :  { %v7619_v49 = vld [vmem:[#allocation2 + $0xda4] sm:$0xf0] }
 0x128   :  { %v6808_v50 = vld [vmem:[#allocation2 + $0xf88] sm:$0xf]  ;;  %v6553_v54 = vor.u32 %v7619_v49, %v6552_v48  ;;  %3545 = vmatpush.bf16.msrb.mxu1 %v6297_v53  ;;  %v3281_v48 = vadd.f32 %v3280_v46, %v667_v30  ;;  %v3293_v49 = vpop.f32.mrf.mxu1  ;;  %v7431_v30 = vld [vmem:[#allocation2 + $0x7cc] sm:$0xf] }
 0x129   :  { %v7683_v51 = vld [vmem:[#allocation2 + $0xfa4] sm:$0xf0]  ;;  %v5274_v46 = vld [vmem:[#allocation2 + $0x3a8] sm:$0xf0] }
 0x12a   :  { %v6008_v55 = vld [vmem:[#allocation2 + $0x948] sm:$0xf]  ;;  %v6809_v58 = vor.u32 %v7683_v51, %v6808_v50  ;;  %3558 = vmatpush.bf16.msrb.mxu2 %v6553_v54 }
 0x12b   :  { %v7483_v56 = vld [vmem:[#allocation2 + $0x964] sm:$0xf0] }
 0x12c   :  { %v6264_v57 = vld [vmem:[#allocation2 + $0xb48] sm:$0xf]  ;;  %v6009_v0 = vor.u32 %v7483_v56, %v6008_v55  ;;  %3571 = vmatpush.bf16.msrb.mxu3 %v6809_v58  ;;  %v3306_v55 = vpop.f32.mrf.mxu2 }
 0x12d   :  { %v7547_v59 = vld [vmem:[#allocation2 + $0xb64] sm:$0xf0] }
 0x12e   :  { %v6520_v60 = vld [vmem:[#allocation2 + $0xd48] sm:$0xf]  ;;  %v6265_v1 = vor.u32 %v7547_v59, %v6264_v57  ;;  %3533 = vmatpush.bf16.msrb.mxu0 %v6009_v0 }
 0x12f   :  { %v7611_v61 = vld [vmem:[#allocation2 + $0xd64] sm:$0xf0] }
 0x130   :  { %v6776_v62 = vld [vmem:[#allocation2 + $0xf48] sm:$0xf]  ;;  %v6521_v2 = vor.u32 %v7611_v61, %v6520_v60  ;;  %3546 = vmatpush.bf16.msrb.mxu1 %v6265_v1  ;;  %v3294_v60 = vadd.f32 %v3293_v49, %v3281_v48  ;;  %v3319_v61 = vpop.f32.mrf.mxu3  ;;  %v5530_v48 = vld [vmem:[#allocation2 + $0x5a8] sm:$0xf0] }
 0x131   :  { %v7675_v63 = vld [vmem:[#allocation2 + $0xf64] sm:$0xf0]  ;;  %v7423_v49 = vld [vmem:[#allocation2 + $0x78c] sm:$0xf] }
 0x132   :  { %v5976_v3 = vld [vmem:[#allocation2 + $0x908] sm:$0xf]  ;;  %v6777_v8 = vor.u32 %v7675_v63, %v6776_v62  ;;  %3559 = vmatpush.bf16.msrb.mxu2 %v6521_v2 }
 0x133   :  { %v7475_v5 = vld [vmem:[#allocation2 + $0x924] sm:$0xf0] }
 0x134   :  { %v6232_v7 = vld [vmem:[#allocation2 + $0xb08] sm:$0xf]  ;;  %v5977_v14 = vor.u32 %v7475_v5, %v5976_v3  ;;  %3572 = vmatpush.bf16.msrb.mxu3 %v6777_v8  ;;  %v3307_v3 = vadd.f32 %v3306_v55, %v3294_v60  ;;  %v4986_v55 = vld [vmem:[#allocation2 + $0x168] sm:$0xf0] }
 0x135   :  { %v7539_v9 = vld [vmem:[#allocation2 + $0xb24] sm:$0xf0]  ;;  %v5498_v60 = vld [vmem:[#allocation2 + $0x568] sm:$0xf0] }
 0x136   :  { %v6488_v10 = vld [vmem:[#allocation2 + $0xd08] sm:$0xf]  ;;  %v6233_v16 = vor.u32 %v7539_v9, %v6232_v7  ;;  %3534 = vmatpush.bf16.msrb.mxu0 %v5977_v14 }
 0x137   :  { %v7603_v11 = vld [vmem:[#allocation2 + $0xd24] sm:$0xf0] }
 0x138   :  { %v6744_v12 = vld [vmem:[#allocation2 + $0xf08] sm:$0xf]  ;;  %v6489_v17 = vor.u32 %v7603_v11, %v6488_v10  ;;  %3547 = vmatpush.bf16.msrb.mxu1 %v6233_v16  ;;  %v7239_v16 = vld [vmem:[#allocation2 + $0x1cc] sm:$0xf] }
 0x139   :  { %v7667_v13 = vld [vmem:[#allocation2 + $0xf24] sm:$0xf0] }
 0x13a   :  { %v5944_v15 = vld [vmem:[#allocation2 + $0x8c8] sm:$0xf]  ;;  %v6745_v23 = vor.u32 %v7667_v13, %v6744_v12  ;;  %3560 = vmatpush.bf16.msrb.mxu2 %v6489_v17  ;;  %v5050_v17 = vld [vmem:[#allocation2 + $0x1e8] sm:$0xf0] }
 0x13b   :  { %v7467_v18 = vld [vmem:[#allocation2 + $0x8e4] sm:$0xf0] }
 0x13c   :  { %v6200_v19 = vld [vmem:[#allocation2 + $0xac8] sm:$0xf]  ;;  %v5945_v29 = vor.u32 %v7467_v18, %v5944_v15  ;;  %3573 = vmatpush.bf16.msrb.mxu3 %v6745_v23  ;;  %v8134_v15 = vadd.f32 %v3319_v61, %v3307_v3  ;;  %v7303_v18 = vld [vmem:[#allocation2 + $0x3cc] sm:$0xf] }
 0x13d   :  { %v7531_v24 = vld [vmem:[#allocation2 + $0xae4] sm:$0xf0]  ;;  %v7415_v61 = vld [vmem:[#allocation2 + $0x74c] sm:$0xf] }
 0x13e   :  { %v6456_v25 = vld [vmem:[#allocation2 + $0xcc8] sm:$0xf]  ;;  %v6201_v31 = vor.u32 %v7531_v24, %v6200_v19  ;;  %3535 = vmatpush.bf16.msrb.mxu0 %v5945_v29  ;;  %v3282_v19 = vpop.f32.mrf.mxu0  ;;  %v5306_v24 = vld [vmem:[#allocation2 + $0x3e8] sm:$0xf0] }
 0x13f   :  { %v7595_v26 = vld [vmem:[#allocation2 + $0xce4] sm:$0xf0]  ;;  %v4954_v3 = vld [vmem:[#allocation2 + $0x128] sm:$0xf0] }
 0x140   :  { %v6712_v27 = vld [vmem:[#allocation2 + $0xec8] sm:$0xf]  ;;  %v6457_v32 = vor.u32 %v7595_v26, %v6456_v25  ;;  %3548 = vmatpush.bf16.msrb.mxu1 %v6201_v31  ;;  %v7367_v25 = vld [vmem:[#allocation2 + $0x5cc] sm:$0xf] }
 0x141   :  { %v7659_v28 = vld [vmem:[#allocation2 + $0xee4] sm:$0xf0]  ;;  %v5562_v26 = vld [vmem:[#allocation2 + $0x5e8] sm:$0xf0] }
 0x142   :  { %v5912_v33 = vld [vmem:[#allocation2 + $0x888] sm:$0xf]  ;;  %v6713_v36 = vor.u32 %v7659_v28, %v6712_v27  ;;  %3561 = vmatpush.bf16.msrb.mxu2 %v6457_v32  ;;  %v3295_v27 = vpop.f32.mrf.mxu1  ;;  %v5818_v31 = vld [vmem:[#allocation2 + $0x7e8] sm:$0xf0]  ;;  %v3308_v32 = vpop.f32.mrf.mxu2 }
 0x143   :  { %v7459_v34 = vld [vmem:[#allocation2 + $0x8a4] sm:$0xf0]  ;;  %v4922_v19 = vld [vmem:[#allocation2 + $0xe8] sm:$0xf0] }
 0x144   :  { %v6168_v35 = vld [vmem:[#allocation2 + $0xa88] sm:$0xf]  ;;  %v5913_v47 = vor.u32 %v7459_v34, %v5912_v33  ;;  %3574 = vmatpush.bf16.msrb.mxu3 %v6713_v36  ;;  %v5053_v34 = vor.u32 %v7239_v16, %v5050_v17  ;;  %v5309_v36 = vor.u32 %v7303_v18, %v5306_v24  ;;  %v7207_v18 = vld [vmem:[#allocation2 + $0xcc] sm:$0xf] }
 0x145   :  { %v7523_v37 = vld [vmem:[#allocation2 + $0xaa4] sm:$0xf0]  ;;  %v5178_v27 = vld [vmem:[#allocation2 + $0x2e8] sm:$0xf0] }
 0x146   :  { %v6424_v39 = vld [vmem:[#allocation2 + $0xc88] sm:$0xf]  ;;  %v6169_v50 = vor.u32 %v7523_v37, %v6168_v35  ;;  %3536 = vmatpush.bf16.msrb.mxu0 %v5913_v47  ;;  %v3321_v35 = vpop.f32.mrf.mxu3  ;;  %v5565_v37 = vor.u32 %v7367_v25, %v5562_v26  ;;  %v7359_v47 = vld [vmem:[#allocation2 + $0x58c] sm:$0xf] }
 0x147   :  { %v7587_v40 = vld [vmem:[#allocation2 + $0xca4] sm:$0xf0] }
 0x148   :  { %v6680_v43 = vld [vmem:[#allocation2 + $0xe88] sm:$0xf]  ;;  %v6425_v51 = vor.u32 %v7587_v40, %v6424_v39  ;;  %3549 = vmatpush.bf16.msrb.mxu1 %v6169_v50  ;;  %v7231_v39 = vld [vmem:[#allocation2 + $0x18c] sm:$0xf] }
 0x149   :  { %v7651_v45 = vld [vmem:[#allocation2 + $0xea4] sm:$0xf0]  ;;  %v5018_v40 = vld [vmem:[#allocation2 + $0x1a8] sm:$0xf0] }
 0x14a   :  { %v5880_v52 = vld [vmem:[#allocation2 + $0x848] sm:$0xf]  ;;  %v6681_v56 = vor.u32 %v7651_v45, %v6680_v43  ;;  %3562 = vmatpush.bf16.msrb.mxu2 %v6425_v51  ;;  %v7295_v43 = vld [vmem:[#allocation2 + $0x38c] sm:$0xf]  ;;  %v5821_v45 = vor.u32 %v7431_v30, %v5818_v31  ;;  %v5021_v51 = vor.u32 %v7231_v39, %v5018_v40  ;;  %v3345_v25 = vpop.f32.mrf.mxu1  ;;  %v3358_v40 = vpop.f32.mrf.mxu2 }
 0x14b   :  { %v7451_v53 = vld [vmem:[#allocation2 + $0x864] sm:$0xf0]  ;;  %v5786_v50 = vld [vmem:[#allocation2 + $0x7a8] sm:$0xf0] }
 0x14c   :  { %v6136_v54 = vld [vmem:[#allocation2 + $0xa48] sm:$0xf]  ;;  %v5881_v0 = vor.u32 %v7451_v53, %v5880_v52  ;;  %3575 = vmatpush.bf16.msrb.mxu3 %v6681_v56  ;;  %v5277_v52 = vor.u32 %v7295_v43, %v5274_v46  ;;  %v5533_v53 = vor.u32 %v7359_v47, %v5530_v48  ;;  %v7287_v56 = vld [vmem:[#allocation2 + $0x34c] sm:$0xf] }
 0x14d   :  { %v7515_v57 = vld [vmem:[#allocation2 + $0xa64] sm:$0xf0]  ;;  %v7399_v30 = vld [vmem:[#allocation2 + $0x6cc] sm:$0xf] }
 0x14e   :  { %v6392_v58 = vld [vmem:[#allocation2 + $0xc48] sm:$0xf]  ;;  %v6137_v5 = vor.u32 %v7515_v57, %v6136_v54  ;;  %3537 = vmatpush.bf16.msrb.mxu0 %v5881_v0  ;;  %v7223_v54 = vld [vmem:[#allocation2 + $0x14c] sm:$0xf]  ;;  %v5789_v57 = vor.u32 %v7423_v49, %v5786_v50  ;;  %v3371_v48 = vpop.f32.mrf.mxu3 }
 0x14f   :  { %v7579_v59 = vld [vmem:[#allocation2 + $0xc64] sm:$0xf0]  ;;  %v5690_v31 = vld [vmem:[#allocation2 + $0x6e8] sm:$0xf0] }
 0x150   :  { %v6648_v62 = vld [vmem:[#allocation2 + $0xe48] sm:$0xf]  ;;  %v6393_v7 = vor.u32 %v7579_v59, %v6392_v58  ;;  %3550 = vmatpush.bf16.msrb.mxu1 %v6137_v5  ;;  %v5242_v58 = vld [vmem:[#allocation2 + $0x368] sm:$0xf0] }
 0x151   :  { %v7643_v63 = vld [vmem:[#allocation2 + $0xe64] sm:$0xf0]  ;;  %v7351_v59 = vld [vmem:[#allocation2 + $0x54c] sm:$0xf]  ;;  %v5245_v0 = vor.u32 %v7287_v56, %v5242_v58 }
 0x152   :  { %v5848_v1 = vld [vmem:[#allocation2 + $0x808] sm:$0xf]  ;;  %v6649_v11 = vor.u32 %v7643_v63, %v6648_v62  ;;  %3563 = vmatpush.bf16.msrb.mxu2 %v6393_v7  ;;  %v5754_v62 = vld [vmem:[#allocation2 + $0x768] sm:$0xf0]  ;;  %v4989_v63 = vor.u32 %v7223_v54, %v4986_v55 }
 0x153   :  { %v7443_v2 = vld [vmem:[#allocation2 + $0x824] sm:$0xf0]  ;;  %v7279_v5 = vld [vmem:[#allocation2 + $0x30c] sm:$0xf]  ;;  %v5757_v7 = vor.u32 %v7415_v61, %v5754_v62 }
 0x154   :  { %v6104_v8 = vld [vmem:[#allocation2 + $0xa08] sm:$0xf]  ;;  %v5849_v23 = vor.u32 %v7443_v2, %v5848_v1  ;;  %3576 = vmatpush.bf16.msrb.mxu3 %v6649_v11  ;;  %v5501_v1 = vor.u32 %v7351_v59, %v5498_v60  ;;  %v7215_v2 = vld [vmem:[#allocation2 + $0x10c] sm:$0xf]  ;;  %v3347_v59 = vpop.f32.mrf.mxu1 }
 0x155   :  { %v7507_v9 = vld [vmem:[#allocation2 + $0xa24] sm:$0xf0]  ;;  %v7407_v11 = vld [vmem:[#allocation2 + $0x70c] sm:$0xf] }
 0x156   :  { %v6360_v10 = vld [vmem:[#allocation2 + $0xc08] sm:$0xf]  ;;  %v6105_v28 = vor.u32 %v7507_v9, %v6104_v8  ;;  %3538 = vmatpush.bf16.msrb.mxu0 %v5849_v23  ;;  %v5210_v8 = vld [vmem:[#allocation2 + $0x328] sm:$0xf0] }
 0x157   :  { %v7571_v12 = vld [vmem:[#allocation2 + $0xc24] sm:$0xf0]  ;;  %v7343_v9 = vld [vmem:[#allocation2 + $0x50c] sm:$0xf]  ;;  %v5213_v16 = vor.u32 %v7279_v5, %v5210_v8 }
 0x158   :  { %v6616_v13 = vld [vmem:[#allocation2 + $0xe08] sm:$0xf]  ;;  %v6361_v29 = vor.u32 %v7571_v12, %v6360_v10  ;;  %3551 = vmatpush.bf16.msrb.mxu1 %v6105_v28  ;;  %v5466_v10 = vld [vmem:[#allocation2 + $0x528] sm:$0xf0] }
 0x159   :  { %v7635_v14 = vld [vmem:[#allocation2 + $0xe24] sm:$0xf0]  ;;  %3539 = vmatmul.bf16.vlgmr.msrb.gmra.mxu0 %v8109_v41  ;;  %v5722_v12 = vld [vmem:[#allocation2 + $0x728] sm:$0xf0]  ;;  %v5469_v17 = vor.u32 %v7343_v9, %v5466_v10 }
 0x15a   :  { %v6617_v33 = vor.u32 %v7635_v14, %v6616_v13  ;;  %3564 = vmatpush.bf16.msrb.mxu2 %v6361_v29  ;;  %3583 = vmatpush.bf16.msra.mxu0 %v5053_v34  ;;  %v4957_v13 = vor.u32 %v7215_v2, %v4954_v3  ;;  %v3332_v14 = vpop.f32.mrf.mxu0  ;;  %v7271_v23 = vld [vmem:[#allocation2 + $0x2cc] sm:$0xf]  ;;  %v5725_v26 = vor.u32 %v7407_v11, %v5722_v12  ;;  %v3360_v12 = vpop.f32.mrf.mxu2 }
 0x15b   :  { %3552 = vmatmul.bf16.vlgmr.msrb.gmra.mxu1 %v8113_v44  ;;  %v3333_v24 = vadd.f32 %v3332_v14, %v8134_v15  ;;  %v7335_v28 = vld [vmem:[#allocation2 + $0x4cc] sm:$0xf]  ;;  %v5181_v34 = vor.u32 %v7271_v23, %v5178_v27  ;;  %v5693_v15 = vor.u32 %v7399_v30, %v5690_v31 }
 0x15c   :  { %3577 = vmatpush.bf16.msrb.mxu3 %v6617_v33  ;;  %3596 = vmatpush.bf16.msra.mxu1 %v5309_v36  ;;  %v5434_v29 = vld [vmem:[#allocation2 + $0x4e8] sm:$0xf0]  ;;  %v4925_v33 = vor.u32 %v7207_v18, %v4922_v19  ;;  %v3373_v18 = vpop.f32.mrf.mxu3 }
 0x15d   :  { %3565 = vmatmul.bf16.vlgmr.msrb.gmra.mxu2 %v8107_v38  ;;  %v3346_v32 = vadd.f32 %v3345_v25, %v3333_v24  ;;  %v5437_v35 = vor.u32 %v7335_v28, %v5434_v29  ;;  %v7199_v36 = vld [vmem:[#allocation2 + $0x8c] sm:$0xf] }
 0x15e   :  { %3609 = vmatpush.bf16.msra.mxu2 %v5565_v37  ;;  %3584 = vmatpush.bf16.msra.mxu0 %v5021_v51  ;;  %v4890_v37 = vld [vmem:[#allocation2 + $0xa8] sm:$0xf0] }
 0x15f   :  { %3578 = vmatmul.bf16.vlgmr.msrb.gmra.mxu3 %v8111_v42  ;;  %v7263_v39 = vld [vmem:[#allocation2 + $0x28c] sm:$0xf]  ;;  %v3359_v47 = vadd.f32 %v3358_v40, %v3346_v32  ;;  %v4893_v51 = vor.u32 %v7199_v36, %v4890_v37 }
 0x160   :  { %3622 = vmatpush.bf16.msra.mxu3 %v5821_v45  ;;  %3597 = vmatpush.bf16.msra.mxu1 %v5277_v52  ;;  %v5146_v43 = vld [vmem:[#allocation2 + $0x2a8] sm:$0xf0] }
 0x161   :  { %v7327_v45 = vld [vmem:[#allocation2 + $0x48c] sm:$0xf]  ;;  %v8141_v52 = vadd.f32 %v3371_v48, %v3359_v47  ;;  %v5149_v54 = vor.u32 %v7263_v39, %v5146_v43 }
 0x162   :  { %3610 = vmatpush.bf16.msra.mxu2 %v5533_v53  ;;  %3585 = vmatpush.bf16.msra.mxu0 %v4989_v63  ;;  %v5402_v46 = vld [vmem:[#allocation2 + $0x4a8] sm:$0xf0]  ;;  %v3334_v53 = vpop.f32.mrf.mxu0 }
 0x163   :  { %v7391_v49 = vld [vmem:[#allocation2 + $0x68c] sm:$0xf]  ;;  %v5405_v55 = vor.u32 %v7327_v45, %v5402_v46  ;;  %vm4103_vm0 = vcmp.ge.f32.partialorder %v8141_v52, 0.0 }
 0x164   :  { %3623 = vmatpush.bf16.msra.mxu3 %v5789_v57  ;;  %3598 = vmatpush.bf16.msra.mxu1 %v5245_v0  ;;  %v5658_v50 = vld [vmem:[#allocation2 + $0x6a8] sm:$0xf0] }
 0x165   :  { %v7191_v56 = vld [vmem:[#allocation2 + $0x4c] sm:$0xf]  ;;  %v5661_v60 = vor.u32 %v7391_v49, %v5658_v50 }
 0x166   :  { %3611 = vmatpush.bf16.msra.mxu2 %v5501_v1  ;;  %3586 = vmatpush.bf16.msra.mxu0 %v4957_v13  ;;  %v4858_v57 = vld [vmem:[#allocation2 + $0x68] sm:$0xf0] }
 0x167   :  { %v7255_v58 = vld [vmem:[#allocation2 + $0x24c] sm:$0xf]  ;;  %v4861_v2 = vor.u32 %v7191_v56, %v4858_v57 }
 0x168   :  { %3624 = vmatpush.bf16.msra.mxu3 %v5757_v7  ;;  %3599 = vmatpush.bf16.msra.mxu1 %v5213_v16  ;;  %v5114_v61 = vld [vmem:[#allocation2 + $0x268] sm:$0xf0] }
 0x169   :  { %v7319_v62 = vld [vmem:[#allocation2 + $0x44c] sm:$0xf]  ;;  %v5117_v7 = vor.u32 %v7255_v58, %v5114_v61 }
 0x16a   :  { %3612 = vmatpush.bf16.msra.mxu2 %v5469_v17  ;;  %3587 = vmatpush.bf16.msra.mxu0 %v4925_v33  ;;  %v5370_v63 = vld [vmem:[#allocation2 + $0x468] sm:$0xf0] }
 0x16b   :  { %v7383_v0 = vld [vmem:[#allocation2 + $0x64c] sm:$0xf]  ;;  %v5373_v8 = vor.u32 %v7319_v62, %v5370_v63 }
 0x16c   :  { %3625 = vmatpush.bf16.msra.mxu3 %v5725_v26  ;;  %3600 = vmatpush.bf16.msra.mxu1 %v5181_v34  ;;  %v5626_v1 = vld [vmem:[#allocation2 + $0x668] sm:$0xf0] }
 0x16d   :  { %v7183_v3 = vld [vmem:[#allocation2 + $0xc] sm:$0xf]  ;;  %v5629_v13 = vor.u32 %v7383_v0, %v5626_v1 }
 0x16e   :  { %3613 = vmatpush.bf16.msra.mxu2 %v5437_v35  ;;  %3588 = vmatpush.bf16.msra.mxu0 %v4893_v51  ;;  %v4826_v5 = vld [vmem:[#allocation2 + $0x28] sm:$0xf0] }
 0x16f   :  { %v7247_v9 = vld [vmem:[#allocation2 + $0x20c] sm:$0xf]  ;;  %v4829_v25 = vor.u32 %v7183_v3, %v4826_v5  ;;  %v668_v5 = vperm.slane %v8131_v22, 1 }
 0x170   :  { %3626 = vmatpush.bf16.msra.mxu3 %v5693_v15  ;;  %3601 = vmatpush.bf16.msra.mxu1 %v5149_v54  ;;  %v5082_v10 = vld [vmem:[#allocation2 + $0x228] sm:$0xf0] }
 0x171   :  { %v7311_v11 = vld [vmem:[#allocation2 + $0x40c] sm:$0xf]  ;;  %v5085_v29 = vor.u32 %v7247_v9, %v5082_v10 }
 0x172   :  { %3614 = vmatpush.bf16.msra.mxu2 %v5405_v55  ;;  %v5338_v14 = vld [vmem:[#allocation2 + $0x428] sm:$0xf0]  ;;  %3589 = vmatpush.bf16.msra.mxu0 %v4861_v2 }
 0x173   :  { %v7375_v16 = vld [vmem:[#allocation2 + $0x60c] sm:$0xf]  ;;  %v5341_v30 = vor.u32 %v7311_v11, %v5338_v14  ;;  %v3384_v14 = vpop.f32.mrf.mxu0 }
 0x174   :  { %3627 = vmatpush.bf16.msra.mxu3 %v5661_v60  ;;  %v5594_v17 = vld [vmem:[#allocation2 + $0x628] sm:$0xf0]  ;;  %3602 = vmatpush.bf16.msra.mxu1 %v5117_v7 }
 0x175   :  { %v7495_v19 = vld [vmem:[#allocation2 + $0x9cc] sm:$0xf]  ;;  %v5597_v33 = vor.u32 %v7375_v16, %v5594_v17 }
 0x176   :  { %v6074_v23 = vld [vmem:[#allocation2 + $0x9e8] sm:$0xf0]  ;;  %3615 = vmatpush.bf16.msra.mxu2 %v5373_v8  ;;  %3590 = vmatpush.bf16.msra.mxu0 %v4829_v25  ;;  %v3397_v25 = vpop.f32.mrf.mxu1 }
 0x177   :  { %v7559_v24 = vld [vmem:[#allocation2 + $0xbcc] sm:$0xf]  ;;  %v6077_v34 = vor.u32 %v7495_v19, %v6074_v23 }
 0x178   :  { %v6330_v26 = vld [vmem:[#allocation2 + $0xbe8] sm:$0xf0]  ;;  %3628 = vmatpush.bf16.msra.mxu3 %v5629_v13  ;;  %3603 = vmatpush.bf16.msra.mxu1 %v5085_v29 }
 0x179   :  { %v7623_v27 = vld [vmem:[#allocation2 + $0xdcc] sm:$0xf]  ;;  %v6333_v35 = vor.u32 %v7559_v24, %v6330_v26  ;;  %3591 = vmatmul.bf16.vlgmr.msra.gmra.mxu0 %v8094_v20  ;;  %v3385_v24 = vadd.f32 %v3384_v14, %v668_v5 }
 0x17a   :  { %v6586_v28 = vld [vmem:[#allocation2 + $0xde8] sm:$0xf0]  ;;  %3616 = vmatpush.bf16.msra.mxu2 %v5341_v30  ;;  %3635 = vmatpush.bf16.msrb.mxu0 %v6077_v34 }
 0x17b   :  { %v7687_v31 = vld [vmem:[#allocation2 + $0xfcc] sm:$0xf]  ;;  %v6589_v36 = vor.u32 %v7623_v27, %v6586_v28  ;;  %3604 = vmatmul.bf16.vlgmr.msra.gmra.mxu1 %v8097_v21 }
 0x17c   :  { %v6842_v32 = vld [vmem:[#allocation2 + $0xfe8] sm:$0xf0]  ;;  %3629 = vmatpush.bf16.msra.mxu3 %v5597_v33  ;;  %3648 = vmatpush.bf16.msrb.mxu1 %v6333_v35 }
 0x17d   :  { %v7487_v37 = vld [vmem:[#allocation2 + $0x98c] sm:$0xf]  ;;  %v6845_v15 = vor.u32 %v7687_v31, %v6842_v32  ;;  %3617 = vmatmul.bf16.vlgmr.msra.gmra.mxu2 %v8086_v4  ;;  %v3398_v31 = vadd.f32 %v3397_v25, %v3385_v24  ;;  %v5312_v24 = vld [vmem:[#allocation2 + $0x3d0] sm:$0xf] }
 0x17e   :  { %v6042_v39 = vld [vmem:[#allocation2 + $0x9a8] sm:$0xf0]  ;;  %3661 = vmatpush.bf16.msrb.mxu2 %v6589_v36 }
 0x17f   :  { %v7551_v40 = vld [vmem:[#allocation2 + $0xb8c] sm:$0xf]  ;;  %v6045_v49 = vor.u32 %v7487_v37, %v6042_v39  ;;  %3630 = vmatmul.bf16.vlgmr.msra.gmra.mxu3 %v8091_v6  ;;  %v3410_v39 = vpop.f32.mrf.mxu2 }
 0x180   :  { %v6298_v43 = vld [vmem:[#allocation2 + $0xba8] sm:$0xf0]  ;;  %3674 = vmatpush.bf16.msrb.mxu3 %v6845_v15 }
 0x181   :  { %v7615_v45 = vld [vmem:[#allocation2 + $0xd8c] sm:$0xf]  ;;  %v6301_v50 = vor.u32 %v7551_v40, %v6298_v43  ;;  %3636 = vmatpush.bf16.msrb.mxu0 %v6045_v49 }
 0x182   :  { %v6554_v46 = vld [vmem:[#allocation2 + $0xda8] sm:$0xf0] }
 0x183   :  { %v7679_v47 = vld [vmem:[#allocation2 + $0xf8c] sm:$0xf]  ;;  %v6557_v51 = vor.u32 %v7615_v45, %v6554_v46  ;;  %3649 = vmatpush.bf16.msrb.mxu1 %v6301_v50  ;;  %v3411_v46 = vadd.f32 %v3410_v39, %v3398_v31  ;;  %v7436_v31 = vld [vmem:[#allocation2 + $0x7ec] sm:$0xf0] }
 0x184   :  { %v6810_v48 = vld [vmem:[#allocation2 + $0xfa8] sm:$0xf0]  ;;  %v5280_v39 = vld [vmem:[#allocation2 + $0x390] sm:$0xf] }
 0x185   :  { %v7479_v53 = vld [vmem:[#allocation2 + $0x94c] sm:$0xf]  ;;  %v6813_v56 = vor.u32 %v7679_v47, %v6810_v48  ;;  %3662 = vmatpush.bf16.msrb.mxu2 %v6557_v51  ;;  %v3423_v47 = vpop.f32.mrf.mxu3 }
 0x186   :  { %v6010_v54 = vld [vmem:[#allocation2 + $0x968] sm:$0xf0]  ;;  %v8148_v51 = vadd.f32 %v3423_v47, %v3411_v46  ;;  %v5792_v46 = vld [vmem:[#allocation2 + $0x790] sm:$0xf] }
 0x187   :  { %v7543_v55 = vld [vmem:[#allocation2 + $0xb4c] sm:$0xf]  ;;  %v6013_v62 = vor.u32 %v7479_v53, %v6010_v54  ;;  %3675 = vmatpush.bf16.msrb.mxu3 %v6813_v56  ;;  %v3386_v53 = vpop.f32.mrf.mxu0  ;;  %v7428_v47 = vld [vmem:[#allocation2 + $0x7ac] sm:$0xf0] }
 0x188   :  { %v6266_v57 = vld [vmem:[#allocation2 + $0xb68] sm:$0xf0]  ;;  %v4992_v53 = vld [vmem:[#allocation2 + $0x150] sm:$0xf] }
 0x189   :  { %v7607_v58 = vld [vmem:[#allocation2 + $0xd4c] sm:$0xf]  ;;  %v6269_v0 = vor.u32 %v7543_v55, %v6266_v57  ;;  %3637 = vmatpush.bf16.msrb.mxu0 %v6013_v62 }
 0x18a   :  { %v6522_v59 = vld [vmem:[#allocation2 + $0xd68] sm:$0xf0] }
 0x18b   :  { %v7671_v60 = vld [vmem:[#allocation2 + $0xf4c] sm:$0xf]  ;;  %v6525_v1 = vor.u32 %v7607_v58, %v6522_v59  ;;  %3650 = vmatpush.bf16.msrb.mxu1 %v6269_v0  ;;  %v3399_v59 = vpop.f32.mrf.mxu1 }
 0x18c   :  { %v6778_v61 = vld [vmem:[#allocation2 + $0xf68] sm:$0xf0]  ;;  %v7356_v59 = vld [vmem:[#allocation2 + $0x56c] sm:$0xf0] }
 0x18d   :  { %v7471_v63 = vld [vmem:[#allocation2 + $0x90c] sm:$0xf]  ;;  %v6781_v7 = vor.u32 %v7671_v60, %v6778_v61  ;;  %3663 = vmatpush.bf16.msrb.mxu2 %v6525_v1 }
 0x18e   :  { %v5978_v2 = vld [vmem:[#allocation2 + $0x928] sm:$0xf0] }
 0x18f   :  { %v7535_v3 = vld [vmem:[#allocation2 + $0xb0c] sm:$0xf]  ;;  %v5981_v13 = vor.u32 %v7471_v63, %v5978_v2  ;;  %3676 = vmatpush.bf16.msrb.mxu3 %v6781_v7 }
 0x190   :  { %v6234_v8 = vld [vmem:[#allocation2 + $0xb28] sm:$0xf0] }
 0x191   :  { %v7599_v9 = vld [vmem:[#allocation2 + $0xd0c] sm:$0xf]  ;;  %v6237_v16 = vor.u32 %v7535_v3, %v6234_v8  ;;  %3638 = vmatpush.bf16.msrb.mxu0 %v5981_v13 }
 0x192   :  { %v6490_v10 = vld [vmem:[#allocation2 + $0xd28] sm:$0xf0] }
 0x193   :  { %v7663_v11 = vld [vmem:[#allocation2 + $0xf0c] sm:$0xf]  ;;  %v6493_v17 = vor.u32 %v7599_v9, %v6490_v10  ;;  %3651 = vmatpush.bf16.msrb.mxu1 %v6237_v16 }
 0x194   :  { %v6746_v12 = vld [vmem:[#allocation2 + $0xf28] sm:$0xf0] }
 0x195   :  { %v7463_v18 = vld [vmem:[#allocation2 + $0x8cc] sm:$0xf]  ;;  %v6749_v22 = vor.u32 %v7663_v11, %v6746_v12  ;;  %3664 = vmatpush.bf16.msrb.mxu2 %v6493_v17  ;;  %v3412_v12 = vpop.f32.mrf.mxu2 }
 0x196   :  { %v5946_v19 = vld [vmem:[#allocation2 + $0x8e8] sm:$0xf0] }
 0x197   :  { %v7527_v23 = vld [vmem:[#allocation2 + $0xacc] sm:$0xf]  ;;  %v5949_v32 = vor.u32 %v7463_v18, %v5946_v19  ;;  %3677 = vmatpush.bf16.msrb.mxu3 %v6749_v22  ;;  %v3425_v18 = vpop.f32.mrf.mxu3  ;;  %v5056_v19 = vld [vmem:[#allocation2 + $0x1d0] sm:$0xf] }
 0x198   :  { %v6202_v26 = vld [vmem:[#allocation2 + $0xae8] sm:$0xf0]  ;;  %v7308_v22 = vld [vmem:[#allocation2 + $0x3ec] sm:$0xf0] }
 0x199   :  { %v7591_v27 = vld [vmem:[#allocation2 + $0xccc] sm:$0xf]  ;;  %v6205_v33 = vor.u32 %v7527_v23, %v6202_v26  ;;  %3639 = vmatpush.bf16.msrb.mxu0 %v5949_v32  ;;  %v7244_v23 = vld [vmem:[#allocation2 + $0x1ec] sm:$0xf0] }
 0x19a   :  { %v6458_v28 = vld [vmem:[#allocation2 + $0xce8] sm:$0xf0]  ;;  %v5568_v26 = vld [vmem:[#allocation2 + $0x5d0] sm:$0xf] }
 0x19b   :  { %v7655_v29 = vld [vmem:[#allocation2 + $0xecc] sm:$0xf]  ;;  %v6461_v34 = vor.u32 %v7591_v27, %v6458_v28  ;;  %3652 = vmatpush.bf16.msrb.mxu1 %v6205_v33  ;;  %v7372_v27 = vld [vmem:[#allocation2 + $0x5ec] sm:$0xf0]  ;;  %v5057_v33 = vor.u32 %v7244_v23, %v5056_v19 }
 0x19c   :  { %v6714_v30 = vld [vmem:[#allocation2 + $0xee8] sm:$0xf0]  ;;  %v7212_v18 = vld [vmem:[#allocation2 + $0xec] sm:$0xf0] }
 0x19d   :  { %v7455_v35 = vld [vmem:[#allocation2 + $0x88c] sm:$0xf]  ;;  %v6717_v40 = vor.u32 %v7655_v29, %v6714_v30  ;;  %3665 = vmatpush.bf16.msrb.mxu2 %v6461_v34  ;;  %v5824_v30 = vld [vmem:[#allocation2 + $0x7d0] sm:$0xf]  ;;  %v5313_v34 = vor.u32 %v7308_v22, %v5312_v24  ;;  %v3449_v24 = vpop.f32.mrf.mxu1 }
 0x19e   :  { %v5914_v36 = vld [vmem:[#allocation2 + $0x8a8] sm:$0xf0]  ;;  %v5184_v19 = vld [vmem:[#allocation2 + $0x2d0] sm:$0xf] }
 0x19f   :  { %v7519_v37 = vld [vmem:[#allocation2 + $0xa8c] sm:$0xf]  ;;  %v5917_v50 = vor.u32 %v7455_v35, %v5914_v36  ;;  %3678 = vmatpush.bf16.msrb.mxu3 %v6717_v40  ;;  %v5569_v35 = vor.u32 %v7372_v27, %v5568_v26  ;;  %v5024_v36 = vld [vmem:[#allocation2 + $0x190] sm:$0xf]  ;;  %v5825_v40 = vor.u32 %v7436_v31, %v5824_v30 }
 0x1a0   :  { %v6170_v15 = vld [vmem:[#allocation2 + $0xaa8] sm:$0xf0]  ;;  %v7276_v22 = vld [vmem:[#allocation2 + $0x2ec] sm:$0xf0] }
 0x1a1   :  { %v7583_v43 = vld [vmem:[#allocation2 + $0xc8c] sm:$0xf]  ;;  %v6173_v54 = vor.u32 %v7519_v37, %v6170_v15  ;;  %3640 = vmatpush.bf16.msrb.mxu0 %v5917_v50  ;;  %v7236_v37 = vld [vmem:[#allocation2 + $0x1ac] sm:$0xf0] }
 0x1a2   :  { %v6426_v45 = vld [vmem:[#allocation2 + $0xca8] sm:$0xf0]  ;;  %v7300_v15 = vld [vmem:[#allocation2 + $0x3ac] sm:$0xf0] }
 0x1a3   :  { %v7647_v48 = vld [vmem:[#allocation2 + $0xe8c] sm:$0xf]  ;;  %v6429_v55 = vor.u32 %v7583_v43, %v6426_v45  ;;  %3653 = vmatpush.bf16.msrb.mxu1 %v6173_v54  ;;  %v5536_v43 = vld [vmem:[#allocation2 + $0x590] sm:$0xf] }
 0x1a4   :  { %v6682_v49 = vld [vmem:[#allocation2 + $0xea8] sm:$0xf0]  ;;  %v7364_v45 = vld [vmem:[#allocation2 + $0x5ac] sm:$0xf0] }
 0x1a5   :  { %v7447_v56 = vld [vmem:[#allocation2 + $0x84c] sm:$0xf]  ;;  %v6685_v60 = vor.u32 %v7647_v48, %v6682_v49  ;;  %3666 = vmatpush.bf16.msrb.mxu2 %v6429_v55  ;;  %v5025_v48 = vor.u32 %v7236_v37, %v5024_v36  ;;  %v5281_v49 = vor.u32 %v7300_v15, %v5280_v39  ;;  %v5537_v50 = vor.u32 %v7364_v45, %v5536_v43  ;;  %v7228_v54 = vld [vmem:[#allocation2 + $0x16c] sm:$0xf0]  ;;  %v3462_v37 = vpop.f32.mrf.mxu2  ;;  %v3475_v45 = vpop.f32.mrf.mxu3 }
 0x1a6   :  { %v5882_v57 = vld [vmem:[#allocation2 + $0x868] sm:$0xf0]  ;;  %v5248_v55 = vld [vmem:[#allocation2 + $0x350] sm:$0xf] }
 0x1a7   :  { %v7511_v58 = vld [vmem:[#allocation2 + $0xa4c] sm:$0xf]  ;;  %v5885_v2 = vor.u32 %v7447_v56, %v5882_v57  ;;  %3679 = vmatpush.bf16.msrb.mxu3 %v6685_v60  ;;  %v5793_v56 = vor.u32 %v7428_v47, %v5792_v46  ;;  %v7292_v57 = vld [vmem:[#allocation2 + $0x36c] sm:$0xf0] }
 0x1a8   :  { %v6138_v61 = vld [vmem:[#allocation2 + $0xa68] sm:$0xf0]  ;;  %v5760_v60 = vld [vmem:[#allocation2 + $0x750] sm:$0xf] }
 0x1a9   :  { %v7575_v62 = vld [vmem:[#allocation2 + $0xc4c] sm:$0xf]  ;;  %v6141_v7 = vor.u32 %v7511_v58, %v6138_v61  ;;  %3641 = vmatpush.bf16.msrb.mxu0 %v5885_v2  ;;  %v5504_v58 = vld [vmem:[#allocation2 + $0x550] sm:$0xf] }
 0x1aa   :  { %v6394_v63 = vld [vmem:[#allocation2 + $0xc68] sm:$0xf0]  ;;  %v7420_v61 = vld [vmem:[#allocation2 + $0x76c] sm:$0xf0] }
 0x1ab   :  { %v7639_v0 = vld [vmem:[#allocation2 + $0xe4c] sm:$0xf]  ;;  %v6397_v8 = vor.u32 %v7575_v62, %v6394_v63  ;;  %3654 = vmatpush.bf16.msrb.mxu1 %v6141_v7  ;;  %v4993_v62 = vor.u32 %v7228_v54, %v4992_v53  ;;  %v5249_v63 = vor.u32 %v7292_v57, %v5248_v55  ;;  %v7220_v2 = vld [vmem:[#allocation2 + $0x12c] sm:$0xf0] }
 0x1ac   :  { %v6650_v1 = vld [vmem:[#allocation2 + $0xe68] sm:$0xf0]  ;;  %v7284_v7 = vld [vmem:[#allocation2 + $0x32c] sm:$0xf0] }
 0x1ad   :  { %v7439_v3 = vld [vmem:[#allocation2 + $0x80c] sm:$0xf]  ;;  %v6653_v13 = vor.u32 %v7639_v0, %v6650_v1  ;;  %3667 = vmatpush.bf16.msrb.mxu2 %v6397_v8  ;;  %v5505_v0 = vor.u32 %v7356_v59, %v5504_v58  ;;  %v4960_v1 = vld [vmem:[#allocation2 + $0x110] sm:$0xf]  ;;  %v3451_v58 = vpop.f32.mrf.mxu1 }
 0x1ae   :  { %v5850_v5 = vld [vmem:[#allocation2 + $0x828] sm:$0xf0]  ;;  %v5472_v8 = vld [vmem:[#allocation2 + $0x510] sm:$0xf]  ;;  %v4961_v12 = vor.u32 %v7220_v2, %v4960_v1 }
 0x1af   :  { %v7503_v9 = vld [vmem:[#allocation2 + $0xa0c] sm:$0xf]  ;;  %v5853_v25 = vor.u32 %v7439_v3, %v5850_v5  ;;  %3680 = vmatpush.bf16.msrb.mxu3 %v6653_v13  ;;  %v5216_v3 = vld [vmem:[#allocation2 + $0x310] sm:$0xf]  ;;  %v5761_v5 = vor.u32 %v7420_v61, %v5760_v60  ;;  %v3436_v13 = vpop.f32.mrf.mxu0 }
 0x1b0   :  { %v6106_v10 = vld [vmem:[#allocation2 + $0xa28] sm:$0xf0]  ;;  %v3437_v23 = vadd.f32 %v3436_v13, %v8148_v51  ;;  %v5440_v26 = vld [vmem:[#allocation2 + $0x4d0] sm:$0xf] }
 0x1b1   :  { %v7567_v11 = vld [vmem:[#allocation2 + $0xc0c] sm:$0xf]  ;;  %v6109_v28 = vor.u32 %v7503_v9, %v6106_v10  ;;  %3642 = vmatpush.bf16.msrb.mxu0 %v5853_v25  ;;  %v7348_v9 = vld [vmem:[#allocation2 + $0x52c] sm:$0xf0] }
 0x1b2   :  { %v6362_v14 = vld [vmem:[#allocation2 + $0xc28] sm:$0xf0]  ;;  %v5728_v10 = vld [vmem:[#allocation2 + $0x710] sm:$0xf]  ;;  %v3450_v30 = vadd.f32 %v3449_v24, %v3437_v23 }
 0x1b3   :  { %v7631_v16 = vld [vmem:[#allocation2 + $0xe0c] sm:$0xf]  ;;  %v6365_v29 = vor.u32 %v7567_v11, %v6362_v14  ;;  %3655 = vmatpush.bf16.msrb.mxu1 %v6109_v28  ;;  %v7412_v11 = vld [vmem:[#allocation2 + $0x72c] sm:$0xf0]  ;;  %v5217_v14 = vor.u32 %v7284_v7, %v5216_v3 }
 0x1b4   :  { %v6618_v17 = vld [vmem:[#allocation2 + $0xe28] sm:$0xf0]  ;;  %3643 = vmatmul.bf16.vlgmr.msrb.gmra.mxu0 %v8109_v41  ;;  %v5729_v25 = vor.u32 %v7412_v11, %v5728_v10  ;;  %v7340_v27 = vld [vmem:[#allocation2 + $0x4ec] sm:$0xf0]  ;;  %v3463_v43 = vadd.f32 %v3462_v37, %v3450_v30  ;;  %v3464_v11 = vpop.f32.mrf.mxu2 }
 0x1b5   :  { %v6621_v32 = vor.u32 %v7631_v16, %v6618_v17  ;;  %3668 = vmatpush.bf16.msrb.mxu2 %v6365_v29  ;;  %3687 = vmatpush.bf16.msra.mxu0 %v5057_v33  ;;  %v5473_v16 = vor.u32 %v7348_v9, %v5472_v8  ;;  %v4928_v17 = vld [vmem:[#allocation2 + $0xd0] sm:$0xf]  ;;  %v5441_v33 = vor.u32 %v7340_v27, %v5440_v26 }
 0x1b6   :  { %3656 = vmatmul.bf16.vlgmr.msrb.gmra.mxu1 %v8113_v44  ;;  %v5696_v28 = vld [vmem:[#allocation2 + $0x6d0] sm:$0xf]  ;;  %v4929_v31 = vor.u32 %v7212_v18, %v4928_v17  ;;  %v3477_v17 = vpop.f32.mrf.mxu3 }
 0x1b7   :  { %3681 = vmatpush.bf16.msrb.mxu3 %v6621_v32  ;;  %3700 = vmatpush.bf16.msra.mxu1 %v5313_v34  ;;  %v7404_v29 = vld [vmem:[#allocation2 + $0x6ec] sm:$0xf0]  ;;  %v5185_v32 = vor.u32 %v7276_v22, %v5184_v19 }
 0x1b8   :  { %3669 = vmatmul.bf16.vlgmr.msrb.gmra.mxu2 %v8107_v38  ;;  %v4896_v34 = vld [vmem:[#allocation2 + $0x90] sm:$0xf]  ;;  %v5697_v51 = vor.u32 %v7404_v29, %v5696_v28 }
 0x1b9   :  { %3713 = vmatpush.bf16.msra.mxu2 %v5569_v35  ;;  %3688 = vmatpush.bf16.msra.mxu0 %v5025_v48  ;;  %v7204_v35 = vld [vmem:[#allocation2 + $0xac] sm:$0xf0] }
 0x1ba   :  { %3682 = vmatmul.bf16.vlgmr.msrb.gmra.mxu3 %v8111_v42  ;;  %v5152_v36 = vld [vmem:[#allocation2 + $0x290] sm:$0xf]  ;;  %v4897_v48 = vor.u32 %v7204_v35, %v4896_v34 }
 0x1bb   :  { %3726 = vmatpush.bf16.msra.mxu3 %v5825_v40  ;;  %3701 = vmatpush.bf16.msra.mxu1 %v5281_v49  ;;  %v7268_v39 = vld [vmem:[#allocation2 + $0x2ac] sm:$0xf0]  ;;  %v8155_v49 = vadd.f32 %v3475_v45, %v3463_v43 }
 0x1bc   :  { %v5408_v40 = vld [vmem:[#allocation2 + $0x490] sm:$0xf]  ;;  %v5153_v53 = vor.u32 %v7268_v39, %v5152_v36 }
 0x1bd   :  { %3714 = vmatpush.bf16.msra.mxu2 %v5537_v50  ;;  %3689 = vmatpush.bf16.msra.mxu0 %v4993_v62  ;;  %v7332_v15 = vld [vmem:[#allocation2 + $0x4ac] sm:$0xf0]  ;;  %v3438_v50 = vpop.f32.mrf.mxu0  ;;  %vm4104_vm2 = vcmp.ge.f32.partialorder %v8155_v49, 0.0 }
 0x1be   :  { %v5664_v46 = vld [vmem:[#allocation2 + $0x690] sm:$0xf]  ;;  %v5409_v54 = vor.u32 %v7332_v15, %v5408_v40 }
 0x1bf   :  { %3727 = vmatpush.bf16.msra.mxu3 %v5793_v56  ;;  %3702 = vmatpush.bf16.msra.mxu1 %v5249_v63  ;;  %v7396_v47 = vld [vmem:[#allocation2 + $0x6ac] sm:$0xf0] }
 0x1c0   :  { %v4864_v55 = vld [vmem:[#allocation2 + $0x50] sm:$0xf]  ;;  %v5665_v59 = vor.u32 %v7396_v47, %v5664_v46 }
 0x1c1   :  { %3715 = vmatpush.bf16.msra.mxu2 %v5505_v0  ;;  %3690 = vmatpush.bf16.msra.mxu0 %v4961_v12  ;;  %v7196_v56 = vld [vmem:[#allocation2 + $0x6c] sm:$0xf0] }
 0x1c2   :  { %v5120_v57 = vld [vmem:[#allocation2 + $0x250] sm:$0xf]  ;;  %v4865_v1 = vor.u32 %v7196_v56, %v4864_v55 }
 0x1c3   :  { %3728 = vmatpush.bf16.msra.mxu3 %v5761_v5  ;;  %3703 = vmatpush.bf16.msra.mxu1 %v5217_v14  ;;  %v7260_v60 = vld [vmem:[#allocation2 + $0x26c] sm:$0xf0] }
 0x1c4   :  { %v5376_v61 = vld [vmem:[#allocation2 + $0x450] sm:$0xf]  ;;  %v5121_v5 = vor.u32 %v7260_v60, %v5120_v57 }
 0x1c5   :  { %3716 = vmatpush.bf16.msra.mxu2 %v5473_v16  ;;  %3691 = vmatpush.bf16.msra.mxu0 %v4929_v31  ;;  %v7324_v62 = vld [vmem:[#allocation2 + $0x46c] sm:$0xf0] }
 0x1c6   :  { %v5632_v63 = vld [vmem:[#allocation2 + $0x650] sm:$0xf]  ;;  %v5377_v7 = vor.u32 %v7324_v62, %v5376_v61 }
 0x1c7   :  { %3729 = vmatpush.bf16.msra.mxu3 %v5729_v25  ;;  %3704 = vmatpush.bf16.msra.mxu1 %v5185_v32  ;;  %v7388_v0 = vld [vmem:[#allocation2 + $0x66c] sm:$0xf0] }
 0x1c8   :  { %v4832_v2 = vld [vmem:[#allocation2 + $0x10] sm:$0xf]  ;;  %v5633_v12 = vor.u32 %v7388_v0, %v5632_v63 }
 0x1c9   :  { %3717 = vmatpush.bf16.msra.mxu2 %v5441_v33  ;;  %3692 = vmatpush.bf16.msra.mxu0 %v4897_v48  ;;  %v7188_v3 = vld [vmem:[#allocation2 + $0x2c] sm:$0xf0] }
 0x1ca   :  { %v5088_v8 = vld [vmem:[#allocation2 + $0x210] sm:$0xf]  ;;  %v4833_v24 = vor.u32 %v7188_v3, %v4832_v2  ;;  %v8161_v3 = vld [vmem:[#allocation4] sm:$0xff] }
 0x1cb   :  { %3730 = vmatpush.bf16.msra.mxu3 %v5697_v51  ;;  %3705 = vmatpush.bf16.msra.mxu1 %v5153_v53  ;;  %v7252_v9 = vld [vmem:[#allocation2 + $0x22c] sm:$0xf0] }
 0x1cc   :  { %v5344_v10 = vld [vmem:[#allocation2 + $0x410] sm:$0xf]  ;;  %v5089_v27 = vor.u32 %v7252_v9, %v5088_v8 }
 0x1cd   :  { %3718 = vmatpush.bf16.msra.mxu2 %v5409_v54  ;;  %v7316_v13 = vld [vmem:[#allocation2 + $0x42c] sm:$0xf0]  ;;  %3693 = vmatpush.bf16.msra.mxu0 %v4865_v1 }
 0x1ce   :  { %v5600_v14 = vld [vmem:[#allocation2 + $0x610] sm:$0xf]  ;;  %v5345_v28 = vor.u32 %v7316_v13, %v5344_v10 }
 0x1cf   :  { %3731 = vmatpush.bf16.msra.mxu3 %v5665_v59  ;;  %v7380_v16 = vld [vmem:[#allocation2 + $0x62c] sm:$0xf0]  ;;  %3706 = vmatpush.bf16.msra.mxu1 %v5121_v5  ;;  %v669_v5 = vperm.slane %v8161_v3, 2 }
 0x1d0   :  { %v6080_v18 = vld [vmem:[#allocation2 + $0x9d0] sm:$0xf]  ;;  %v5601_v31 = vor.u32 %v7380_v16, %v5600_v14  ;;  %v3488_v14 = vpop.f32.mrf.mxu0 }
 0x1d1   :  { %v7500_v19 = vld [vmem:[#allocation2 + $0x9ec] sm:$0xf0]  ;;  %3719 = vmatpush.bf16.msra.mxu2 %v5377_v7  ;;  %3694 = vmatpush.bf16.msra.mxu0 %v4833_v24  ;;  %v3489_v24 = vadd.f32 %v3488_v14, %v669_v5 }
 0x1d2   :  { %v6336_v23 = vld [vmem:[#allocation2 + $0xbd0] sm:$0xf]  ;;  %v6081_v32 = vor.u32 %v7500_v19, %v6080_v18 }
 0x1d3   :  { %v7564_v25 = vld [vmem:[#allocation2 + $0xbec] sm:$0xf0]  ;;  %3732 = vmatpush.bf16.msra.mxu3 %v5633_v12  ;;  %3707 = vmatpush.bf16.msra.mxu1 %v5089_v27 }
 0x1d4   :  { %v6592_v22 = vld [vmem:[#allocation2 + $0xdd0] sm:$0xf]  ;;  %v6337_v33 = vor.u32 %v7564_v25, %v6336_v23  ;;  %3695 = vmatmul.bf16.vlgmr.msra.gmra.mxu0 %v8094_v20  ;;  %v3501_v25 = vpop.f32.mrf.mxu1 }
 0x1d5   :  { %v7628_v26 = vld [vmem:[#allocation2 + $0xdec] sm:$0xf0]  ;;  %3720 = vmatpush.bf16.msra.mxu2 %v5345_v28  ;;  %3739 = vmatpush.bf16.msrb.mxu0 %v6081_v32 }
 0x1d6   :  { %v6848_v29 = vld [vmem:[#allocation2 + $0xfd0] sm:$0xf]  ;;  %v6593_v34 = vor.u32 %v7628_v26, %v6592_v22  ;;  %3708 = vmatmul.bf16.vlgmr.msra.gmra.mxu1 %v8097_v21 }
 0x1d7   :  { %v7692_v30 = vld [vmem:[#allocation2 + $0xfec] sm:$0xf0]  ;;  %3733 = vmatpush.bf16.msra.mxu3 %v5601_v31  ;;  %3752 = vmatpush.bf16.msrb.mxu1 %v6337_v33  ;;  %v3502_v31 = vadd.f32 %v3501_v25, %v3489_v24  ;;  %v7240_v24 = vld [vmem:[#allocation2 + $0x1d4] sm:$0xf] }
 0x1d8   :  { %v6048_v35 = vld [vmem:[#allocation2 + $0x990] sm:$0xf]  ;;  %v6849_v51 = vor.u32 %v7692_v30, %v6848_v29  ;;  %3721 = vmatmul.bf16.vlgmr.msra.gmra.mxu2 %v8086_v4  ;;  %v5058_v25 = vld [vmem:[#allocation2 + $0x1f0] sm:$0xf0] }
 0x1d9   :  { %v7492_v36 = vld [vmem:[#allocation2 + $0x9ac] sm:$0xf0]  ;;  %3765 = vmatpush.bf16.msrb.mxu2 %v6593_v34 }
 0x1da   :  { %v6304_v37 = vld [vmem:[#allocation2 + $0xb90] sm:$0xf]  ;;  %v6049_v46 = vor.u32 %v7492_v36, %v6048_v35  ;;  %3734 = vmatmul.bf16.vlgmr.msra.gmra.mxu3 %v8091_v6 }
 0x1db   :  { %v7556_v39 = vld [vmem:[#allocation2 + $0xbac] sm:$0xf0]  ;;  %3778 = vmatpush.bf16.msrb.mxu3 %v6849_v51  ;;  %v3514_v51 = vpop.f32.mrf.mxu2 }
 0x1dc   :  { %v6560_v40 = vld [vmem:[#allocation2 + $0xd90] sm:$0xf]  ;;  %v6305_v47 = vor.u32 %v7556_v39, %v6304_v37  ;;  %3740 = vmatpush.bf16.msrb.mxu0 %v6049_v46  ;;  %v3527_v46 = vpop.f32.mrf.mxu3 }
 0x1dd   :  { %v7620_v15 = vld [vmem:[#allocation2 + $0xdac] sm:$0xf0] }
 0x1de   :  { %v6816_v43 = vld [vmem:[#allocation2 + $0xf90] sm:$0xf]  ;;  %v6561_v48 = vor.u32 %v7620_v15, %v6560_v40  ;;  %3753 = vmatpush.bf16.msrb.mxu1 %v6305_v47 }
 0x1df   :  { %v7684_v45 = vld [vmem:[#allocation2 + $0xfac] sm:$0xf0] }
 0x1e0   :  { %v6016_v50 = vld [vmem:[#allocation2 + $0x950] sm:$0xf]  ;;  %v6817_v55 = vor.u32 %v7684_v45, %v6816_v43  ;;  %3766 = vmatpush.bf16.msrb.mxu2 %v6561_v48  ;;  %v3515_v45 = vadd.f32 %v3514_v51, %v3502_v31  ;;  %v7232_v51 = vld [vmem:[#allocation2 + $0x194] sm:$0xf] }
 0x1e1   :  { %v7484_v53 = vld [vmem:[#allocation2 + $0x96c] sm:$0xf0] }
 0x1e2   :  { %v6272_v54 = vld [vmem:[#allocation2 + $0xb50] sm:$0xf]  ;;  %v6017_v61 = vor.u32 %v7484_v53, %v6016_v50  ;;  %3779 = vmatpush.bf16.msrb.mxu3 %v6817_v55  ;;  %v8164_v53 = vadd.f32 %v3527_v46, %v3515_v45  ;;  %v7360_v45 = vld [vmem:[#allocation2 + $0x594] sm:$0xf] }
 0x1e3   :  { %v7548_v56 = vld [vmem:[#allocation2 + $0xb6c] sm:$0xf0]  ;;  %v3516_v14 = vpop.f32.mrf.mxu2  ;;  %v5538_v46 = vld [vmem:[#allocation2 + $0x5b0] sm:$0xf0] }
 0x1e4   :  { %v6528_v57 = vld [vmem:[#allocation2 + $0xd50] sm:$0xf]  ;;  %v6273_v63 = vor.u32 %v7548_v56, %v6272_v54  ;;  %3741 = vmatpush.bf16.msrb.mxu0 %v6017_v61  ;;  %v3490_v54 = vpop.f32.mrf.mxu0  ;;  %v7408_v14 = vld [vmem:[#allocation2 + $0x714] sm:$0xf] }
 0x1e5   :  { %v7612_v58 = vld [vmem:[#allocation2 + $0xd6c] sm:$0xf0] }
 0x1e6   :  { %v6784_v59 = vld [vmem:[#allocation2 + $0xf50] sm:$0xf]  ;;  %v6529_v0 = vor.u32 %v7612_v58, %v6528_v57  ;;  %3754 = vmatpush.bf16.msrb.mxu1 %v6273_v63 }
 0x1e7   :  { %v7676_v60 = vld [vmem:[#allocation2 + $0xf6c] sm:$0xf0] }
 0x1e8   :  { %v5984_v62 = vld [vmem:[#allocation2 + $0x910] sm:$0xf]  ;;  %v6785_v7 = vor.u32 %v7676_v60, %v6784_v59  ;;  %3767 = vmatpush.bf16.msrb.mxu2 %v6529_v0  ;;  %v3503_v60 = vpop.f32.mrf.mxu1 }
 0x1e9   :  { %v7476_v1 = vld [vmem:[#allocation2 + $0x92c] sm:$0xf0]  ;;  %v5250_v60 = vld [vmem:[#allocation2 + $0x370] sm:$0xf0] }
 0x1ea   :  { %v6240_v2 = vld [vmem:[#allocation2 + $0xb10] sm:$0xf]  ;;  %v5985_v13 = vor.u32 %v7476_v1, %v5984_v62  ;;  %3780 = vmatpush.bf16.msrb.mxu3 %v6785_v7 }
 0x1eb   :  { %v7540_v8 = vld [vmem:[#allocation2 + $0xb2c] sm:$0xf0] }
 0x1ec   :  { %v6496_v9 = vld [vmem:[#allocation2 + $0xd10] sm:$0xf]  ;;  %v6241_v16 = vor.u32 %v7540_v8, %v6240_v2  ;;  %3742 = vmatpush.bf16.msrb.mxu0 %v5985_v13 }
 0x1ed   :  { %v7604_v10 = vld [vmem:[#allocation2 + $0xd2c] sm:$0xf0] }
 0x1ee   :  { %v6752_v11 = vld [vmem:[#allocation2 + $0xf10] sm:$0xf]  ;;  %v6497_v17 = vor.u32 %v7604_v10, %v6496_v9  ;;  %3755 = vmatpush.bf16.msrb.mxu1 %v6241_v16 }
 0x1ef   :  { %v7668_v12 = vld [vmem:[#allocation2 + $0xf2c] sm:$0xf0] }
 0x1f0   :  { %v5952_v18 = vld [vmem:[#allocation2 + $0x8d0] sm:$0xf]  ;;  %v6753_v22 = vor.u32 %v7668_v12, %v6752_v11  ;;  %3768 = vmatpush.bf16.msrb.mxu2 %v6497_v17 }
 0x1f1   :  { %v7468_v19 = vld [vmem:[#allocation2 + $0x8ec] sm:$0xf0] }
 0x1f2   :  { %v6208_v23 = vld [vmem:[#allocation2 + $0xad0] sm:$0xf]  ;;  %v5953_v32 = vor.u32 %v7468_v19, %v5952_v18  ;;  %3781 = vmatpush.bf16.msrb.mxu3 %v6753_v22  ;;  %v7304_v22 = vld [vmem:[#allocation2 + $0x3d4] sm:$0xf] }
 0x1f3   :  { %v7532_v26 = vld [vmem:[#allocation2 + $0xaec] sm:$0xf0] }
 0x1f4   :  { %v6464_v27 = vld [vmem:[#allocation2 + $0xcd0] sm:$0xf]  ;;  %v6209_v33 = vor.u32 %v7532_v26, %v6208_v23  ;;  %3743 = vmatpush.bf16.msrb.mxu0 %v5953_v32  ;;  %v3529_v23 = vpop.f32.mrf.mxu3  ;;  %v7432_v32 = vld [vmem:[#allocation2 + $0x7d4] sm:$0xf] }
 0x1f5   :  { %v7596_v28 = vld [vmem:[#allocation2 + $0xcec] sm:$0xf0] }
 0x1f6   :  { %v6720_v29 = vld [vmem:[#allocation2 + $0xed0] sm:$0xf]  ;;  %v6465_v34 = vor.u32 %v7596_v28, %v6464_v27  ;;  %3756 = vmatpush.bf16.msrb.mxu1 %v6209_v33  ;;  %v5314_v27 = vld [vmem:[#allocation2 + $0x3f0] sm:$0xf0] }
 0x1f7   :  { %v7660_v30 = vld [vmem:[#allocation2 + $0xeec] sm:$0xf0]  ;;  %v7368_v28 = vld [vmem:[#allocation2 + $0x5d4] sm:$0xf] }
 0x1f8   :  { %v5920_v35 = vld [vmem:[#allocation2 + $0x890] sm:$0xf]  ;;  %v6721_v39 = vor.u32 %v7660_v30, %v6720_v29  ;;  %3769 = vmatpush.bf16.msrb.mxu2 %v6465_v34  ;;  %v5570_v29 = vld [vmem:[#allocation2 + $0x5f0] sm:$0xf0] }
 0x1f9   :  { %v7460_v36 = vld [vmem:[#allocation2 + $0x8ac] sm:$0xf0]  ;;  %v5826_v33 = vld [vmem:[#allocation2 + $0x7f0] sm:$0xf0] }
 0x1fa   :  { %v6176_v37 = vld [vmem:[#allocation2 + $0xa90] sm:$0xf]  ;;  %v5921_v50 = vor.u32 %v7460_v36, %v5920_v35  ;;  %3782 = vmatpush.bf16.msrb.mxu3 %v6721_v39  ;;  %v5061_v35 = vor.u32 %v7240_v24, %v5058_v25  ;;  %v5317_v36 = vor.u32 %v7304_v22, %v5314_v27  ;;  %v5026_v39 = vld [vmem:[#allocation2 + $0x1b0] sm:$0xf0]  ;;  %v3553_v27 = vpop.f32.mrf.mxu1 }
 0x1fb   :  { %v7524_v40 = vld [vmem:[#allocation2 + $0xaac] sm:$0xf0]  ;;  %v7208_v24 = vld [vmem:[#allocation2 + $0xd4] sm:$0xf] }
 0x1fc   :  { %v6432_v15 = vld [vmem:[#allocation2 + $0xc90] sm:$0xf]  ;;  %v6177_v55 = vor.u32 %v7524_v40, %v6176_v37  ;;  %3744 = vmatpush.bf16.msrb.mxu0 %v5921_v50  ;;  %v5573_v37 = vor.u32 %v7368_v28, %v5570_v29  ;;  %v7296_v40 = vld [vmem:[#allocation2 + $0x394] sm:$0xf]  ;;  %v5029_v50 = vor.u32 %v7232_v51, %v5026_v39 }
 0x1fd   :  { %v7588_v43 = vld [vmem:[#allocation2 + $0xcac] sm:$0xf0]  ;;  %v4930_v25 = vld [vmem:[#allocation2 + $0xf0] sm:$0xf0] }
 0x1fe   :  { %v6688_v47 = vld [vmem:[#allocation2 + $0xe90] sm:$0xf]  ;;  %v6433_v56 = vor.u32 %v7588_v43, %v6432_v15  ;;  %3757 = vmatpush.bf16.msrb.mxu1 %v6177_v55  ;;  %v5829_v15 = vor.u32 %v7432_v32, %v5826_v33  ;;  %v5282_v43 = vld [vmem:[#allocation2 + $0x3b0] sm:$0xf0]  ;;  %v5541_v55 = vor.u32 %v7360_v45, %v5538_v46 }
 0x1ff   :  { %v7652_v48 = vld [vmem:[#allocation2 + $0xeac] sm:$0xf0]  ;;  %v5285_v54 = vor.u32 %v7296_v40, %v5282_v43  ;;  %v7272_v22 = vld [vmem:[#allocation2 + $0x2d4] sm:$0xf] }
 0x200   :  { %v5888_v57 = vld [vmem:[#allocation2 + $0x850] sm:$0xf]  ;;  %v6689_v61 = vor.u32 %v7652_v48, %v6688_v47  ;;  %3770 = vmatpush.bf16.msrb.mxu2 %v6433_v56  ;;  %v7424_v47 = vld [vmem:[#allocation2 + $0x794] sm:$0xf] }
 0x201   :  { %v7452_v58 = vld [vmem:[#allocation2 + $0x86c] sm:$0xf0]  ;;  %v5794_v48 = vld [vmem:[#allocation2 + $0x7b0] sm:$0xf0] }
 0x202   :  { %v6144_v59 = vld [vmem:[#allocation2 + $0xa50] sm:$0xf]  ;;  %v5889_v5 = vor.u32 %v7452_v58, %v5888_v57  ;;  %3783 = vmatpush.bf16.msrb.mxu3 %v6689_v61  ;;  %v7224_v56 = vld [vmem:[#allocation2 + $0x154] sm:$0xf] }
 0x203   :  { %v7516_v62 = vld [vmem:[#allocation2 + $0xa6c] sm:$0xf0]  ;;  %v4994_v57 = vld [vmem:[#allocation2 + $0x170] sm:$0xf0] }
 0x204   :  { %v6400_v63 = vld [vmem:[#allocation2 + $0xc50] sm:$0xf]  ;;  %v6145_v9 = vor.u32 %v7516_v62, %v6144_v59  ;;  %3745 = vmatpush.bf16.msrb.mxu0 %v5889_v5  ;;  %v7288_v58 = vld [vmem:[#allocation2 + $0x354] sm:$0xf]  ;;  %v5797_v59 = vor.u32 %v7424_v47, %v5794_v48  ;;  %v3579_v48 = vpop.f32.mrf.mxu3 }
 0x205   :  { %v7580_v0 = vld [vmem:[#allocation2 + $0xc6c] sm:$0xf0]  ;;  %v7352_v61 = vld [vmem:[#allocation2 + $0x554] sm:$0xf] }
 0x206   :  { %v6656_v1 = vld [vmem:[#allocation2 + $0xe50] sm:$0xf]  ;;  %v6401_v10 = vor.u32 %v7580_v0, %v6400_v63  ;;  %3758 = vmatpush.bf16.msrb.mxu1 %v6145_v9  ;;  %v5506_v62 = vld [vmem:[#allocation2 + $0x570] sm:$0xf0] }
 0x207   :  { %v7644_v2 = vld [vmem:[#allocation2 + $0xe6c] sm:$0xf0]  ;;  %v7416_v63 = vld [vmem:[#allocation2 + $0x754] sm:$0xf]  ;;  %v5509_v5 = vor.u32 %v7352_v61, %v5506_v62 }
 0x208   :  { %v5856_v7 = vld [vmem:[#allocation2 + $0x810] sm:$0xf]  ;;  %v6657_v16 = vor.u32 %v7644_v2, %v6656_v1  ;;  %3771 = vmatpush.bf16.msrb.mxu2 %v6401_v10  ;;  %v5762_v0 = vld [vmem:[#allocation2 + $0x770] sm:$0xf0]  ;;  %v4997_v1 = vor.u32 %v7224_v56, %v4994_v57  ;;  %v5253_v2 = vor.u32 %v7288_v58, %v5250_v60 }
 0x209   :  { %v7444_v8 = vld [vmem:[#allocation2 + $0x82c] sm:$0xf0]  ;;  %v7280_v9 = vld [vmem:[#allocation2 + $0x314] sm:$0xf]  ;;  %v5765_v10 = vor.u32 %v7416_v63, %v5762_v0  ;;  %v3555_v63 = vpop.f32.mrf.mxu1 }
 0x20a   :  { %v6112_v11 = vld [vmem:[#allocation2 + $0xa10] sm:$0xf]  ;;  %v5857_v26 = vor.u32 %v7444_v8, %v5856_v7  ;;  %3784 = vmatpush.bf16.msrb.mxu3 %v6657_v16  ;;  %v7216_v7 = vld [vmem:[#allocation2 + $0x114] sm:$0xf] }
 0x20b   :  { %v7508_v12 = vld [vmem:[#allocation2 + $0xa2c] sm:$0xf0]  ;;  %v4962_v8 = vld [vmem:[#allocation2 + $0x130] sm:$0xf0] }
 0x20c   :  { %v6368_v13 = vld [vmem:[#allocation2 + $0xc10] sm:$0xf]  ;;  %v6113_v30 = vor.u32 %v7508_v12, %v6112_v11  ;;  %3746 = vmatpush.bf16.msrb.mxu0 %v5857_v26  ;;  %v5218_v11 = vld [vmem:[#allocation2 + $0x330] sm:$0xf0] }
 0x20d   :  { %v7572_v17 = vld [vmem:[#allocation2 + $0xc2c] sm:$0xf0]  ;;  %v7344_v12 = vld [vmem:[#allocation2 + $0x514] sm:$0xf] }
 0x20e   :  { %v6624_v18 = vld [vmem:[#allocation2 + $0xe10] sm:$0xf]  ;;  %v6369_v31 = vor.u32 %v7572_v17, %v6368_v13  ;;  %3759 = vmatpush.bf16.msrb.mxu1 %v6113_v30  ;;  %v5474_v13 = vld [vmem:[#allocation2 + $0x530] sm:$0xf0]  ;;  %v4965_v17 = vor.u32 %v7216_v7, %v4962_v8 }
 0x20f   :  { %v7636_v19 = vld [vmem:[#allocation2 + $0xe2c] sm:$0xf0]  ;;  %3747 = vmatmul.bf16.vlgmr.msrb.gmra.mxu0 %v8109_v41  ;;  %v5730_v16 = vld [vmem:[#allocation2 + $0x730] sm:$0xf0]  ;;  %v5477_v23 = vor.u32 %v7344_v12, %v5474_v13 }
 0x210   :  { %v6625_v34 = vor.u32 %v7636_v19, %v6624_v18  ;;  %3772 = vmatpush.bf16.msrb.mxu2 %v6369_v31  ;;  %3791 = vmatpush.bf16.msra.mxu0 %v5061_v35  ;;  %v3540_v18 = vpop.f32.mrf.mxu0  ;;  %v5221_v19 = vor.u32 %v7280_v9, %v5218_v11  ;;  %v5733_v28 = vor.u32 %v7408_v14, %v5730_v16  ;;  %v5186_v29 = vld [vmem:[#allocation2 + $0x2f0] sm:$0xf0] }
 0x211   :  { %3760 = vmatmul.bf16.vlgmr.msrb.gmra.mxu1 %v8113_v44  ;;  %v3541_v26 = vadd.f32 %v3540_v18, %v8164_v53  ;;  %v7336_v30 = vld [vmem:[#allocation2 + $0x4d4] sm:$0xf]  ;;  %v4933_v35 = vor.u32 %v7208_v24, %v4930_v25 }
 0x212   :  { %3785 = vmatpush.bf16.msrb.mxu3 %v6625_v34  ;;  %3804 = vmatpush.bf16.msra.mxu1 %v5317_v36  ;;  %v5442_v31 = vld [vmem:[#allocation2 + $0x4f0] sm:$0xf0]  ;;  %v5189_v36 = vor.u32 %v7272_v22, %v5186_v29  ;;  %v3581_v22 = vpop.f32.mrf.mxu3 }
 0x213   :  { %3773 = vmatmul.bf16.vlgmr.msrb.gmra.mxu2 %v8107_v38  ;;  %v7400_v32 = vld [vmem:[#allocation2 + $0x6d4] sm:$0xf]  ;;  %v3554_v34 = vadd.f32 %v3553_v27, %v3541_v26 }
 0x214   :  { %3817 = vmatpush.bf16.msra.mxu2 %v5573_v37  ;;  %3792 = vmatpush.bf16.msra.mxu0 %v5029_v50  ;;  %v5698_v33 = vld [vmem:[#allocation2 + $0x6f0] sm:$0xf0]  ;;  %v5445_v37 = vor.u32 %v7336_v30, %v5442_v31 }
 0x215   :  { %3786 = vmatmul.bf16.vlgmr.msrb.gmra.mxu3 %v8111_v42  ;;  %v7200_v51 = vld [vmem:[#allocation2 + $0x94] sm:$0xf]  ;;  %v5701_v53 = vor.u32 %v7400_v32, %v5698_v33 }
 0x216   :  { %3830 = vmatpush.bf16.msra.mxu3 %v5829_v15  ;;  %3805 = vmatpush.bf16.msra.mxu1 %v5285_v54  ;;  %v4898_v39 = vld [vmem:[#allocation2 + $0xb0] sm:$0xf0]  ;;  %v3566_v15 = vpop.f32.mrf.mxu2 }
 0x217   :  { %v7264_v40 = vld [vmem:[#allocation2 + $0x294] sm:$0xf]  ;;  %v3567_v47 = vadd.f32 %v3566_v15, %v3554_v34 }
 0x218   :  { %3818 = vmatpush.bf16.msra.mxu2 %v5541_v55  ;;  %3793 = vmatpush.bf16.msra.mxu0 %v4997_v1  ;;  %v5154_v43 = vld [vmem:[#allocation2 + $0x2b0] sm:$0xf0]  ;;  %v4901_v55 = vor.u32 %v7200_v51, %v4898_v39  ;;  %v3542_v57 = vpop.f32.mrf.mxu0 }
 0x219   :  { %v7328_v45 = vld [vmem:[#allocation2 + $0x494] sm:$0xf]  ;;  %v8171_v56 = vadd.f32 %v3579_v48, %v3567_v47  ;;  %v5157_v58 = vor.u32 %v7264_v40, %v5154_v43 }
 0x21a   :  { %3831 = vmatpush.bf16.msra.mxu3 %v5797_v59  ;;  %3806 = vmatpush.bf16.msra.mxu1 %v5253_v2  ;;  %v5410_v46 = vld [vmem:[#allocation2 + $0x4b0] sm:$0xf0] }
 0x21b   :  { %v7392_v50 = vld [vmem:[#allocation2 + $0x694] sm:$0xf]  ;;  %v5413_v59 = vor.u32 %v7328_v45, %v5410_v46  ;;  %vm4105_vm4 = vcmp.ge.f32.partialorder %v8171_v56, 0.0 }
 0x21c   :  { %3819 = vmatpush.bf16.msra.mxu2 %v5509_v5  ;;  %3794 = vmatpush.bf16.msra.mxu0 %v4965_v17  ;;  %v5666_v54 = vld [vmem:[#allocation2 + $0x6b0] sm:$0xf0] }
 0x21d   :  { %v7192_v60 = vld [vmem:[#allocation2 + $0x54] sm:$0xf]  ;;  %v5669_v0 = vor.u32 %v7392_v50, %v5666_v54 }
 0x21e   :  { %3832 = vmatpush.bf16.msra.mxu3 %v5765_v10  ;;  %3807 = vmatpush.bf16.msra.mxu1 %v5221_v19  ;;  %v4866_v61 = vld [vmem:[#allocation2 + $0x70] sm:$0xf0]  ;;  %v3568_v18 = vpop.f32.mrf.mxu2 }
 0x21f   :  { %v7256_v62 = vld [vmem:[#allocation2 + $0x254] sm:$0xf]  ;;  %v4869_v9 = vor.u32 %v7192_v60, %v4866_v61 }
 0x220   :  { %3820 = vmatpush.bf16.msra.mxu2 %v5477_v23  ;;  %3795 = vmatpush.bf16.msra.mxu0 %v4933_v35  ;;  %v5122_v1 = vld [vmem:[#allocation2 + $0x270] sm:$0xf0] }
 0x221   :  { %v7320_v2 = vld [vmem:[#allocation2 + $0x454] sm:$0xf]  ;;  %v5125_v12 = vor.u32 %v7256_v62, %v5122_v1 }
 0x222   :  { %3833 = vmatpush.bf16.msra.mxu3 %v5733_v28  ;;  %3808 = vmatpush.bf16.msra.mxu1 %v5189_v36  ;;  %v5378_v5 = vld [vmem:[#allocation2 + $0x470] sm:$0xf0] }
 0x223   :  { %v7384_v7 = vld [vmem:[#allocation2 + $0x654] sm:$0xf]  ;;  %v5381_v13 = vor.u32 %v7320_v2, %v5378_v5 }
 0x224   :  { %3821 = vmatpush.bf16.msra.mxu2 %v5445_v37  ;;  %v5634_v8 = vld [vmem:[#allocation2 + $0x670] sm:$0xf0]  ;;  %3796 = vmatpush.bf16.msra.mxu0 %v4901_v55 }
 0x225   :  { %v7184_v10 = vld [vmem:[#allocation2 + $0x14] sm:$0xf]  ;;  %v5637_v19 = vor.u32 %v7384_v7, %v5634_v8 }
 0x226   :  { %3834 = vmatpush.bf16.msra.mxu3 %v5701_v53  ;;  %v4834_v11 = vld [vmem:[#allocation2 + $0x30] sm:$0xf0]  ;;  %3809 = vmatpush.bf16.msra.mxu1 %v5157_v58 }
 0x227   :  { %v7248_v14 = vld [vmem:[#allocation2 + $0x214] sm:$0xf]  ;;  %v4837_v29 = vor.u32 %v7184_v10, %v4834_v11 }
 0x228   :  { %3822 = vmatpush.bf16.msra.mxu2 %v5413_v59  ;;  %v5090_v16 = vld [vmem:[#allocation2 + $0x230] sm:$0xf0]  ;;  %3797 = vmatpush.bf16.msra.mxu0 %v4869_v9 }
 0x229   :  { %v7312_v17 = vld [vmem:[#allocation2 + $0x414] sm:$0xf]  ;;  %v5093_v33 = vor.u32 %v7248_v14, %v5090_v16 }
 0x22a   :  { %3835 = vmatpush.bf16.msra.mxu3 %v5669_v0  ;;  %v5346_v23 = vld [vmem:[#allocation2 + $0x430] sm:$0xf0]  ;;  %3810 = vmatpush.bf16.msra.mxu1 %v5125_v12 }
 0x22b   :  { %v7376_v24 = vld [vmem:[#allocation2 + $0x614] sm:$0xf]  ;;  %v5349_v34 = vor.u32 %v7312_v17, %v5346_v23 }
 0x22c   :  { %v5602_v25 = vld [vmem:[#allocation2 + $0x630] sm:$0xf0]  ;;  %3823 = vmatpush.bf16.msra.mxu2 %v5381_v13  ;;  %3798 = vmatpush.bf16.msra.mxu0 %v4837_v29  ;;  %v670_v13 = vperm.slane %v8161_v3, 3 }
 0x22d   :  { %v7496_v26 = vld [vmem:[#allocation2 + $0x9d4] sm:$0xf]  ;;  %v5605_v37 = vor.u32 %v7376_v24, %v5602_v25  ;;  %v3592_v25 = vpop.f32.mrf.mxu0 }
 0x22e   :  { %v6082_v27 = vld [vmem:[#allocation2 + $0x9f0] sm:$0xf0]  ;;  %3836 = vmatpush.bf16.msra.mxu3 %v5637_v19  ;;  %3811 = vmatpush.bf16.msra.mxu1 %v5093_v33 }
 0x22f   :  { %v7560_v28 = vld [vmem:[#allocation2 + $0xbd4] sm:$0xf]  ;;  %v6085_v51 = vor.u32 %v7496_v26, %v6082_v27  ;;  %3799 = vmatmul.bf16.vlgmr.msra.gmra.mxu0 %v8094_v20 }
 0x230   :  { %v6338_v30 = vld [vmem:[#allocation2 + $0xbf0] sm:$0xf0]  ;;  %3824 = vmatpush.bf16.msra.mxu2 %v5349_v34 }
 0x231   :  { %v7624_v31 = vld [vmem:[#allocation2 + $0xdd4] sm:$0xf]  ;;  %v6341_v39 = vor.u32 %v7560_v28, %v6338_v30  ;;  %3843 = vmatpush.bf16.msrb.mxu0 %v6085_v51  ;;  %3812 = vmatmul.bf16.vlgmr.msra.gmra.mxu1 %v8097_v21  ;;  %v3593_v30 = vadd.f32 %v3592_v25, %v670_v13 }
 0x232   :  { %v6594_v32 = vld [vmem:[#allocation2 + $0xdf0] sm:$0xf0]  ;;  %3837 = vmatpush.bf16.msra.mxu3 %v5605_v37 }
 0x233   :  { %v7688_v35 = vld [vmem:[#allocation2 + $0xfd4] sm:$0xf]  ;;  %v6597_v40 = vor.u32 %v7624_v31, %v6594_v32  ;;  %3856 = vmatpush.bf16.msrb.mxu1 %v6341_v39  ;;  %3825 = vmatmul.bf16.vlgmr.msra.gmra.mxu2 %v8086_v4  ;;  %v3605_v31 = vpop.f32.mrf.mxu1 }
 0x234   :  { %v6850_v36 = vld [vmem:[#allocation2 + $0xff0] sm:$0xf0]  ;;  %v3606_v37 = vadd.f32 %v3605_v31, %v3593_v30  ;;  %v5064_v30 = vld [vmem:[#allocation2 + $0x1d8] sm:$0xf] }
 0x235   :  { %v7488_v15 = vld [vmem:[#allocation2 + $0x994] sm:$0xf]  ;;  %v6853_v45 = vor.u32 %v7688_v35, %v6850_v36  ;;  %3869 = vmatpush.bf16.msrb.mxu2 %v6597_v40  ;;  %3838 = vmatmul.bf16.vlgmr.msra.gmra.mxu3 %v8091_v6  ;;  %v7245_v31 = vld [vmem:[#allocation2 + $0x1f4] sm:$0xf0] }
 0x236   :  { %v6050_v53 = vld [vmem:[#allocation2 + $0x9b0] sm:$0xf0] }
 0x237   :  { %v7552_v43 = vld [vmem:[#allocation2 + $0xb94] sm:$0xf]  ;;  %v6053_v55 = vor.u32 %v7488_v15, %v6050_v53  ;;  %3882 = vmatpush.bf16.msrb.mxu3 %v6853_v45  ;;  %v3618_v45 = vpop.f32.mrf.mxu2 }
 0x238   :  { %v6306_v46 = vld [vmem:[#allocation2 + $0xbb0] sm:$0xf0] }
 0x239   :  { %v7616_v47 = vld [vmem:[#allocation2 + $0xd94] sm:$0xf]  ;;  %v6309_v57 = vor.u32 %v7552_v43, %v6306_v46  ;;  %3844 = vmatpush.bf16.msrb.mxu0 %v6053_v55  ;;  %v3631_v55 = vpop.f32.mrf.mxu3 }
 0x23a   :  { %v6562_v48 = vld [vmem:[#allocation2 + $0xdb0] sm:$0xf0] }
 0x23b   :  { %v7680_v50 = vld [vmem:[#allocation2 + $0xf94] sm:$0xf]  ;;  %v6565_v58 = vor.u32 %v7616_v47, %v6562_v48  ;;  %3857 = vmatpush.bf16.msrb.mxu1 %v6309_v57 }
 0x23c   :  { %v6818_v54 = vld [vmem:[#allocation2 + $0xfb0] sm:$0xf0] }
 0x23d   :  { %v7480_v59 = vld [vmem:[#allocation2 + $0x954] sm:$0xf]  ;;  %v6821_v62 = vor.u32 %v7680_v50, %v6818_v54  ;;  %3870 = vmatpush.bf16.msrb.mxu2 %v6565_v58  ;;  %v3619_v54 = vadd.f32 %v3618_v45, %v3606_v37  ;;  %v5032_v45 = vld [vmem:[#allocation2 + $0x198] sm:$0xf] }
 0x23e   :  { %v6018_v60 = vld [vmem:[#allocation2 + $0x970] sm:$0xf0] }
 0x23f   :  { %v7544_v61 = vld [vmem:[#allocation2 + $0xb54] sm:$0xf]  ;;  %v6021_v7 = vor.u32 %v7480_v59, %v6018_v60  ;;  %3883 = vmatpush.bf16.msrb.mxu3 %v6821_v62  ;;  %v8178_v60 = vadd.f32 %v3631_v55, %v3619_v54  ;;  %v3620_v25 = vpop.f32.mrf.mxu2  ;;  %v5544_v54 = vld [vmem:[#allocation2 + $0x598] sm:$0xf] }
 0x240   :  { %v6274_v63 = vld [vmem:[#allocation2 + $0xb70] sm:$0xf0]  ;;  %v7365_v55 = vld [vmem:[#allocation2 + $0x5b4] sm:$0xf0] }
 0x241   :  { %v7608_v0 = vld [vmem:[#allocation2 + $0xd54] sm:$0xf]  ;;  %v6277_v9 = vor.u32 %v7544_v61, %v6274_v63  ;;  %3845 = vmatpush.bf16.msrb.mxu0 %v6021_v7  ;;  %v3594_v61 = vpop.f32.mrf.mxu0  ;;  %v5736_v25 = vld [vmem:[#allocation2 + $0x718] sm:$0xf] }
 0x242   :  { %v6530_v1 = vld [vmem:[#allocation2 + $0xd70] sm:$0xf0] }
 0x243   :  { %v7672_v2 = vld [vmem:[#allocation2 + $0xf54] sm:$0xf]  ;;  %v6533_v10 = vor.u32 %v7608_v0, %v6530_v1  ;;  %3858 = vmatpush.bf16.msrb.mxu1 %v6277_v9 }
 0x244   :  { %v6786_v5 = vld [vmem:[#allocation2 + $0xf70] sm:$0xf0] }
 0x245   :  { %v7472_v8 = vld [vmem:[#allocation2 + $0x914] sm:$0xf]  ;;  %v6789_v14 = vor.u32 %v7672_v2, %v6786_v5  ;;  %3871 = vmatpush.bf16.msrb.mxu2 %v6533_v10  ;;  %v3607_v5 = vpop.f32.mrf.mxu1 }
 0x246   :  { %v5986_v11 = vld [vmem:[#allocation2 + $0x930] sm:$0xf0]  ;;  %v7293_v5 = vld [vmem:[#allocation2 + $0x374] sm:$0xf0] }
 0x247   :  { %v7536_v12 = vld [vmem:[#allocation2 + $0xb14] sm:$0xf]  ;;  %v5989_v24 = vor.u32 %v7472_v8, %v5986_v11  ;;  %3884 = vmatpush.bf16.msrb.mxu3 %v6789_v14 }
 0x248   :  { %v6242_v16 = vld [vmem:[#allocation2 + $0xb30] sm:$0xf0] }
 0x249   :  { %v7600_v17 = vld [vmem:[#allocation2 + $0xd14] sm:$0xf]  ;;  %v6245_v22 = vor.u32 %v7536_v12, %v6242_v16  ;;  %3846 = vmatpush.bf16.msrb.mxu0 %v5989_v24 }
 0x24a   :  { %v6498_v18 = vld [vmem:[#allocation2 + $0xd30] sm:$0xf0] }
 0x24b   :  { %v7664_v19 = vld [vmem:[#allocation2 + $0xf14] sm:$0xf]  ;;  %v6501_v26 = vor.u32 %v7600_v17, %v6498_v18  ;;  %3859 = vmatpush.bf16.msrb.mxu1 %v6245_v22 }
 0x24c   :  { %v6754_v23 = vld [vmem:[#allocation2 + $0xf30] sm:$0xf0] }
 0x24d   :  { %v7464_v27 = vld [vmem:[#allocation2 + $0x8d4] sm:$0xf]  ;;  %v6757_v3 = vor.u32 %v7664_v19, %v6754_v23  ;;  %3872 = vmatpush.bf16.msrb.mxu2 %v6501_v26 }
 0x24e   :  { %v5954_v28 = vld [vmem:[#allocation2 + $0x8f0] sm:$0xf0] }
 0x24f   :  { %v7528_v29 = vld [vmem:[#allocation2 + $0xad4] sm:$0xf]  ;;  %v5957_v51 = vor.u32 %v7464_v27, %v5954_v28  ;;  %3885 = vmatpush.bf16.msrb.mxu3 %v6757_v3  ;;  %v5320_v3 = vld [vmem:[#allocation2 + $0x3d8] sm:$0xf] }
 0x250   :  { %v6210_v32 = vld [vmem:[#allocation2 + $0xaf0] sm:$0xf0] }
 0x251   :  { %v7592_v33 = vld [vmem:[#allocation2 + $0xcd4] sm:$0xf]  ;;  %v6213_v39 = vor.u32 %v7528_v29, %v6210_v32  ;;  %3847 = vmatpush.bf16.msrb.mxu0 %v5957_v51  ;;  %v3633_v29 = vpop.f32.mrf.mxu3  ;;  %v5832_v51 = vld [vmem:[#allocation2 + $0x7d8] sm:$0xf] }
 0x252   :  { %v6466_v34 = vld [vmem:[#allocation2 + $0xcf0] sm:$0xf0] }
 0x253   :  { %v7656_v35 = vld [vmem:[#allocation2 + $0xed4] sm:$0xf]  ;;  %v6469_v40 = vor.u32 %v7592_v33, %v6466_v34  ;;  %3860 = vmatpush.bf16.msrb.mxu1 %v6213_v39  ;;  %v7309_v33 = vld [vmem:[#allocation2 + $0x3f4] sm:$0xf0] }
 0x254   :  { %v6722_v36 = vld [vmem:[#allocation2 + $0xef0] sm:$0xf0]  ;;  %v5576_v34 = vld [vmem:[#allocation2 + $0x5d8] sm:$0xf] }
 0x255   :  { %v7456_v15 = vld [vmem:[#allocation2 + $0x894] sm:$0xf]  ;;  %v6725_v46 = vor.u32 %v7656_v35, %v6722_v36  ;;  %3873 = vmatpush.bf16.msrb.mxu2 %v6469_v40  ;;  %v7373_v35 = vld [vmem:[#allocation2 + $0x5f4] sm:$0xf0] }
 0x256   :  { %v5922_v53 = vld [vmem:[#allocation2 + $0x8b0] sm:$0xf0]  ;;  %v7437_v39 = vld [vmem:[#allocation2 + $0x7f4] sm:$0xf0] }
 0x257   :  { %v7520_v43 = vld [vmem:[#allocation2 + $0xa94] sm:$0xf]  ;;  %v5925_v59 = vor.u32 %v7456_v15, %v5922_v53  ;;  %3886 = vmatpush.bf16.msrb.mxu3 %v6725_v46  ;;  %v5065_v15 = vor.u32 %v7245_v31, %v5064_v30  ;;  %v5321_v53 = vor.u32 %v7309_v33, %v5320_v3  ;;  %v7237_v46 = vld [vmem:[#allocation2 + $0x1b4] sm:$0xf0]  ;;  %v3657_v33 = vpop.f32.mrf.mxu1 }
 0x258   :  { %v6178_v47 = vld [vmem:[#allocation2 + $0xab0] sm:$0xf0]  ;;  %v4936_v30 = vld [vmem:[#allocation2 + $0xd8] sm:$0xf] }
 0x259   :  { %v7584_v48 = vld [vmem:[#allocation2 + $0xc94] sm:$0xf]  ;;  %v6181_v62 = vor.u32 %v7520_v43, %v6178_v47  ;;  %3848 = vmatpush.bf16.msrb.mxu0 %v5925_v59  ;;  %v5577_v43 = vor.u32 %v7373_v35, %v5576_v34  ;;  %v5288_v47 = vld [vmem:[#allocation2 + $0x398] sm:$0xf]  ;;  %v5033_v59 = vor.u32 %v7237_v46, %v5032_v45 }
 0x25a   :  { %v6434_v50 = vld [vmem:[#allocation2 + $0xcb0] sm:$0xf0]  ;;  %v7213_v31 = vld [vmem:[#allocation2 + $0xf4] sm:$0xf0] }
 0x25b   :  { %v7648_v57 = vld [vmem:[#allocation2 + $0xe94] sm:$0xf]  ;;  %v6437_v63 = vor.u32 %v7584_v48, %v6434_v50  ;;  %3861 = vmatpush.bf16.msrb.mxu1 %v6181_v62  ;;  %v5833_v48 = vor.u32 %v7437_v39, %v5832_v51  ;;  %v7301_v50 = vld [vmem:[#allocation2 + $0x3b4] sm:$0xf0]  ;;  %v5545_v62 = vor.u32 %v7365_v55, %v5544_v54 }
 0x25c   :  { %v6690_v58 = vld [vmem:[#allocation2 + $0xeb0] sm:$0xf0]  ;;  %v5289_v61 = vor.u32 %v7301_v50, %v5288_v47  ;;  %v5192_v3 = vld [vmem:[#allocation2 + $0x2d8] sm:$0xf] }
 0x25d   :  { %v7448_v0 = vld [vmem:[#allocation2 + $0x854] sm:$0xf]  ;;  %v6693_v7 = vor.u32 %v7648_v57, %v6690_v58  ;;  %3874 = vmatpush.bf16.msrb.mxu2 %v6437_v63  ;;  %v5800_v57 = vld [vmem:[#allocation2 + $0x798] sm:$0xf] }
 0x25e   :  { %v5890_v1 = vld [vmem:[#allocation2 + $0x870] sm:$0xf0]  ;;  %v7429_v58 = vld [vmem:[#allocation2 + $0x7b4] sm:$0xf0] }
 0x25f   :  { %v7512_v2 = vld [vmem:[#allocation2 + $0xa54] sm:$0xf]  ;;  %v5893_v13 = vor.u32 %v7448_v0, %v5890_v1  ;;  %3887 = vmatpush.bf16.msrb.mxu3 %v6693_v7  ;;  %v5000_v63 = vld [vmem:[#allocation2 + $0x158] sm:$0xf] }
 0x260   :  { %v6146_v8 = vld [vmem:[#allocation2 + $0xa70] sm:$0xf0]  ;;  %v7229_v0 = vld [vmem:[#allocation2 + $0x174] sm:$0xf0] }
 0x261   :  { %v7576_v9 = vld [vmem:[#allocation2 + $0xc54] sm:$0xf]  ;;  %v6149_v17 = vor.u32 %v7512_v2, %v6146_v8  ;;  %3849 = vmatpush.bf16.msrb.mxu0 %v5893_v13  ;;  %v5256_v1 = vld [vmem:[#allocation2 + $0x358] sm:$0xf]  ;;  %v5801_v2 = vor.u32 %v7429_v58, %v5800_v57  ;;  %v3683_v58 = vpop.f32.mrf.mxu3 }
 0x262   :  { %v6402_v10 = vld [vmem:[#allocation2 + $0xc70] sm:$0xf0]  ;;  %v5512_v7 = vld [vmem:[#allocation2 + $0x558] sm:$0xf] }
 0x263   :  { %v7640_v11 = vld [vmem:[#allocation2 + $0xe54] sm:$0xf]  ;;  %v6405_v18 = vor.u32 %v7576_v9, %v6402_v10  ;;  %3862 = vmatpush.bf16.msrb.mxu1 %v6149_v17  ;;  %v7357_v8 = vld [vmem:[#allocation2 + $0x574] sm:$0xf0] }
 0x264   :  { %v6658_v12 = vld [vmem:[#allocation2 + $0xe70] sm:$0xf0]  ;;  %v5768_v9 = vld [vmem:[#allocation2 + $0x758] sm:$0xf]  ;;  %v5513_v13 = vor.u32 %v7357_v8, %v5512_v7 }
 0x265   :  { %v7440_v14 = vld [vmem:[#allocation2 + $0x814] sm:$0xf]  ;;  %v6661_v22 = vor.u32 %v7640_v11, %v6658_v12  ;;  %3875 = vmatpush.bf16.msrb.mxu2 %v6405_v18  ;;  %v7421_v10 = vld [vmem:[#allocation2 + $0x774] sm:$0xf0]  ;;  %v5001_v11 = vor.u32 %v7229_v0, %v5000_v63  ;;  %v5257_v12 = vor.u32 %v7293_v5, %v5256_v1 }
 0x266   :  { %v5858_v16 = vld [vmem:[#allocation2 + $0x830] sm:$0xf0]  ;;  %v5224_v17 = vld [vmem:[#allocation2 + $0x318] sm:$0xf]  ;;  %v5769_v18 = vor.u32 %v7421_v10, %v5768_v9  ;;  %v3659_v9 = vpop.f32.mrf.mxu1 }
 0x267   :  { %v7504_v19 = vld [vmem:[#allocation2 + $0xa14] sm:$0xf]  ;;  %v5861_v32 = vor.u32 %v7440_v14, %v5858_v16  ;;  %3888 = vmatpush.bf16.msrb.mxu3 %v6661_v22  ;;  %v4968_v14 = vld [vmem:[#allocation2 + $0x118] sm:$0xf] }
 0x268   :  { %v6114_v23 = vld [vmem:[#allocation2 + $0xa30] sm:$0xf0]  ;;  %v7221_v16 = vld [vmem:[#allocation2 + $0x134] sm:$0xf0] }
 0x269   :  { %v7568_v24 = vld [vmem:[#allocation2 + $0xc14] sm:$0xf]  ;;  %v6117_v36 = vor.u32 %v7504_v19, %v6114_v23  ;;  %3850 = vmatpush.bf16.msrb.mxu0 %v5861_v32  ;;  %v7285_v19 = vld [vmem:[#allocation2 + $0x334] sm:$0xf0] }
 0x26a   :  { %v6370_v26 = vld [vmem:[#allocation2 + $0xc30] sm:$0xf0]  ;;  %v5480_v23 = vld [vmem:[#allocation2 + $0x518] sm:$0xf] }
 0x26b   :  { %v7632_v27 = vld [vmem:[#allocation2 + $0xe14] sm:$0xf]  ;;  %v6373_v37 = vor.u32 %v7568_v24, %v6370_v26  ;;  %3863 = vmatpush.bf16.msrb.mxu1 %v6117_v36  ;;  %v7349_v24 = vld [vmem:[#allocation2 + $0x534] sm:$0xf0]  ;;  %v4969_v26 = vor.u32 %v7221_v16, %v4968_v14 }
 0x26c   :  { %v6626_v28 = vld [vmem:[#allocation2 + $0xe30] sm:$0xf0]  ;;  %3851 = vmatmul.bf16.vlgmr.msrb.gmra.mxu0 %v8109_v41  ;;  %v7413_v22 = vld [vmem:[#allocation2 + $0x734] sm:$0xf0]  ;;  %v5481_v29 = vor.u32 %v7349_v24, %v5480_v23 }
 0x26d   :  { %v6629_v40 = vor.u32 %v7632_v27, %v6626_v28  ;;  %3876 = vmatpush.bf16.msrb.mxu2 %v6373_v37  ;;  %3895 = vmatpush.bf16.msra.mxu0 %v5065_v15  ;;  %v3644_v27 = vpop.f32.mrf.mxu0  ;;  %v5225_v28 = vor.u32 %v7285_v19, %v5224_v17  ;;  %v5737_v34 = vor.u32 %v7413_v22, %v5736_v25  ;;  %v7277_v35 = vld [vmem:[#allocation2 + $0x2f4] sm:$0xf0] }
 0x26e   :  { %3864 = vmatmul.bf16.vlgmr.msrb.gmra.mxu1 %v8113_v44  ;;  %v3645_v32 = vadd.f32 %v3644_v27, %v8178_v60  ;;  %v5448_v36 = vld [vmem:[#allocation2 + $0x4d8] sm:$0xf]  ;;  %v4937_v15 = vor.u32 %v7213_v31, %v4936_v30 }
 0x26f   :  { %3889 = vmatpush.bf16.msrb.mxu3 %v6629_v40  ;;  %3908 = vmatpush.bf16.msra.mxu1 %v5321_v53  ;;  %v7341_v37 = vld [vmem:[#allocation2 + $0x4f4] sm:$0xf0]  ;;  %v5193_v53 = vor.u32 %v7277_v35, %v5192_v3  ;;  %v3685_v3 = vpop.f32.mrf.mxu3 }
 0x270   :  { %3877 = vmatmul.bf16.vlgmr.msrb.gmra.mxu2 %v8107_v38  ;;  %v5704_v51 = vld [vmem:[#allocation2 + $0x6d8] sm:$0xf]  ;;  %v3658_v40 = vadd.f32 %v3657_v33, %v3645_v32 }
 0x271   :  { %3921 = vmatpush.bf16.msra.mxu2 %v5577_v43  ;;  %3896 = vmatpush.bf16.msra.mxu0 %v5033_v59  ;;  %v7405_v39 = vld [vmem:[#allocation2 + $0x6f4] sm:$0xf0]  ;;  %v5449_v43 = vor.u32 %v7341_v37, %v5448_v36 }
 0x272   :  { %3890 = vmatmul.bf16.vlgmr.msrb.gmra.mxu3 %v8111_v42  ;;  %v4904_v45 = vld [vmem:[#allocation2 + $0x98] sm:$0xf]  ;;  %v5705_v60 = vor.u32 %v7405_v39, %v5704_v51 }
 0x273   :  { %3934 = vmatpush.bf16.msra.mxu3 %v5833_v48  ;;  %3909 = vmatpush.bf16.msra.mxu1 %v5289_v61  ;;  %v7205_v46 = vld [vmem:[#allocation2 + $0xb4] sm:$0xf0]  ;;  %v3670_v48 = vpop.f32.mrf.mxu2 }
 0x274   :  { %v5160_v47 = vld [vmem:[#allocation2 + $0x298] sm:$0xf]  ;;  %v3671_v57 = vadd.f32 %v3670_v48, %v3658_v40 }
 0x275   :  { %3922 = vmatpush.bf16.msra.mxu2 %v5545_v62  ;;  %3897 = vmatpush.bf16.msra.mxu0 %v5001_v11  ;;  %v7269_v50 = vld [vmem:[#allocation2 + $0x2b4] sm:$0xf0]  ;;  %v4905_v62 = vor.u32 %v7205_v46, %v4904_v45  ;;  %v3646_v0 = vpop.f32.mrf.mxu0 }
 0x276   :  { %v5416_v54 = vld [vmem:[#allocation2 + $0x498] sm:$0xf]  ;;  %v8185_v63 = vadd.f32 %v3683_v58, %v3671_v57  ;;  %v5161_v1 = vor.u32 %v7269_v50, %v5160_v47 }
 0x277   :  { %3935 = vmatpush.bf16.msra.mxu3 %v5801_v2  ;;  %3910 = vmatpush.bf16.msra.mxu1 %v5257_v12  ;;  %v7333_v55 = vld [vmem:[#allocation2 + $0x4b4] sm:$0xf0] }
 0x278   :  { %v5672_v59 = vld [vmem:[#allocation2 + $0x698] sm:$0xf]  ;;  %v5417_v2 = vor.u32 %v7333_v55, %v5416_v54  ;;  %vm4106_vm6 = vcmp.ge.f32.partialorder %v8185_v63, 0.0 }
 0x279   :  { %3923 = vmatpush.bf16.msra.mxu2 %v5513_v13  ;;  %3898 = vmatpush.bf16.msra.mxu0 %v4969_v26  ;;  %v7397_v61 = vld [vmem:[#allocation2 + $0x6b4] sm:$0xf0] }
 0x27a   :  { %v4872_v5 = vld [vmem:[#allocation2 + $0x58] sm:$0xf]  ;;  %v5673_v10 = vor.u32 %v7397_v61, %v5672_v59 }
 0x27b   :  { %3936 = vmatpush.bf16.msra.mxu3 %v5769_v18  ;;  %3911 = vmatpush.bf16.msra.mxu1 %v5225_v28  ;;  %v7197_v7 = vld [vmem:[#allocation2 + $0x74] sm:$0xf0]  ;;  %v3672_v27 = vpop.f32.mrf.mxu2 }
 0x27c   :  { %v5128_v8 = vld [vmem:[#allocation2 + $0x258] sm:$0xf]  ;;  %v4873_v17 = vor.u32 %v7197_v7, %v4872_v5 }
 0x27d   :  { %3924 = vmatpush.bf16.msra.mxu2 %v5481_v29  ;;  %3899 = vmatpush.bf16.msra.mxu0 %v4937_v15  ;;  %v7261_v11 = vld [vmem:[#allocation2 + $0x274] sm:$0xf0]  ;;  %v3696_v3 = vpop.f32.mrf.mxu0 }
 0x27e   :  { %v5384_v12 = vld [vmem:[#allocation2 + $0x458] sm:$0xf]  ;;  %v5129_v23 = vor.u32 %v7261_v11, %v5128_v8 }
 0x27f   :  { %3937 = vmatpush.bf16.msra.mxu3 %v5737_v34  ;;  %3912 = vmatpush.bf16.msra.mxu1 %v5193_v53  ;;  %v7325_v13 = vld [vmem:[#allocation2 + $0x474] sm:$0xf0] }
 0x280   :  { %v5640_v14 = vld [vmem:[#allocation2 + $0x658] sm:$0xf]  ;;  %v5385_v24 = vor.u32 %v7325_v13, %v5384_v12 }
 0x281   :  { %3925 = vmatpush.bf16.msra.mxu2 %v5449_v43  ;;  %v7389_v16 = vld [vmem:[#allocation2 + $0x674] sm:$0xf0]  ;;  %3900 = vmatpush.bf16.msra.mxu0 %v4905_v62 }
 0x282   :  { %v4840_v18 = vld [vmem:[#allocation2 + $0x18] sm:$0xf]  ;;  %v5641_v28 = vor.u32 %v7389_v16, %v5640_v14 }
 0x283   :  { %3938 = vmatpush.bf16.msra.mxu3 %v5705_v60  ;;  %v7189_v19 = vld [vmem:[#allocation2 + $0x34] sm:$0xf0]  ;;  %3913 = vmatpush.bf16.msra.mxu1 %v5161_v1 }
 0x284   :  { %v5096_v25 = vld [vmem:[#allocation2 + $0x218] sm:$0xf]  ;;  %v4841_v35 = vor.u32 %v7189_v19, %v4840_v18 }
 0x285   :  { %3926 = vmatpush.bf16.msra.mxu2 %v5417_v2  ;;  %v7253_v22 = vld [vmem:[#allocation2 + $0x234] sm:$0xf0]  ;;  %3901 = vmatpush.bf16.msra.mxu0 %v4873_v17 }
 0x286   :  { %v5352_v26 = vld [vmem:[#allocation2 + $0x418] sm:$0xf]  ;;  %v5097_v39 = vor.u32 %v7253_v22, %v5096_v25 }
 0x287   :  { %3939 = vmatpush.bf16.msra.mxu3 %v5673_v10  ;;  %v7317_v29 = vld [vmem:[#allocation2 + $0x434] sm:$0xf0]  ;;  %3914 = vmatpush.bf16.msra.mxu1 %v5129_v23 }
 0x288   :  { %v5608_v30 = vld [vmem:[#allocation2 + $0x618] sm:$0xf]  ;;  %v5353_v40 = vor.u32 %v7317_v29, %v5352_v26 }
 0x289   :  { %v7381_v31 = vld [vmem:[#allocation2 + $0x634] sm:$0xf0]  ;;  %3927 = vmatpush.bf16.msra.mxu2 %v5385_v24  ;;  %3902 = vmatpush.bf16.msra.mxu0 %v4841_v35  ;;  %v8191_v24 = vld [vmem:[#allocation4] sm:$0xff] }
 0x28a   :  { %v6088_v32 = vld [vmem:[#allocation2 + $0x9d8] sm:$0xf]  ;;  %v5609_v43 = vor.u32 %v7381_v31, %v5608_v30  ;;  %v671_v25 = vperm.slane %v8191_v24, 4 }
 0x28b   :  { %v7501_v33 = vld [vmem:[#allocation2 + $0x9f4] sm:$0xf0]  ;;  %3940 = vmatpush.bf16.msra.mxu3 %v5641_v28  ;;  %3915 = vmatpush.bf16.msra.mxu1 %v5097_v39 }
 0x28c   :  { %v6344_v34 = vld [vmem:[#allocation2 + $0xbd8] sm:$0xf]  ;;  %v6089_v45 = vor.u32 %v7501_v33, %v6088_v32  ;;  %3903 = vmatmul.bf16.vlgmr.msra.gmra.mxu0 %v8094_v20 }
 0x28d   :  { %v7565_v36 = vld [vmem:[#allocation2 + $0xbf4] sm:$0xf0]  ;;  %3928 = vmatpush.bf16.msra.mxu2 %v5353_v40 }
 0x28e   :  { %v6600_v37 = vld [vmem:[#allocation2 + $0xdd8] sm:$0xf]  ;;  %v6345_v46 = vor.u32 %v7565_v36, %v6344_v34  ;;  %3947 = vmatpush.bf16.msrb.mxu0 %v6089_v45  ;;  %3916 = vmatmul.bf16.vlgmr.msra.gmra.mxu1 %v8097_v21 }
 0x28f   :  { %v7629_v51 = vld [vmem:[#allocation2 + $0xdf4] sm:$0xf0]  ;;  %3941 = vmatpush.bf16.msra.mxu3 %v5609_v43 }
 0x290   :  { %v6856_v15 = vld [vmem:[#allocation2 + $0xfd8] sm:$0xf]  ;;  %v6601_v47 = vor.u32 %v7629_v51, %v6600_v37  ;;  %3960 = vmatpush.bf16.msrb.mxu1 %v6345_v46  ;;  %3929 = vmatmul.bf16.vlgmr.msra.gmra.mxu2 %v8086_v4  ;;  %v3697_v37 = vadd.f32 %v3696_v3, %v671_v25  ;;  %v3709_v51 = vpop.f32.mrf.mxu1 }
 0x291   :  { %v7693_v53 = vld [vmem:[#allocation2 + $0xff4] sm:$0xf0] }
 0x292   :  { %v6056_v48 = vld [vmem:[#allocation2 + $0x998] sm:$0xf]  ;;  %v6857_v54 = vor.u32 %v7693_v53, %v6856_v15  ;;  %3973 = vmatpush.bf16.msrb.mxu2 %v6601_v47  ;;  %3942 = vmatmul.bf16.vlgmr.msra.gmra.mxu3 %v8091_v6  ;;  %v3710_v46 = vadd.f32 %v3709_v51, %v3697_v37 }
 0x293   :  { %v7493_v60 = vld [vmem:[#allocation2 + $0x9b4] sm:$0xf0] }
 0x294   :  { %v6312_v50 = vld [vmem:[#allocation2 + $0xb98] sm:$0xf]  ;;  %v6057_v62 = vor.u32 %v7493_v60, %v6056_v48  ;;  %3986 = vmatpush.bf16.msrb.mxu3 %v6857_v54 }
 0x295   :  { %v7557_v55 = vld [vmem:[#allocation2 + $0xbb4] sm:$0xf0] }
 0x296   :  { %v6568_v57 = vld [vmem:[#allocation2 + $0xd98] sm:$0xf]  ;;  %v6313_v0 = vor.u32 %v7557_v55, %v6312_v50  ;;  %3948 = vmatpush.bf16.msrb.mxu0 %v6057_v62 }
 0x297   :  { %v7621_v58 = vld [vmem:[#allocation2 + $0xdb4] sm:$0xf0] }
 0x298   :  { %v6824_v59 = vld [vmem:[#allocation2 + $0xf98] sm:$0xf]  ;;  %v6569_v1 = vor.u32 %v7621_v58, %v6568_v57  ;;  %3961 = vmatpush.bf16.msrb.mxu1 %v6313_v0  ;;  %v3722_v57 = vpop.f32.mrf.mxu2 }
 0x299   :  { %v7685_v61 = vld [vmem:[#allocation2 + $0xfb4] sm:$0xf0]  ;;  %v3723_v0 = vadd.f32 %v3722_v57, %v3710_v46  ;;  %v5578_v46 = vld [vmem:[#allocation2 + $0x5f8] sm:$0xf0] }
 0x29a   :  { %v6024_v2 = vld [vmem:[#allocation2 + $0x958] sm:$0xf]  ;;  %v6825_v8 = vor.u32 %v7685_v61, %v6824_v59  ;;  %3974 = vmatpush.bf16.msrb.mxu2 %v6569_v1  ;;  %v3735_v1 = vpop.f32.mrf.mxu3 }
 0x29b   :  { %v7485_v5 = vld [vmem:[#allocation2 + $0x974] sm:$0xf0] }
 0x29c   :  { %v6280_v7 = vld [vmem:[#allocation2 + $0xb58] sm:$0xf]  ;;  %v6025_v14 = vor.u32 %v7485_v5, %v6024_v2  ;;  %3987 = vmatpush.bf16.msrb.mxu3 %v6825_v8  ;;  %v8194_v8 = vadd.f32 %v3735_v1, %v3723_v0  ;;  %v5290_v1 = vld [vmem:[#allocation2 + $0x3b8] sm:$0xf0] }
 0x29d   :  { %v7549_v9 = vld [vmem:[#allocation2 + $0xb74] sm:$0xf0] }
 0x29e   :  { %v6536_v10 = vld [vmem:[#allocation2 + $0xd58] sm:$0xf]  ;;  %v6281_v17 = vor.u32 %v7549_v9, %v6280_v7  ;;  %3949 = vmatpush.bf16.msrb.mxu0 %v6025_v14  ;;  %v3698_v9 = vpop.f32.mrf.mxu0 }
 0x29f   :  { %v7613_v11 = vld [vmem:[#allocation2 + $0xd74] sm:$0xf0]  ;;  %v5802_v9 = vld [vmem:[#allocation2 + $0x7b8] sm:$0xf0] }
 0x2a0   :  { %v6792_v12 = vld [vmem:[#allocation2 + $0xf58] sm:$0xf]  ;;  %v6537_v18 = vor.u32 %v7613_v11, %v6536_v10  ;;  %3962 = vmatpush.bf16.msrb.mxu1 %v6281_v17 }
 0x2a1   :  { %v7677_v13 = vld [vmem:[#allocation2 + $0xf74] sm:$0xf0] }
 0x2a2   :  { %v5992_v16 = vld [vmem:[#allocation2 + $0x918] sm:$0xf]  ;;  %v6793_v22 = vor.u32 %v7677_v13, %v6792_v12  ;;  %3975 = vmatpush.bf16.msrb.mxu2 %v6537_v18  ;;  %v3737_v51 = vpop.f32.mrf.mxu3 }
 0x2a3   :  { %v7477_v19 = vld [vmem:[#allocation2 + $0x934] sm:$0xf0] }
 0x2a4   :  { %v6248_v23 = vld [vmem:[#allocation2 + $0xb18] sm:$0xf]  ;;  %v5993_v31 = vor.u32 %v7477_v19, %v5992_v16  ;;  %3988 = vmatpush.bf16.msrb.mxu3 %v6793_v22  ;;  %v3711_v16 = vpop.f32.mrf.mxu1 }
 0x2a5   :  { %v7541_v26 = vld [vmem:[#allocation2 + $0xb34] sm:$0xf0]  ;;  %v7289_v16 = vld [vmem:[#allocation2 + $0x35c] sm:$0xf] }
 0x2a6   :  { %v6504_v27 = vld [vmem:[#allocation2 + $0xd18] sm:$0xf]  ;;  %v6249_v32 = vor.u32 %v7541_v26, %v6248_v23  ;;  %3950 = vmatpush.bf16.msrb.mxu0 %v5993_v31  ;;  %v3748_v51 = vpop.f32.mrf.mxu0 }
 0x2a7   :  { %v7605_v28 = vld [vmem:[#allocation2 + $0xd34] sm:$0xf0] }
 0x2a8   :  { %v6760_v29 = vld [vmem:[#allocation2 + $0xf18] sm:$0xf]  ;;  %v6505_v33 = vor.u32 %v7605_v28, %v6504_v27  ;;  %3963 = vmatpush.bf16.msrb.mxu1 %v6249_v32 }
 0x2a9   :  { %v7669_v30 = vld [vmem:[#allocation2 + $0xf34] sm:$0xf0] }
 0x2aa   :  { %v5960_v34 = vld [vmem:[#allocation2 + $0x8d8] sm:$0xf]  ;;  %v6761_v39 = vor.u32 %v7669_v30, %v6760_v29  ;;  %3976 = vmatpush.bf16.msrb.mxu2 %v6505_v33  ;;  %v3724_v33 = vpop.f32.mrf.mxu2 }
 0x2ab   :  { %v7469_v35 = vld [vmem:[#allocation2 + $0x8f4] sm:$0xf0]  ;;  %v7345_v33 = vld [vmem:[#allocation2 + $0x51c] sm:$0xf] }
 0x2ac   :  { %v6216_v36 = vld [vmem:[#allocation2 + $0xad8] sm:$0xf]  ;;  %v5961_v47 = vor.u32 %v7469_v35, %v5960_v34  ;;  %3989 = vmatpush.bf16.msrb.mxu3 %v6761_v39  ;;  %v7241_v39 = vld [vmem:[#allocation2 + $0x1dc] sm:$0xf] }
 0x2ad   :  { %v7533_v40 = vld [vmem:[#allocation2 + $0xaf4] sm:$0xf0] }
 0x2ae   :  { %v6472_v15 = vld [vmem:[#allocation2 + $0xcd8] sm:$0xf]  ;;  %v6217_v48 = vor.u32 %v7533_v40, %v6216_v36  ;;  %3951 = vmatpush.bf16.msrb.mxu0 %v5961_v47  ;;  %v5066_v40 = vld [vmem:[#allocation2 + $0x1f8] sm:$0xf0] }
 0x2af   :  { %v7597_v53 = vld [vmem:[#allocation2 + $0xcf4] sm:$0xf0] }
 0x2b0   :  { %v6728_v43 = vld [vmem:[#allocation2 + $0xed8] sm:$0xf]  ;;  %v6473_v60 = vor.u32 %v7597_v53, %v6472_v15  ;;  %3964 = vmatpush.bf16.msrb.mxu1 %v6217_v48  ;;  %v7305_v15 = vld [vmem:[#allocation2 + $0x3dc] sm:$0xf] }
 0x2b1   :  { %v7661_v45 = vld [vmem:[#allocation2 + $0xef4] sm:$0xf0] }
 0x2b2   :  { %v5928_v50 = vld [vmem:[#allocation2 + $0x898] sm:$0xf]  ;;  %v6729_v58 = vor.u32 %v7661_v45, %v6728_v43  ;;  %3977 = vmatpush.bf16.msrb.mxu2 %v6473_v60  ;;  %v5322_v43 = vld [vmem:[#allocation2 + $0x3f8] sm:$0xf0] }
 0x2b3   :  { %v7461_v54 = vld [vmem:[#allocation2 + $0x8b4] sm:$0xf0]  ;;  %v7369_v45 = vld [vmem:[#allocation2 + $0x5dc] sm:$0xf]  ;;  %v5325_v57 = vor.u32 %v7305_v15, %v5322_v43  ;;  %v3749_v15 = vadd.f32 %v3748_v51, %v8194_v8 }
 0x2b4   :  { %v6184_v55 = vld [vmem:[#allocation2 + $0xa98] sm:$0xf]  ;;  %v5929_v7 = vor.u32 %v7461_v54, %v5928_v50  ;;  %3990 = vmatpush.bf16.msrb.mxu3 %v6729_v58  ;;  %v7433_v60 = vld [vmem:[#allocation2 + $0x7dc] sm:$0xf]  ;;  %v5581_v58 = vor.u32 %v7369_v45, %v5578_v46 }
 0x2b5   :  { %v7525_v59 = vld [vmem:[#allocation2 + $0xab4] sm:$0xf0]  ;;  %v5834_v50 = vld [vmem:[#allocation2 + $0x7f8] sm:$0xf0] }
 0x2b6   :  { %v6440_v61 = vld [vmem:[#allocation2 + $0xc98] sm:$0xf]  ;;  %v6185_v10 = vor.u32 %v7525_v59, %v6184_v55  ;;  %3952 = vmatpush.bf16.msrb.mxu0 %v5929_v7  ;;  %v5069_v55 = vor.u32 %v7241_v39, %v5066_v40  ;;  %v7233_v59 = vld [vmem:[#allocation2 + $0x19c] sm:$0xf]  ;;  %v5837_v0 = vor.u32 %v7433_v60, %v5834_v50 }
 0x2b7   :  { %v7589_v62 = vld [vmem:[#allocation2 + $0xcb4] sm:$0xf0]  ;;  %v7425_v7 = vld [vmem:[#allocation2 + $0x79c] sm:$0xf] }
 0x2b8   :  { %v6696_v2 = vld [vmem:[#allocation2 + $0xe98] sm:$0xf]  ;;  %v6441_v11 = vor.u32 %v7589_v62, %v6440_v61  ;;  %3965 = vmatpush.bf16.msrb.mxu1 %v6185_v10  ;;  %v5034_v61 = vld [vmem:[#allocation2 + $0x1b8] sm:$0xf0] }
 0x2b9   :  { %v7653_v5 = vld [vmem:[#allocation2 + $0xeb4] sm:$0xf0]  ;;  %v7297_v62 = vld [vmem:[#allocation2 + $0x39c] sm:$0xf]  ;;  %v5037_v10 = vor.u32 %v7233_v59, %v5034_v61 }
 0x2ba   :  { %v5896_v12 = vld [vmem:[#allocation2 + $0x858] sm:$0xf]  ;;  %v6697_v17 = vor.u32 %v7653_v5, %v6696_v2  ;;  %3978 = vmatpush.bf16.msrb.mxu2 %v6441_v11  ;;  %v7361_v2 = vld [vmem:[#allocation2 + $0x59c] sm:$0xf]  ;;  %v5293_v11 = vor.u32 %v7297_v62, %v5290_v1  ;;  %v3774_v62 = vpop.f32.mrf.mxu2 }
 0x2bb   :  { %v7453_v13 = vld [vmem:[#allocation2 + $0x874] sm:$0xf0]  ;;  %v5546_v5 = vld [vmem:[#allocation2 + $0x5b8] sm:$0xf0] }
 0x2bc   :  { %v6152_v14 = vld [vmem:[#allocation2 + $0xa58] sm:$0xf]  ;;  %v5897_v26 = vor.u32 %v7453_v13, %v5896_v12  ;;  %3991 = vmatpush.bf16.msrb.mxu3 %v6697_v17  ;;  %v5549_v12 = vor.u32 %v7361_v2, %v5546_v5  ;;  %v7225_v13 = vld [vmem:[#allocation2 + $0x15c] sm:$0xf]  ;;  %v5805_v17 = vor.u32 %v7425_v7, %v5802_v9  ;;  %v3787_v7 = vpop.f32.mrf.mxu3 }
 0x2bd   :  { %v7517_v18 = vld [vmem:[#allocation2 + $0xa74] sm:$0xf0]  ;;  %v7209_v43 = vld [vmem:[#allocation2 + $0xdc] sm:$0xf] }
 0x2be   :  { %v6408_v19 = vld [vmem:[#allocation2 + $0xc58] sm:$0xf]  ;;  %v6153_v29 = vor.u32 %v7517_v18, %v6152_v14  ;;  %3953 = vmatpush.bf16.msrb.mxu0 %v5897_v26  ;;  %v5002_v14 = vld [vmem:[#allocation2 + $0x178] sm:$0xf0] }
 0x2bf   :  { %v7581_v23 = vld [vmem:[#allocation2 + $0xc74] sm:$0xf0]  ;;  %v5258_v18 = vld [vmem:[#allocation2 + $0x378] sm:$0xf0]  ;;  %v5005_v26 = vor.u32 %v7225_v13, %v5002_v14  ;;  %v4111_v14 = vmul.f32 0.01, %v8141_v52 }
 0x2c0   :  { %v6664_v25 = vld [vmem:[#allocation2 + $0xe58] sm:$0xf]  ;;  %v6409_v30 = vor.u32 %v7581_v23, %v6408_v19  ;;  %3966 = vmatpush.bf16.msrb.mxu1 %v6153_v29  ;;  %v7353_v19 = vld [vmem:[#allocation2 + $0x55c] sm:$0xf] }
 0x2c1   :  { %v7645_v22 = vld [vmem:[#allocation2 + $0xe74] sm:$0xf0]  ;;  %v5514_v23 = vld [vmem:[#allocation2 + $0x578] sm:$0xf0] }
 0x2c2   :  { %v5864_v27 = vld [vmem:[#allocation2 + $0x818] sm:$0xf]  ;;  %v6665_v34 = vor.u32 %v7645_v22, %v6664_v25  ;;  %3979 = vmatpush.bf16.msrb.mxu2 %v6409_v30  ;;  %v7417_v25 = vld [vmem:[#allocation2 + $0x75c] sm:$0xf] }
 0x2c3   :  { %v7445_v28 = vld [vmem:[#allocation2 + $0x834] sm:$0xf0]  ;;  %v5770_v22 = vld [vmem:[#allocation2 + $0x778] sm:$0xf0] }
 0x2c4   :  { %v6120_v31 = vld [vmem:[#allocation2 + $0xa18] sm:$0xf]  ;;  %v5865_v53 = vor.u32 %v7445_v28, %v5864_v27  ;;  %3992 = vmatpush.bf16.msrb.mxu3 %v6665_v34  ;;  %v5261_v27 = vor.u32 %v7289_v16, %v5258_v18  ;;  %v5517_v28 = vor.u32 %v7353_v19, %v5514_v23  ;;  %v7217_v29 = vld [vmem:[#allocation2 + $0x11c] sm:$0xf]  ;;  %v3750_v23 = vpop.f32.mrf.mxu0 }
 0x2c5   :  { %v7509_v3 = vld [vmem:[#allocation2 + $0xa34] sm:$0xf0]  ;;  %v4970_v30 = vld [vmem:[#allocation2 + $0x138] sm:$0xf0] }
 0x2c6   :  { %v6376_v32 = vld [vmem:[#allocation2 + $0xc18] sm:$0xf]  ;;  %v6121_v47 = vor.u32 %v7509_v3, %v6120_v31  ;;  %3954 = vmatpush.bf16.msrb.mxu0 %v5865_v53  ;;  %v7281_v31 = vld [vmem:[#allocation2 + $0x31c] sm:$0xf]  ;;  %v5773_v3 = vor.u32 %v7417_v25, %v5770_v22  ;;  %v3761_v53 = vpop.f32.mrf.mxu1 }
 0x2c7   :  { %v7573_v35 = vld [vmem:[#allocation2 + $0xc34] sm:$0xf0]  ;;  %v5482_v34 = vld [vmem:[#allocation2 + $0x538] sm:$0xf0] }
 0x2c8   :  { %v6632_v36 = vld [vmem:[#allocation2 + $0xe18] sm:$0xf]  ;;  %v6377_v48 = vor.u32 %v7573_v35, %v6376_v32  ;;  %3967 = vmatpush.bf16.msrb.mxu1 %v6121_v47  ;;  %v5226_v32 = vld [vmem:[#allocation2 + $0x338] sm:$0xf0]  ;;  %v5485_v40 = vor.u32 %v7345_v33, %v5482_v34  ;;  %v4119_v34 = vsel %vm4103_vm0, %v8141_v52, %v4111_v14 }
 0x2c9   :  { %v7637_v37 = vld [vmem:[#allocation2 + $0xe34] sm:$0xf0]  ;;  %3955 = vmatmul.bf16.vlgmr.msrb.gmra.mxu0 %v8109_v41  ;;  %v7409_v35 = vld [vmem:[#allocation2 + $0x71c] sm:$0xf]  ;;  %v5229_v39 = vor.u32 %v7281_v31, %v5226_v32 }
 0x2ca   :  { %v6633_v54 = vor.u32 %v7637_v37, %v6632_v36  ;;  %3980 = vmatpush.bf16.msrb.mxu2 %v6377_v48  ;;  %3999 = vmatpush.bf16.msra.mxu0 %v5069_v55  ;;  %v5738_v36 = vld [vmem:[#allocation2 + $0x738] sm:$0xf0]  ;;  %v4973_v37 = vor.u32 %v7217_v29, %v4970_v30 }
 0x2cb   :  { %3968 = vmatmul.bf16.vlgmr.msrb.gmra.mxu1 %v8113_v44  ;;  %v4938_v45 = vld [vmem:[#allocation2 + $0xf8] sm:$0xf0]  ;;  %v5741_v47 = vor.u32 %v7409_v35, %v5738_v36 }
 0x2cc   :  { %3993 = vmatpush.bf16.msrb.mxu3 %v6633_v54  ;;  %4012 = vmatpush.bf16.msra.mxu1 %v5325_v57  ;;  %v7273_v46 = vld [vmem:[#allocation2 + $0x2dc] sm:$0xf]  ;;  %v3762_v54 = vadd.f32 %v3761_v53, %v3749_v15 }
 0x2cd   :  { %3981 = vmatmul.bf16.vlgmr.msrb.gmra.mxu2 %v8107_v38  ;;  %v5194_v48 = vld [vmem:[#allocation2 + $0x2f8] sm:$0xf0] }
 0x2ce   :  { %4025 = vmatpush.bf16.msra.mxu2 %v5581_v58  ;;  %4000 = vmatpush.bf16.msra.mxu0 %v5037_v10  ;;  %v7337_v60 = vld [vmem:[#allocation2 + $0x4dc] sm:$0xf]  ;;  %v4941_v58 = vor.u32 %v7209_v43, %v4938_v45  ;;  %v5197_v59 = vor.u32 %v7273_v46, %v5194_v48  ;;  %v3775_v5 = vadd.f32 %v3774_v62, %v3762_v54  ;;  %v3763_v29 = vpop.f32.mrf.mxu1  ;;  %v3776_v46 = vpop.f32.mrf.mxu2 }
 0x2cf   :  { %3994 = vmatmul.bf16.vlgmr.msrb.gmra.mxu3 %v8111_v42  ;;  %v5450_v50 = vld [vmem:[#allocation2 + $0x4f8] sm:$0xf0] }
 0x2d0   :  { %4038 = vmatpush.bf16.msra.mxu3 %v5837_v0  ;;  %4013 = vmatpush.bf16.msra.mxu1 %v5293_v11  ;;  %v7401_v55 = vld [vmem:[#allocation2 + $0x6dc] sm:$0xf]  ;;  %v5453_v61 = vor.u32 %v7337_v60, %v5450_v50  ;;  %v3788_v16 = vadd.f32 %v3787_v7, %v3775_v5  ;;  %v3789_v50 = vpop.f32.mrf.mxu3 }
 0x2d1   :  { %v5706_v57 = vld [vmem:[#allocation2 + $0x6f8] sm:$0xf0] }
 0x2d2   :  { %4026 = vmatpush.bf16.msra.mxu2 %v5549_v12  ;;  %4001 = vmatpush.bf16.msra.mxu0 %v5005_v26  ;;  %v7201_v8 = vld [vmem:[#allocation2 + $0x9c] sm:$0xf]  ;;  %v5709_v2 = vor.u32 %v7401_v55, %v5706_v57  ;;  %vm4107_vm1 = vcmp.ge.f32.partialorder %v3788_v16, 0.0  ;;  %v4115_v30 = vmul.f32 0.01, %v3788_v16 }
 0x2d3   :  { %v4906_v0 = vld [vmem:[#allocation2 + $0xb8] sm:$0xf0] }
 0x2d4   :  { %4039 = vmatpush.bf16.msra.mxu3 %v5805_v17  ;;  %4014 = vmatpush.bf16.msra.mxu1 %v5261_v27  ;;  %v7265_v1 = vld [vmem:[#allocation2 + $0x29c] sm:$0xf]  ;;  %v4909_v17 = vor.u32 %v7201_v8, %v4906_v0  ;;  %v4123_v35 = vsel %vm4107_vm1, %v3788_v16, %v4115_v30 }
 0x2d5   :  { %v5162_v9 = vld [vmem:[#allocation2 + $0x2b8] sm:$0xf0] }
 0x2d6   :  { %4027 = vmatpush.bf16.msra.mxu2 %v5517_v28  ;;  %4002 = vmatpush.bf16.msra.mxu0 %v4973_v37  ;;  %v7329_v10 = vld [vmem:[#allocation2 + $0x49c] sm:$0xf]  ;;  %v5165_v25 = vor.u32 %v7265_v1, %v5162_v9 }
 0x2d7   :  { %v5418_v11 = vld [vmem:[#allocation2 + $0x4b8] sm:$0xf0] }
 0x2d8   :  { %4040 = vmatpush.bf16.msra.mxu3 %v5773_v3  ;;  %4015 = vmatpush.bf16.msra.mxu1 %v5229_v39  ;;  %v7393_v12 = vld [vmem:[#allocation2 + $0x69c] sm:$0xf]  ;;  %v5421_v22 = vor.u32 %v7329_v10, %v5418_v11  ;;  %v8206_v39 = vmax.f32 %v4119_v34, %v4123_v35 }
 0x2d9   :  { %v5674_v13 = vld [vmem:[#allocation2 + $0x6b8] sm:$0xf0] }
 0x2da   :  { %4028 = vmatpush.bf16.msra.mxu2 %v5485_v40  ;;  %4003 = vmatpush.bf16.msra.mxu0 %v4941_v58  ;;  %v7193_v18 = vld [vmem:[#allocation2 + $0x5c] sm:$0xf]  ;;  %v5677_v31 = vor.u32 %v7393_v12, %v5674_v13 }
 0x2db   :  { %v4874_v19 = vld [vmem:[#allocation2 + $0x78] sm:$0xf0] }
 0x2dc   :  { %4041 = vmatpush.bf16.msra.mxu3 %v5741_v47  ;;  %4016 = vmatpush.bf16.msra.mxu1 %v5197_v59  ;;  %v7257_v26 = vld [vmem:[#allocation2 + $0x25c] sm:$0xf]  ;;  %v4877_v36 = vor.u32 %v7193_v18, %v4874_v19 }
 0x2dd   :  { %v5130_v27 = vld [vmem:[#allocation2 + $0x278] sm:$0xf0] }
 0x2de   :  { %4029 = vmatpush.bf16.msra.mxu2 %v5453_v61  ;;  %v7321_v28 = vld [vmem:[#allocation2 + $0x45c] sm:$0xf]  ;;  %4004 = vmatpush.bf16.msra.mxu0 %v4909_v17  ;;  %v5133_v40 = vor.u32 %v7257_v26, %v5130_v27 }
 0x2df   :  { %v5386_v3 = vld [vmem:[#allocation2 + $0x478] sm:$0xf0] }
 0x2e0   :  { %4042 = vmatpush.bf16.msra.mxu3 %v5709_v2  ;;  %v7385_v32 = vld [vmem:[#allocation2 + $0x65c] sm:$0xf]  ;;  %4017 = vmatpush.bf16.msra.mxu1 %v5165_v25  ;;  %v5389_v15 = vor.u32 %v7321_v28, %v5386_v3 }
 0x2e1   :  { %v5642_v33 = vld [vmem:[#allocation2 + $0x678] sm:$0xf0] }
 0x2e2   :  { %v7185_v37 = vld [vmem:[#allocation2 + $0x1c] sm:$0xf]  ;;  %4030 = vmatpush.bf16.msra.mxu2 %v5421_v22  ;;  %v5645_v47 = vor.u32 %v7385_v32, %v5642_v33  ;;  %4005 = vmatpush.bf16.msra.mxu0 %v4877_v36 }
 0x2e3   :  { %v4842_v51 = vld [vmem:[#allocation2 + $0x38] sm:$0xf0] }
 0x2e4   :  { %v7249_v53 = vld [vmem:[#allocation2 + $0x21c] sm:$0xf]  ;;  %4043 = vmatpush.bf16.msra.mxu3 %v5677_v31  ;;  %v4845_v58 = vor.u32 %v7185_v37, %v4842_v51  ;;  %4018 = vmatpush.bf16.msra.mxu1 %v5133_v40 }
 0x2e5   :  { %v5098_v43 = vld [vmem:[#allocation2 + $0x238] sm:$0xf0] }
 0x2e6   :  { %v7313_v45 = vld [vmem:[#allocation2 + $0x41c] sm:$0xf]  ;;  %4031 = vmatpush.bf16.msra.mxu2 %v5389_v15  ;;  %v5101_v8 = vor.u32 %v7249_v53, %v5098_v43  ;;  %4006 = vmatpush.bf16.msra.mxu0 %v4845_v58 }
 0x2e7   :  { %v5354_v48 = vld [vmem:[#allocation2 + $0x438] sm:$0xf0] }
 0x2e8   :  { %v7377_v60 = vld [vmem:[#allocation2 + $0x61c] sm:$0xf]  ;;  %v5357_v0 = vor.u32 %v7313_v45, %v5354_v48  ;;  %4044 = vmatpush.bf16.msra.mxu3 %v5645_v47  ;;  %4019 = vmatpush.bf16.msra.mxu1 %v5101_v8  ;;  %v8212_v47 = vpop.f32.mrf.mxu0 }
 0x2e9   :  { %v5610_v52 = vld [vmem:[#allocation2 + $0x638] sm:$0xf0]  ;;  %4007 = vmatmul.bf16.vlgmr.msra.gmra.mxu0 %v8094_v20 }
 0x2ea   :  { %v7497_v54 = vld [vmem:[#allocation2 + $0x9dc] sm:$0xf]  ;;  %v5613_v5 = vor.u32 %v7377_v60, %v5610_v52  ;;  %4032 = vmatpush.bf16.msra.mxu2 %v5357_v0 }
 0x2eb   :  { %v6090_v55 = vld [vmem:[#allocation2 + $0x9f8] sm:$0xf0]  ;;  %4020 = vmatmul.bf16.vlgmr.msra.gmra.mxu1 %v8097_v21 }
 0x2ec   :  { %v7561_v57 = vld [vmem:[#allocation2 + $0xbdc] sm:$0xf]  ;;  %v6093_v7 = vor.u32 %v7497_v54, %v6090_v55  ;;  %4045 = vmatpush.bf16.msra.mxu3 %v5613_v5  ;;  %v8214_v54 = vpop.f32.mrf.mxu1 }
 0x2ed   :  { %v6346_v59 = vld [vmem:[#allocation2 + $0xbf8] sm:$0xf0]  ;;  %4033 = vmatmul.bf16.vlgmr.msra.gmra.mxu2 %v8086_v4 }
 0x2ee   :  { %v7625_v61 = vld [vmem:[#allocation2 + $0xddc] sm:$0xf]  ;;  %v6349_v9 = vor.u32 %v7561_v57, %v6346_v59  ;;  %4051 = vmatpush.bf16.msrb.mxu0 %v6093_v7 }
 0x2ef   :  { %v6602_v62 = vld [vmem:[#allocation2 + $0xdf8] sm:$0xf0]  ;;  %4046 = vmatmul.bf16.vlgmr.msra.gmra.mxu3 %v8091_v6 }
 0x2f0   :  { %v7689_v1 = vld [vmem:[#allocation2 + $0xfdc] sm:$0xf]  ;;  %v6605_v10 = vor.u32 %v7625_v61, %v6602_v62  ;;  %4064 = vmatpush.bf16.msrb.mxu1 %v6349_v9  ;;  %v8216_v9 = vpop.f32.mrf.mxu2 }
 0x2f1   :  { %v6858_v2 = vld [vmem:[#allocation2 + $0xff8] sm:$0xf0] }
 0x2f2   :  { %v7489_v11 = vld [vmem:[#allocation2 + $0x99c] sm:$0xf]  ;;  %v6861_v14 = vor.u32 %v7689_v1, %v6858_v2  ;;  %4077 = vmatpush.bf16.msrb.mxu2 %v6605_v10 }
 0x2f3   :  { %v6058_v12 = vld [vmem:[#allocation2 + $0x9b8] sm:$0xf0] }
 0x2f4   :  { %v7553_v13 = vld [vmem:[#allocation2 + $0xb9c] sm:$0xf]  ;;  %v6061_v25 = vor.u32 %v7489_v11, %v6058_v12  ;;  %4090 = vmatpush.bf16.msrb.mxu3 %v6861_v14  ;;  %v8218_v14 = vpop.f32.mrf.mxu3 }
 0x2f5   :  { %v6314_v16 = vld [vmem:[#allocation2 + $0xbb8] sm:$0xf0] }
 0x2f6   :  { %v7617_v17 = vld [vmem:[#allocation2 + $0xd9c] sm:$0xf]  ;;  %v6317_v22 = vor.u32 %v7553_v13, %v6314_v16  ;;  %4052 = vmatpush.bf16.msrb.mxu0 %v6061_v25 }
 0x2f7   :  { %v6570_v18 = vld [vmem:[#allocation2 + $0xdb8] sm:$0xf0] }
 0x2f8   :  { %v7681_v19 = vld [vmem:[#allocation2 + $0xf9c] sm:$0xf]  ;;  %v6573_v26 = vor.u32 %v7617_v17, %v6570_v18  ;;  %4065 = vmatpush.bf16.msrb.mxu1 %v6317_v22 }
 0x2f9   :  { %v6826_v23 = vld [vmem:[#allocation2 + $0xfb8] sm:$0xf0] }
 0x2fa   :  { %v7481_v27 = vld [vmem:[#allocation2 + $0x95c] sm:$0xf]  ;;  %v6829_v30 = vor.u32 %v7681_v19, %v6826_v23  ;;  %4078 = vmatpush.bf16.msrb.mxu2 %v6573_v26  ;;  %v3802_v19 = vpop.f32.mrf.mxu0 }
 0x2fb   :  { %v6026_v28 = vld [vmem:[#allocation2 + $0x978] sm:$0xf0]  ;;  %v7703_v19 = vld [vmem:[#allocation6 + $0x44] sm:$0xf0] }
 0x2fc   :  { %v7545_v29 = vld [vmem:[#allocation2 + $0xb5c] sm:$0xf]  ;;  %v6029_v35 = vor.u32 %v7481_v27, %v6026_v28  ;;  %4091 = vmatpush.bf16.msrb.mxu3 %v6829_v30  ;;  %v3815_v28 = vpop.f32.mrf.mxu1 }
 0x2fd   :  { %v6282_v31 = vld [vmem:[#allocation2 + $0xb78] sm:$0xf0]  ;;  %v7701_v28 = vld [vmem:[#allocation6 + $0x34] sm:$0xf0] }
 0x2fe   :  { %v7609_v3 = vld [vmem:[#allocation2 + $0xd5c] sm:$0xf]  ;;  %v6285_v36 = vor.u32 %v7545_v29, %v6282_v31  ;;  %4053 = vmatpush.bf16.msrb.mxu0 %v6029_v35 }
 0x2ff   :  { %v6538_v32 = vld [vmem:[#allocation2 + $0xd78] sm:$0xf0] }
 0x300   :  { %v7673_v33 = vld [vmem:[#allocation2 + $0xf5c] sm:$0xf]  ;;  %v6541_v37 = vor.u32 %v7609_v3, %v6538_v32  ;;  %4066 = vmatpush.bf16.msrb.mxu1 %v6285_v36 }
 0x301   :  { %v6794_v34 = vld [vmem:[#allocation2 + $0xf78] sm:$0xf0] }
 0x302   :  { %v7473_v51 = vld [vmem:[#allocation2 + $0x91c] sm:$0xf]  ;;  %v6797_v15 = vor.u32 %v7673_v33, %v6794_v34  ;;  %4079 = vmatpush.bf16.msrb.mxu2 %v6541_v37  ;;  %v672_v34 = vperm.slane %v8191_v24, 5 }
 0x303   :  { %v5994_v40 = vld [vmem:[#allocation2 + $0x938] sm:$0xf0] }
 0x304   :  { %v7537_v4 = vld [vmem:[#allocation2 + $0xb1c] sm:$0xf]  ;;  %v5997_v6 = vor.u32 %v7473_v51, %v5994_v40  ;;  %4092 = vmatpush.bf16.msrb.mxu3 %v6797_v15 }
 0x305   :  { %v6250_v53 = vld [vmem:[#allocation2 + $0xb38] sm:$0xf0] }
 0x306   :  { %v7601_v43 = vld [vmem:[#allocation2 + $0xd1c] sm:$0xf]  ;;  %v6253_v21 = vor.u32 %v7537_v4, %v6250_v53  ;;  %4054 = vmatpush.bf16.msrb.mxu0 %v5997_v6  ;;  %v3828_v53 = vpop.f32.mrf.mxu2  ;;  %v3841_v6 = vpop.f32.mrf.mxu3 }
 0x307   :  { %v6506_v45 = vld [vmem:[#allocation2 + $0xd38] sm:$0xf0]  ;;  %v7715_v53 = vld [vmem:[#allocation6 + $0xa4] sm:$0xf0] }
 0x308   :  { %v7665_v46 = vld [vmem:[#allocation2 + $0xf1c] sm:$0xf]  ;;  %v6509_v48 = vor.u32 %v7601_v43, %v6506_v45  ;;  %4067 = vmatpush.bf16.msrb.mxu1 %v6253_v21  ;;  %v3801_v21 = vadd.f32 %v8212_v47, %v672_v34  ;;  %v6976_v47 = vld [vmem:[#allocation6 + $0xe0] sm:$0xf] }
 0x309   :  { %v6762_v20 = vld [vmem:[#allocation2 + $0xf38] sm:$0xf0] }
 0x30a   :  { %v7465_v60 = vld [vmem:[#allocation2 + $0x8dc] sm:$0xf]  ;;  %v6765_v55 = vor.u32 %v7665_v46, %v6762_v20  ;;  %4080 = vmatpush.bf16.msrb.mxu2 %v6509_v48  ;;  %v6920_v48 = vld [vmem:[#allocation6 + $0x70] sm:$0xf] }
 0x30b   :  { %v5962_v52 = vld [vmem:[#allocation2 + $0x8f8] sm:$0xf0] }
 0x30c   :  { %v7529_v50 = vld [vmem:[#allocation2 + $0xadc] sm:$0xf]  ;;  %v5965_v8 = vor.u32 %v7465_v60, %v5962_v52  ;;  %4093 = vmatpush.bf16.msrb.mxu3 %v6765_v55  ;;  %v7709_v60 = vld [vmem:[#allocation6 + $0x74] sm:$0xf0] }
 0x30d   :  { %v6218_v57 = vld [vmem:[#allocation2 + $0xaf8] sm:$0xf0]  ;;  %v7725_v55 = vld [vmem:[#allocation6 + $0xf4] sm:$0xf0] }
 0x30e   :  { %v7593_v58 = vld [vmem:[#allocation2 + $0xcdc] sm:$0xf]  ;;  %v6221_v0 = vor.u32 %v7529_v50, %v6218_v57  ;;  %4055 = vmatpush.bf16.msrb.mxu0 %v5965_v8  ;;  %v6984_v50 = vld [vmem:[#allocation6 + $0xf0] sm:$0xf] }
 0x30f   :  { %v6474_v59 = vld [vmem:[#allocation2 + $0xcf8] sm:$0xf0]  ;;  %v6985_v8 = vor.u32 %v7725_v55, %v6984_v50  ;;  %v6936_v50 = vld [vmem:[#allocation6 + $0x90] sm:$0xf]  ;;  %v7713_v55 = vld [vmem:[#allocation6 + $0x94] sm:$0xf0] }
 0x310   :  { %v7657_v61 = vld [vmem:[#allocation2 + $0xedc] sm:$0xf]  ;;  %v6477_v1 = vor.u32 %v7593_v58, %v6474_v59  ;;  %4068 = vmatpush.bf16.msrb.mxu1 %v6221_v0  ;;  %v6912_v0 = vld [vmem:[#allocation6 + $0x60] sm:$0xf] }
 0x311   :  { %v6730_v62 = vld [vmem:[#allocation2 + $0xef8] sm:$0xf0] }
 0x312   :  { %v7457_v2 = vld [vmem:[#allocation2 + $0x89c] sm:$0xf]  ;;  %v6733_v10 = vor.u32 %v7657_v61, %v6730_v62  ;;  %4081 = vmatpush.bf16.msrb.mxu2 %v6477_v1  ;;  %v6921_v61 = vor.u32 %v7709_v60, %v6920_v48  ;;  %v3814_v62 = vadd.f32 %v8214_v54, %v3801_v21  ;;  %v7707_v1 = vld [vmem:[#allocation6 + $0x64] sm:$0xf0]  ;;  %v6968_v54 = vld [vmem:[#allocation6 + $0xd0] sm:$0xf] }
 0x313   :  { %v5930_v5 = vld [vmem:[#allocation2 + $0x8b8] sm:$0xf0]  ;;  %v7032_v60 = vld [vmem:[#allocation6 + $0x150] sm:$0xf] }
 0x314   :  { %v7521_v7 = vld [vmem:[#allocation2 + $0xa9c] sm:$0xf]  ;;  %v5933_v18 = vor.u32 %v7457_v2, %v5930_v5  ;;  %4094 = vmatpush.bf16.msrb.mxu3 %v6733_v10  ;;  %v7723_v2 = vld [vmem:[#allocation6 + $0xe4] sm:$0xf0]  ;;  %v6913_v5 = vor.u32 %v7707_v1, %v6912_v0  ;;  %v6937_v0 = vor.u32 %v7713_v55, %v6936_v50  ;;  %v6928_v1 = vld [vmem:[#allocation6 + $0x80] sm:$0xf] }
 0x315   :  { %v6186_v11 = vld [vmem:[#allocation2 + $0xab8] sm:$0xf0]  ;;  %v6977_v10 = vor.u32 %v7723_v2, %v6976_v47  ;;  %v7024_v2 = vld [vmem:[#allocation6 + $0x140] sm:$0xf]  ;;  %v7050_v55 = vld [vmem:[#allocation6 + $0x178] sm:$0xf0] }
 0x316   :  { %v7585_v12 = vld [vmem:[#allocation2 + $0xc9c] sm:$0xf]  ;;  %v6189_v23 = vor.u32 %v7521_v7, %v6186_v11  ;;  %4056 = vmatpush.bf16.msrb.mxu0 %v5933_v18  ;;  %v3827_v7 = vadd.f32 %v8216_v9, %v3814_v62  ;;  %v6904_v11 = vld [vmem:[#allocation6 + $0x50] sm:$0xf]  ;;  %v6896_v9 = vld [vmem:[#allocation6 + $0x40] sm:$0xf] }
 0x317   :  { %v6442_v13 = vld [vmem:[#allocation2 + $0xcb8] sm:$0xf0]  ;;  %v6864_v62 = vld [vmem:[#allocation6] sm:$0xf] }
 0x318   :  { %v7649_v16 = vld [vmem:[#allocation2 + $0xe9c] sm:$0xf]  ;;  %v6445_v25 = vor.u32 %v7585_v12, %v6442_v13  ;;  %4069 = vmatpush.bf16.msrb.mxu1 %v6189_v23  ;;  %v7705_v12 = vld [vmem:[#allocation6 + $0x54] sm:$0xf0]  ;;  %v7719_v23 = vld [vmem:[#allocation6 + $0xc4] sm:$0xf0] }
 0x319   :  { %v6698_v17 = vld [vmem:[#allocation2 + $0xeb8] sm:$0xf0]  ;;  %v7721_v13 = vld [vmem:[#allocation6 + $0xd4] sm:$0xf0] }
 0x31a   :  { %v7449_v22 = vld [vmem:[#allocation2 + $0x85c] sm:$0xf]  ;;  %v6701_v29 = vor.u32 %v7649_v16, %v6698_v17  ;;  %4082 = vmatpush.bf16.msrb.mxu2 %v6445_v25  ;;  %v6905_v16 = vor.u32 %v7705_v12, %v6904_v11  ;;  %v3840_v17 = vadd.f32 %v8218_v14, %v3827_v7  ;;  %v6969_v18 = vor.u32 %v7721_v13, %v6968_v54  ;;  %v7711_v7 = vld [vmem:[#allocation6 + $0x84] sm:$0xf0]  ;;  %v6922_v11 = vld [vmem:[#allocation6 + $0x78] sm:$0xf0] }
 0x31b   :  { %v5898_v26 = vld [vmem:[#allocation2 + $0x878] sm:$0xf0]  ;;  %v6897_v25 = vor.u32 %v7703_v19, %v6896_v9  ;;  %v6929_v19 = vor.u32 %v7711_v7, %v6928_v1  ;;  %v6882_v1 = vld [vmem:[#allocation6 + $0x28] sm:$0xf0] }
 0x31c   :  { %v7513_v27 = vld [vmem:[#allocation2 + $0xa5c] sm:$0xf]  ;;  %v5901_v35 = vor.u32 %v7449_v22, %v5898_v26  ;;  %4095 = vmatpush.bf16.msrb.mxu3 %v6701_v29  ;;  %v3852_v22 = vpop.f32.mrf.mxu0  ;;  %v7741_v29 = vld [vmem:[#allocation6 + $0x174] sm:$0xf0]  ;;  %v6946_v7 = vld [vmem:[#allocation6 + $0xa8] sm:$0xf0] }
 0x31d   :  { %v6154_v30 = vld [vmem:[#allocation2 + $0xa78] sm:$0xf0]  ;;  %v3853_v26 = vadd.f32 %v3852_v22, %v3840_v17  ;;  %v6986_v17 = vld [vmem:[#allocation6 + $0xf8] sm:$0xf0] }
 0x31e   :  { %v7577_v31 = vld [vmem:[#allocation2 + $0xc5c] sm:$0xf]  ;;  %v6157_v37 = vor.u32 %v7513_v27, %v6154_v30  ;;  %4057 = vmatpush.bf16.msrb.mxu0 %v5901_v35  ;;  %v3865_v27 = vpop.f32.mrf.mxu1  ;;  %v6952_v30 = vld [vmem:[#allocation6 + $0xb0] sm:$0xf]  ;;  %v3878_v35 = vpop.f32.mrf.mxu2 }
 0x31f   :  { %v6410_v3 = vld [vmem:[#allocation2 + $0xc78] sm:$0xf0] }
 0x320   :  { %v7641_v32 = vld [vmem:[#allocation2 + $0xe5c] sm:$0xf]  ;;  %v6413_v51 = vor.u32 %v7577_v31, %v6410_v3  ;;  %4070 = vmatpush.bf16.msrb.mxu1 %v6157_v37  ;;  %v7717_v31 = vld [vmem:[#allocation6 + $0xb4] sm:$0xf0]  ;;  %v3866_v3 = vadd.f32 %v3865_v27, %v3853_v26  ;;  %v7040_v37 = vld [vmem:[#allocation6 + $0x160] sm:$0xf] }
 0x321   :  { %v6666_v33 = vld [vmem:[#allocation2 + $0xe78] sm:$0xf0]  ;;  %v6953_v34 = vor.u32 %v7717_v31, %v6952_v30  ;;  %v6914_v26 = vld [vmem:[#allocation6 + $0x68] sm:$0xf0]  ;;  %v7008_v30 = vld [vmem:[#allocation6 + $0x120] sm:$0xf] }
 0x322   :  { %v7441_v36 = vld [vmem:[#allocation2 + $0x81c] sm:$0xf]  ;;  %v6669_v43 = vor.u32 %v7641_v32, %v6666_v33  ;;  %4083 = vmatpush.bf16.msrb.mxu2 %v6413_v51  ;;  %v6880_v33 = vld [vmem:[#allocation6 + $0x20] sm:$0xf]  ;;  %v7739_v51 = vld [vmem:[#allocation6 + $0x164] sm:$0xf0] }
 0x323   :  { %v5866_v40 = vld [vmem:[#allocation2 + $0x838] sm:$0xf0]  ;;  %v7731_v31 = vld [vmem:[#allocation6 + $0x124] sm:$0xf0] }
 0x324   :  { %v7505_v4 = vld [vmem:[#allocation2 + $0xa1c] sm:$0xf]  ;;  %v5869_v52 = vor.u32 %v7441_v36, %v5866_v40  ;;  %4096 = vmatpush.bf16.msrb.mxu3 %v6669_v43  ;;  %v7699_v36 = vld [vmem:[#allocation6 + $0x24] sm:$0xf0]  ;;  %v3879_v40 = vadd.f32 %v3878_v35, %v3866_v3  ;;  %v7041_v43 = vor.u32 %v7739_v51, %v7040_v37  ;;  %v3854_v6 = vpop.f32.mrf.mxu0  ;;  %v7009_v35 = vor.u32 %v7731_v31, %v7008_v30  ;;  %v6970_v51 = vld [vmem:[#allocation6 + $0xd8] sm:$0xf0] }
 0x325   :  { %v6122_v15 = vld [vmem:[#allocation2 + $0xa38] sm:$0xf0]  ;;  %v7727_v6 = vld [vmem:[#allocation6 + $0x104] sm:$0xf0]  ;;  %v7026_v30 = vld [vmem:[#allocation6 + $0x148] sm:$0xf0] }
 0x326   :  { %v7569_v45 = vld [vmem:[#allocation2 + $0xc1c] sm:$0xf]  ;;  %v6125_v57 = vor.u32 %v7505_v4, %v6122_v15  ;;  %4058 = vmatpush.bf16.msrb.mxu0 %v5869_v52  ;;  %v3891_v4 = vpop.f32.mrf.mxu3  ;;  %v6944_v15 = vld [vmem:[#allocation6 + $0xa0] sm:$0xf]  ;;  %v3867_v48 = vpop.f32.mrf.mxu1  ;;  %v7737_v52 = vld [vmem:[#allocation6 + $0x154] sm:$0xf0] }
 0x327   :  { %v6378_v46 = vld [vmem:[#allocation2 + $0xc38] sm:$0xf0]  ;;  %v6945_v21 = vor.u32 %v7715_v53, %v6944_v15  ;;  %v3880_v47 = vpop.f32.mrf.mxu2  ;;  %v7702_v15 = vld [vmem:[#allocation6 + $0x44] sm:$0xf]  ;;  %v6898_v53 = vld [vmem:[#allocation6 + $0x48] sm:$0xf0] }
 0x328   :  { %v7633_v20 = vld [vmem:[#allocation2 + $0xe1c] sm:$0xf]  ;;  %v6381_v58 = vor.u32 %v7569_v45, %v6378_v46  ;;  %4071 = vmatpush.bf16.msrb.mxu1 %v6125_v57  ;;  %v3892_v45 = vadd.f32 %v3891_v4, %v3879_v40  ;;  %v6881_v46 = vor.u32 %v7699_v36, %v6880_v33  ;;  %v7033_v57 = vor.u32 %v7737_v52, %v7032_v60  ;;  %v7729_v36 = vld [vmem:[#allocation6 + $0x114] sm:$0xf0]  ;;  %v6890_v60 = vld [vmem:[#allocation6 + $0x38] sm:$0xf0] }
 0x329   :  { %v6634_v24 = vld [vmem:[#allocation2 + $0xe38] sm:$0xf0]  ;;  %4059 = vmatmul.bf16.vlgmr.msrb.gmra.mxu0 %v8109_v41  ;;  %v6960_v41 = vld [vmem:[#allocation6 + $0xc0] sm:$0xf]  ;;  %v7738_v47 = vld [vmem:[#allocation6 + $0x164] sm:$0xf] }
 0x32a   :  { %v6637_v59 = vor.u32 %v7633_v20, %v6634_v24  ;;  %4084 = vmatpush.bf16.msrb.mxu2 %v6381_v58  ;;  %4525 = vmatpush.bf16.msra.mxu0 %v6921_v61  ;;  %v6872_v20 = vld [vmem:[#allocation6 + $0x10] sm:$0xf]  ;;  %v7697_v24 = vld [vmem:[#allocation6 + $0x14] sm:$0xf0]  ;;  %v4112_v58 = vmul.f32 0.01, %v8155_v49 }
 0x32b   :  { %4072 = vmatmul.bf16.vlgmr.msrb.gmra.mxu1 %v8113_v44  ;;  %v6888_v44 = vld [vmem:[#allocation6 + $0x30] sm:$0xf]  ;;  %vm4108_vm3 = vcmp.ge.f32.partialorder %v3892_v45, 0.0  ;;  %v6873_v61 = vor.u32 %v7697_v24, %v6872_v20  ;;  %v7704_v33 = vld [vmem:[#allocation6 + $0x54] sm:$0xf] }
 0x32c   :  { %4097 = vmatpush.bf16.msrb.mxu3 %v6637_v59  ;;  %4538 = vmatpush.bf16.msra.mxu1 %v6985_v8  ;;  %v6889_v32 = vor.u32 %v7701_v28, %v6888_v44  ;;  %v4116_v59 = vmul.f32 0.01, %v3892_v45  ;;  %v7695_v8 = vld [vmem:[#allocation6 + $0x4] sm:$0xf0]  ;;  %v4120_v9 = vsel %vm4104_vm2, %v8155_v49, %v4112_v58  ;;  %v7722_v28 = vld [vmem:[#allocation6 + $0xe4] sm:$0xf]  ;;  %v3904_v52 = vpop.f32.mrf.mxu0 }
 0x32d   :  { %4085 = vmatmul.bf16.vlgmr.msrb.gmra.mxu2 %v8107_v38  ;;  %v6961_v38 = vor.u32 %v7719_v23, %v6960_v41  ;;  %v7016_v23 = vld [vmem:[#allocation6 + $0x130] sm:$0xf]  ;;  %v7720_v37 = vld [vmem:[#allocation6 + $0xd4] sm:$0xf]  ;;  %v6992_v20 = vld [vmem:[#allocation6 + $0x100] sm:$0xf] }
 0x32e   :  { %4526 = vmatpush.bf16.msra.mxu0 %v6913_v5  ;;  %v7735_v5 = vld [vmem:[#allocation6 + $0x144] sm:$0xf0]  ;;  %v3893_v12 = vpop.f32.mrf.mxu3  ;;  %v4124_v13 = vsel %vm4108_vm3, %v3892_v45, %v4116_v59  ;;  %v6973_v4 = vor.u32 %v7720_v37, %v6970_v51  ;;  %v6962_v45 = vld [vmem:[#allocation6 + $0xc8] sm:$0xf0]  ;;  %v7700_v48 = vld [vmem:[#allocation6 + $0x34] sm:$0xf]  ;;  %v6993_v50 = vor.u32 %v7727_v6, %v6992_v20  ;;  %v3917_v59 = vpop.f32.mrf.mxu1 }
 0x32f   :  { %4098 = vmatmul.bf16.vlgmr.msrb.gmra.mxu3 %v8111_v42  ;;  %v7048_v42 = vld [vmem:[#allocation6 + $0x170] sm:$0xf]  ;;  %v7025_v54 = vor.u32 %v7735_v5, %v7024_v2  ;;  %v4128_v22 = vmax.f32 %v4120_v9, %v4124_v13  ;;  %v6954_v58 = vld [vmem:[#allocation6 + $0xb8] sm:$0xf0]  ;;  %v7042_v2 = vld [vmem:[#allocation6 + $0x168] sm:$0xf0] }
 0x330   :  { %4539 = vmatpush.bf16.msra.mxu1 %v6977_v10  ;;  %v7049_v14 = vor.u32 %v7741_v29, %v7048_v42  ;;  %v7708_v10 = vld [vmem:[#allocation6 + $0x74] sm:$0xf]  ;;  %v6978_v42 = vld [vmem:[#allocation6 + $0xe8] sm:$0xf0]  ;;  %v8237_v29 = vpack.c.bf16 %v8206_v39, %v8206_v39  ;;  %v7714_v5 = vld [vmem:[#allocation6 + $0xa4] sm:$0xf] }
 0x331   :  { %v6925_v41 = vor.u32 %v7708_v10, %v6922_v11  ;;  %v8239_v3 = vpack.c.bf16 %v4128_v22, %v4128_v22  ;;  %v3930_v10 = vpop.f32.mrf.mxu2  ;;  %v7045_v11 = vor.u32 %v7738_v47, %v7042_v2  ;;  %v7696_v13 = vld [vmem:[#allocation6 + $0x14] sm:$0xf]  ;;  %v7710_v31 = vld [vmem:[#allocation6 + $0x84] sm:$0xf]  ;;  %v7018_v51 = vld [vmem:[#allocation6 + $0x138] sm:$0xf0] }
 0x332   :  { %4527 = vmatpush.bf16.msra.mxu0 %v6905_v16  ;;  %4551 = vmatpush.bf16.msra.mxu2 %v7049_v14  ;;  %v7724_v16 = vld [vmem:[#allocation6 + $0xf4] sm:$0xf]  ;;  %v7000_v14 = vld [vmem:[#allocation6 + $0x110] sm:$0xf] }
 0x333   :  { %v6989_v44 = vor.u32 %v7724_v16, %v6986_v17  ;;  %v7001_v39 = vor.u32 %v7729_v36, %v7000_v14  ;;  %v6949_v16 = vor.u32 %v7714_v5, %v6946_v7  ;;  %v6874_v17 = vld [vmem:[#allocation6 + $0x18] sm:$0xf0]  ;;  %v7736_v9 = vld [vmem:[#allocation6 + $0x154] sm:$0xf]  ;;  %v6930_v14 = vld [vmem:[#allocation6 + $0x88] sm:$0xf0] }
 0x334   :  { %4540 = vmatpush.bf16.msra.mxu1 %v6969_v18  ;;  %v6865_v18 = vor.u32 %v7695_v8, %v6864_v62  ;;  %v6893_v62 = vor.u32 %v7700_v48, %v6890_v60  ;;  %v7698_v8 = vld [vmem:[#allocation6 + $0x24] sm:$0xf]  ;;  %v7732_v37 = vld [vmem:[#allocation6 + $0x134] sm:$0xf]  ;;  %v7088_v7 = vld [vmem:[#allocation6 + $0x1c0] sm:$0xf] }
 0x335   :  { %v7728_v6 = vld [vmem:[#allocation6 + $0x114] sm:$0xf]  ;;  %v7726_v60 = vld [vmem:[#allocation6 + $0x104] sm:$0xf] }
 0x336   :  { %4528 = vmatpush.bf16.msra.mxu0 %v6897_v25  ;;  %4552 = vmatpush.bf16.msra.mxu2 %v7041_v43  ;;  %v7733_v25 = vld [vmem:[#allocation6 + $0x134] sm:$0xf0]  ;;  %v7718_v43 = vld [vmem:[#allocation6 + $0xc4] sm:$0xf]  ;;  %v3943_v12 = vpop.f32.mrf.mxu3 }
 0x337   :  { %v7017_v27 = vor.u32 %v7733_v25, %v7016_v23  ;;  %v6965_v24 = vor.u32 %v7718_v43, %v6962_v45  ;;  %v6938_v23 = vld [vmem:[#allocation6 + $0x98] sm:$0xf0]  ;;  %v3919_v25 = vpop.f32.mrf.mxu1  ;;  %v7757_v43 = vld [vmem:[#allocation6 + $0x1f4] sm:$0xf0] }
 0x338   :  { %4541 = vmatpush.bf16.msra.mxu1 %v6961_v38  ;;  %v7706_v38 = vld [vmem:[#allocation6 + $0x64] sm:$0xf] }
 0x339   :  { %v6917_v49 = vor.u32 %v7706_v38, %v6914_v26  ;;  %v8243_v38 = vld [vmem:[#allocation4] sm:$0xff] }
 0x33a   :  { %4529 = vmatpush.bf16.msra.mxu0 %v6889_v32  ;;  %4553 = vmatpush.bf16.msra.mxu2 %v7033_v57  ;;  %v6981_v32 = vor.u32 %v7722_v28, %v6978_v42  ;;  %v7716_v57 = vld [vmem:[#allocation6 + $0xb4] sm:$0xf]  ;;  %v673_v26 = vperm.slane %v8243_v38, 6  ;;  %v6866_v42 = vld [vmem:[#allocation6 + $0x8] sm:$0xf0] }
 0x33c   :  { %4542 = vmatpush.bf16.msra.mxu1 %v6953_v34  ;;  %v6906_v34 = vld [vmem:[#allocation6 + $0x58] sm:$0xf0] }
 0x33d   :  { %v6909_v40 = vor.u32 %v7704_v33, %v6906_v34 }
 0x33e   :  { %4530 = vmatpush.bf16.msra.mxu0 %v6881_v46  ;;  %4554 = vmatpush.bf16.msra.mxu2 %v7025_v54  ;;  %v6901_v46 = vor.u32 %v7702_v15, %v6898_v53  ;;  %v6885_v54 = vor.u32 %v7698_v8, %v6882_v1  ;;  %v3945_v34 = vpop.f32.mrf.mxu3  ;;  %v7010_v15 = vld [vmem:[#allocation6 + $0x128] sm:$0xf0]  ;;  %v7112_v53 = vld [vmem:[#allocation6 + $0x1f0] sm:$0xf]  ;;  %v7753_v1 = vld [vmem:[#allocation6 + $0x1d4] sm:$0xf0] }
 0x33f   :  { %v7113_v20 = vor.u32 %v7757_v43, %v7112_v53  ;;  %v7114_v34 = vld [vmem:[#allocation6 + $0x1f8] sm:$0xf0]  ;;  %v7752_v53 = vld [vmem:[#allocation6 + $0x1d4] sm:$0xf] }
 0x340   :  { %4543 = vmatpush.bf16.msra.mxu1 %v6945_v21  ;;  %v7740_v21 = vld [vmem:[#allocation6 + $0x174] sm:$0xf]  ;;  %v7098_v43 = vld [vmem:[#allocation6 + $0x1d8] sm:$0xf0] }
 0x341   :  { %4564 = vmatpush.bf16.msra.mxu3 %v7113_v20 }
 0x342   :  { %4531 = vmatpush.bf16.msra.mxu0 %v6873_v61  ;;  %4555 = vmatpush.bf16.msra.mxu2 %v7017_v27  ;;  %v7053_v61 = vor.u32 %v7740_v21, %v7050_v55  ;;  %v7694_v27 = vld [vmem:[#allocation6 + $0x4] sm:$0xf]  ;;  %v7002_v21 = vld [vmem:[#allocation6 + $0x118] sm:$0xf0] }
 0x343   :  { %v6869_v36 = vor.u32 %v7694_v27, %v6866_v42  ;;  %v7005_v48 = vor.u32 %v7728_v6, %v7002_v21  ;;  %v7750_v6 = vld [vmem:[#allocation6 + $0x1c4] sm:$0xf]  ;;  %v7090_v21 = vld [vmem:[#allocation6 + $0x1c8] sm:$0xf0] }
 0x344   :  { %4544 = vmatpush.bf16.msra.mxu1 %v6937_v0  ;;  %v6957_v0 = vor.u32 %v7716_v57, %v6954_v58 }
 0x346   :  { %4532 = vmatpush.bf16.msra.mxu0 %v6865_v18  ;;  %4556 = vmatpush.bf16.msra.mxu2 %v7009_v35  ;;  %v3906_v18 = vpop.f32.mrf.mxu0  ;;  %v3905_v35 = vadd.f32 %v3904_v52, %v673_v26  ;;  %v6994_v52 = vld [vmem:[#allocation6 + $0x108] sm:$0xf0]  ;;  %v7747_v26 = vld [vmem:[#allocation6 + $0x1a4] sm:$0xf0] }
 0x347   :  { %v6997_v55 = vor.u32 %v7726_v60, %v6994_v52  ;;  %v7080_v18 = vld [vmem:[#allocation6 + $0x1b0] sm:$0xf] }
 0x348   :  { %4545 = vmatpush.bf16.msra.mxu1 %v6929_v19  ;;  %v7034_v19 = vld [vmem:[#allocation6 + $0x158] sm:$0xf0]  ;;  %v3918_v45 = vadd.f32 %v3917_v59, %v3905_v35  ;;  %v3969_v59 = vpop.f32.mrf.mxu1 }
 0x349   :  { %4533 = vmatmul.bf16.vlgmr.msra.gmra.mxu0 %v8237_v29  ;;  %v7037_v22 = vor.u32 %v7736_v9, %v7034_v19  ;;  %v7749_v9 = vld [vmem:[#allocation6 + $0x1b4] sm:$0xf0] }
 0x34a   :  { %4577 = vmatpush.bf16.msrb.mxu0 %v6925_v41  ;;  %4557 = vmatpush.bf16.msra.mxu2 %v7001_v39  ;;  %v7712_v41 = vld [vmem:[#allocation6 + $0x94] sm:$0xf]  ;;  %v6933_v39 = vor.u32 %v7710_v31, %v6930_v14  ;;  %v7056_v14 = vld [vmem:[#allocation6 + $0x180] sm:$0xf] }
 0x34b   :  { %4546 = vmatmul.bf16.vlgmr.msra.gmra.mxu1 %v8239_v3  ;;  %v6941_v28 = vor.u32 %v7712_v41, %v6938_v23  ;;  %v7081_v23 = vor.u32 %v7749_v9, %v7080_v18  ;;  %v4114_v9 = vmul.f32 0.01, %v8185_v63 }
 0x34c   :  { %4590 = vmatpush.bf16.msrb.mxu1 %v6989_v44  ;;  %v6877_v44 = vor.u32 %v7696_v13, %v6874_v17 }
 0x34e   :  { %4578 = vmatpush.bf16.msrb.mxu0 %v6917_v49  ;;  %4558 = vmatpush.bf16.msra.mxu2 %v6993_v50  ;;  %v7734_v49 = vld [vmem:[#allocation6 + $0x144] sm:$0xf]  ;;  %v3956_v57 = vpop.f32.mrf.mxu0 }
 0x34f   :  { %v7029_v33 = vor.u32 %v7734_v49, %v7026_v30  ;;  %v7064_v49 = vld [vmem:[#allocation6 + $0x190] sm:$0xf]  ;;  %v7745_v30 = vld [vmem:[#allocation6 + $0x194] sm:$0xf0] }
 0x350   :  { %4591 = vmatpush.bf16.msrb.mxu1 %v6981_v32  ;;  %v3932_v32 = vpop.f32.mrf.mxu2  ;;  %v7065_v31 = vor.u32 %v7745_v30, %v7064_v49 }
 0x351   :  { %v7743_v32 = vld [vmem:[#allocation6 + $0x184] sm:$0xf0] }
 0x352   :  { %4579 = vmatpush.bf16.msrb.mxu0 %v6909_v40  ;;  %4603 = vmatpush.bf16.msrb.mxu2 %v7053_v61  ;;  %v7021_v40 = vor.u32 %v7732_v37, %v7018_v51  ;;  %v7104_v61 = vld [vmem:[#allocation6 + $0x1e0] sm:$0xf]  ;;  %v3995_v5 = vpop.f32.mrf.mxu3  ;;  %v7754_v51 = vld [vmem:[#allocation6 + $0x1e4] sm:$0xf] }
 0x354   :  { %4592 = vmatpush.bf16.msrb.mxu1 %v6973_v4  ;;  %v7730_v4 = vld [vmem:[#allocation6 + $0x124] sm:$0xf] }
 0x356   :  { %4580 = vmatpush.bf16.msrb.mxu0 %v6901_v46  ;;  %4604 = vmatpush.bf16.msrb.mxu2 %v7045_v11  ;;  %v7013_v46 = vor.u32 %v7730_v4, %v7010_v15  ;;  %v4113_v11 = vmul.f32 0.01, %v8171_v56 }
 0x358   :  { %4593 = vmatpush.bf16.msrb.mxu1 %v6965_v24  ;;  %v3931_v24 = vadd.f32 %v3930_v10, %v3918_v45  ;;  %v3982_v47 = vpop.f32.mrf.mxu2  ;;  %v7751_v10 = vld [vmem:[#allocation6 + $0x1c4] sm:$0xf0]  ;;  %v4121_v19 = vsel %vm4105_vm4, %v8171_v56, %v4113_v11  ;;  %v7057_v56 = vor.u32 %v7743_v32, %v7056_v14  ;;  %v7101_v45 = vor.u32 %v7752_v53, %v7098_v43 }
 0x359   :  { %v7089_v13 = vor.u32 %v7751_v10, %v7088_v7 }
 0x35a   :  { %4581 = vmatpush.bf16.msrb.mxu0 %v6893_v62  ;;  %4605 = vmatpush.bf16.msrb.mxu2 %v7037_v22  ;;  %v3944_v50 = vadd.f32 %v3943_v12, %v3931_v24  ;;  %v7755_v62 = vld [vmem:[#allocation6 + $0x1e4] sm:$0xf0]  ;;  %v3997_v27 = vpop.f32.mrf.mxu3  ;;  %v7093_v24 = vor.u32 %v7750_v6, %v7090_v21  ;;  %v7761_v6 = vld [vmem:[#allocation9 + $0x18] sm:$0xff]  ;;  %v7760_v21 = vld [vmem:[#allocation9 + $0x10] sm:$0xff] }
 0x35b   :  { %v7105_v8 = vor.u32 %v7755_v62, %v7104_v61 }
 0x35c   :  { %4594 = vmatpush.bf16.msrb.mxu1 %v6957_v0  ;;  %v3957_v58 = vadd.f32 %v3956_v57, %v3944_v50  ;;  %v7748_v50 = vld [vmem:[#allocation6 + $0x1b4] sm:$0xf] }
 0x35d   :  { %4565 = vmatpush.bf16.msra.mxu3 %v7105_v8  ;;  %v7744_v8 = vld [vmem:[#allocation6 + $0x194] sm:$0xf] }
 0x35e   :  { %4582 = vmatpush.bf16.msrb.mxu0 %v6885_v54  ;;  %4606 = vmatpush.bf16.msrb.mxu2 %v7029_v33  ;;  %v3970_v0 = vadd.f32 %v3969_v59, %v3957_v58  ;;  %v3958_v54 = vpop.f32.mrf.mxu0  ;;  %v7756_v33 = vld [vmem:[#allocation6 + $0x1f4] sm:$0xf]  ;;  %v7746_v58 = vld [vmem:[#allocation6 + $0x1a4] sm:$0xf]  ;;  %v7074_v59 = vld [vmem:[#allocation6 + $0x1a8] sm:$0xf0] }
 0x35f   :  { %v7117_v35 = vor.u32 %v7756_v33, %v7114_v34  ;;  %v7077_v62 = vor.u32 %v7746_v58, %v7074_v59  ;;  %v7769_v59 = vld [vmem:[#allocation12 + $0x18] sm:$0xff] }
 0x360   :  { %4595 = vmatpush.bf16.msrb.mxu1 %v6949_v16  ;;  %v3983_v2 = vadd.f32 %v3982_v47, %v3970_v0  ;;  %v3971_v16 = vpop.f32.mrf.mxu1  ;;  %v3984_v22 = vpop.f32.mrf.mxu2  ;;  %v7066_v0 = vld [vmem:[#allocation6 + $0x198] sm:$0xf0] }
 0x362   :  { %4583 = vmatpush.bf16.msrb.mxu0 %v6877_v44  ;;  %4607 = vmatpush.bf16.msrb.mxu2 %v7021_v40  ;;  %v3996_v12 = vadd.f32 %v3995_v5, %v3983_v2  ;;  %v7072_v44 = vld [vmem:[#allocation6 + $0x1a0] sm:$0xf] }
 0x363   :  { %v7073_v42 = vor.u32 %v7747_v26, %v7072_v44 }
 0x364   :  { %4596 = vmatpush.bf16.msrb.mxu1 %v6941_v28  ;;  %vm4109_vm5 = vcmp.ge.f32.partialorder %v3996_v12, 0.0  ;;  %v4117_v17 = vmul.f32 0.01, %v3996_v12 }
 0x366   :  { %4584 = vmatpush.bf16.msrb.mxu0 %v6869_v36  ;;  %4608 = vmatpush.bf16.msrb.mxu2 %v7013_v46  ;;  %v4125_v41 = vsel %vm4109_vm5, %v3996_v12, %v4117_v17  ;;  %v4008_v36 = vpop.f32.mrf.mxu0 }
 0x367   :  { %v4129_v25 = vmax.f32 %v4121_v19, %v4125_v41 }
 0x368   :  { %4597 = vmatpush.bf16.msrb.mxu1 %v6933_v39  ;;  %v4021_v37 = vpop.f32.mrf.mxu1  ;;  %v7106_v39 = vld [vmem:[#allocation6 + $0x1e8] sm:$0xf0] }
 0x369   :  { %4585 = vmatmul.bf16.vlgmr.msrb.gmra.mxu0 %v8237_v29  ;;  %v7096_v29 = vld [vmem:[#allocation6 + $0x1d0] sm:$0xf]  ;;  %v4133_v28 = vpack.c.bf16 %v4129_v25, %v4129_v25  ;;  %v7109_v40 = vor.u32 %v7754_v51, %v7106_v39  ;;  %v7765_v39 = vld [vmem:[#allocation9 + $0x38] sm:$0xff] }
 0x36a   :  { %4609 = vmatpush.bf16.msrb.mxu2 %v7005_v48  ;;  %v674_v48 = vperm.slane %v8243_v38, 7  ;;  %v7058_v38 = vld [vmem:[#allocation6 + $0x188] sm:$0xf0]  ;;  %4705 = vmatpush.bf16.msra.mxu0 %v7765_v39 }
 0x36b   :  { %4598 = vmatmul.bf16.vlgmr.msrb.gmra.mxu1 %v8239_v3  ;;  %v7097_v3 = vor.u32 %v7753_v1, %v7096_v29  ;;  %4559 = vmatmul.bf16.vlgmr.msra.gmra.mxu2 %v4133_v28  ;;  %v7069_v1 = vor.u32 %v7744_v8, %v7066_v0 }
 0x36c   :  { %v4009_v61 = vadd.f32 %v4008_v36, %v674_v48  ;;  %v7758_v48 = vld [vmem:[#allocation9] sm:$0xff] }
 0x36d   :  { %4566 = vmatpush.bf16.msra.mxu3 %v7097_v3  ;;  %v7742_v3 = vld [vmem:[#allocation6 + $0x184] sm:$0xf] }
 0x36e   :  { %4610 = vmatpush.bf16.msrb.mxu2 %v6997_v55  ;;  %v4010_v46 = vpop.f32.mrf.mxu0  ;;  %v7082_v55 = vld [vmem:[#allocation6 + $0x1b8] sm:$0xf0]  ;;  %v4022_v29 = vadd.f32 %v4021_v37, %v4009_v61  ;;  %v7061_v2 = vor.u32 %v7742_v3, %v7058_v38  ;;  %v7768_v61 = vld [vmem:[#allocation12 + $0x10] sm:$0xff] }
 0x36f   :  { %v7085_v57 = vor.u32 %v7748_v50, %v7082_v55  ;;  %v7763_v46 = vld [vmem:[#allocation9 + $0x28] sm:$0xff] }
 0x370   :  { %v4034_v4 = vpop.f32.mrf.mxu2  ;;  %v4023_v20 = vpop.f32.mrf.mxu1  ;;  %v7771_v55 = vld [vmem:[#allocation12 + $0x28] sm:$0xff] }
 0x371   :  { %4567 = vmatpush.bf16.msra.mxu3 %v7089_v13  ;;  %v4035_v47 = vadd.f32 %v4034_v4, %v4022_v29  ;;  %v7762_v20 = vld [vmem:[#allocation9 + $0x20] sm:$0xff] }
 0x372   :  { %v4047_v15 = vpop.f32.mrf.mxu3 }
 0x373   :  { %v4048_v5 = vadd.f32 %v4047_v15, %v4035_v47 }
 0x375   :  { %4568 = vmatpush.bf16.msra.mxu3 %v7081_v23  ;;  %v4122_v23 = vsel %vm4106_vm6, %v8185_v63, %v4114_v9 }
 0x378   :  { %v4036_v60 = vpop.f32.mrf.mxu2 }
 0x379   :  { %4569 = vmatpush.bf16.msra.mxu3 %v7073_v42  ;;  %v7773_v60 = vld [vmem:[#allocation12 + $0x38] sm:$0xff] }
 0x37a   :  { %v4049_v52 = vpop.f32.mrf.mxu3  ;;  %4790 = vmatpush.bf16.msra.mxu1 %v7773_v60 }
 0x37b   :  { %4611 = vmatmul.bf16.vlgmr.msrb.gmra.mxu2 %v4133_v28  ;;  %v4199_v28 = vld [vmem:[#allocation7] sm:$0x3]  ;;  %v7772_v52 = vld [vmem:[#allocation12 + $0x30] sm:$0xff] }
 0x37c   :  { %v4201_v42 = vperm.slane %v4199_v28, 0  ;;  %v4202_v33 = vperm.slane %v4199_v28, 1 }
 0x37d   :  { %4570 = vmatpush.bf16.msra.mxu3 %v7065_v31 }
 0x37e   :  { %4791 = vmatpush.bf16.msra.mxu1 %v7772_v52 }
 0x381   :  { %4571 = vmatpush.bf16.msra.mxu3 %v7057_v56 }
 0x382   :  { %4792 = vmatpush.bf16.msra.mxu1 %v7771_v55 }
 0x385   :  { %4616 = vmatpush.bf16.msrb.mxu3 %v7117_v35 }
 0x389   :  { %4617 = vmatpush.bf16.msrb.mxu3 %v7109_v40  ;;  %v7764_v40 = vld [vmem:[#allocation9 + $0x30] sm:$0xff] }
 0x38a   :  { %4706 = vmatpush.bf16.msra.mxu0 %v7764_v40 }
 0x38d   :  { %4618 = vmatpush.bf16.msrb.mxu3 %v7101_v45 }
 0x38e   :  { %4707 = vmatpush.bf16.msra.mxu0 %v7763_v46 }
 0x391   :  { %4619 = vmatpush.bf16.msrb.mxu3 %v7093_v24  ;;  %v7759_v24 = vld [vmem:[#allocation9 + $0x8] sm:$0xff] }
 0x392   :  { %4708 = vmatpush.bf16.msra.mxu0 %v7762_v20 }
 0x395   :  { %4620 = vmatpush.bf16.msrb.mxu3 %v7085_v57  ;;  %v7770_v57 = vld [vmem:[#allocation12 + $0x20] sm:$0xff] }
 0x396   :  { %4709 = vmatpush.bf16.msra.mxu0 %v7761_v6  ;;  %4793 = vmatpush.bf16.msra.mxu1 %v7770_v57 }
 0x399   :  { %4621 = vmatpush.bf16.msrb.mxu3 %v7077_v62 }
 0x39a   :  { %4710 = vmatpush.bf16.msra.mxu0 %v7760_v21  ;;  %4794 = vmatpush.bf16.msra.mxu1 %v7769_v59 }
 0x39d   :  { %4622 = vmatpush.bf16.msrb.mxu3 %v7069_v1 }
 0x39e   :  { %4711 = vmatpush.bf16.msra.mxu0 %v7759_v24  ;;  %4795 = vmatpush.bf16.msra.mxu1 %v7768_v61 }
 0x3a1   :  { %4623 = vmatpush.bf16.msrb.mxu3 %v7061_v2 }
 0x3a2   :  { %4712 = vmatpush.bf16.msra.mxu0 %v7758_v48 }
 0x3a6   :  { %v4060_v7 = vpop.f32.mrf.mxu0 }
 0x3a7   :  { %v4061_v11 = vadd.f32 %v4060_v7, %v4048_v5 }
 0x3a8   :  { %v4073_v10 = vpop.f32.mrf.mxu1 }
 0x3a9   :  { %v4074_v12 = vadd.f32 %v4073_v10, %v4061_v11  ;;  %v7767_v10 = vld [vmem:[#allocation12 + $0x8] sm:$0xff]  ;;  %v7766_v11 = vld [vmem:[#allocation12] sm:$0xff] }
 0x3aa   :  { %4796 = vmatpush.bf16.msra.mxu1 %v7767_v10 }
 0x3ae   :  { %v4062_v17 = vpop.f32.mrf.mxu0  ;;  %4797 = vmatpush.bf16.msra.mxu1 %v7766_v11 }
 0x3b0   :  { %v4086_v54 = vpop.f32.mrf.mxu2  ;;  %v4075_v18 = vpop.f32.mrf.mxu1 }
 0x3b1   :  { %v4087_v13 = vadd.f32 %v4086_v54, %v4074_v12  ;;  %v7788_v12 = vld [vmem:[#allocation10] ss:$0 sm:$0xff] }
 0x3b2   :  { %v4099_v16 = vpop.f32.mrf.mxu3 }
 0x3b3   :  { %v4100_v19 = vadd.f32 %v4099_v16, %v4087_v13 }
 0x3b5   :  { %vm4110_vm7 = vcmp.ge.f32.partialorder %v4100_v19, 0.0  ;;  %v4118_v41 = vmul.f32 0.01, %v4100_v19 }
 0x3b7   :  { %v4126_v25 = vsel %vm4110_vm7, %v4100_v19, %v4118_v41  ;;  %v7789_v19 = vld [vmem:[#allocation13] ss:$0 sm:$0xff] }
 0x3b8   :  { %v4130_v22 = vmax.f32 %v4122_v23, %v4126_v25  ;;  %v4088_v44 = vpop.f32.mrf.mxu2 }
 0x3ba   :  { %v4101_v26 = vpop.f32.mrf.mxu3  ;;  %v4134_v27 = vpack.c.bf16 %v4130_v22, %v4130_v22 }
 0x3bc   :  { %4572 = vmatmul.bf16.vlgmr.msra.gmra.mxu3 %v4134_v27 }
 0x3c6   :  { %v4534_v49 = vpop.f32.mrf.mxu0 }
 0x3c7   :  { %v4535_v30 = vadd.f32 %v4534_v49, %v4201_v42 }
 0x3c8   :  { %v4547_v31 = vpop.f32.mrf.mxu1 }
 0x3c9   :  { %v4548_v14 = vadd.f32 %v4547_v31, %v4535_v30 }
 0x3cc   :  { %4624 = vmatmul.bf16.vlgmr.msrb.gmra.mxu3 %v4134_v27 }
 0x3ce   :  { %v4536_v32 = vpop.f32.mrf.mxu0 }
 0x3d0   :  { %v4549_v56 = vpop.f32.mrf.mxu1 }
 0x3e6   :  { %v4586_v34 = vpop.f32.mrf.mxu0 }
 0x3e7   :  { %v4587_v35 = vadd.f32 %v4586_v34, %v4202_v33 }
 0x3e8   :  { %v4599_v36 = vpop.f32.mrf.mxu1 }
 0x3e9   :  { %v4600_v63 = vadd.f32 %v4599_v36, %v4587_v35 }
 0x3ee   :  { %v4588_v37 = vpop.f32.mrf.mxu0  ;;  %v4560_v4 = vpop.f32.mrf.mxu2 }
 0x3ef   :  { %v4561_v15 = vadd.f32 %v4560_v4, %v4548_v14 }
 0x3f0   :  { %v4601_v51 = vpop.f32.mrf.mxu1 }
 0x3f6   :  { %v4562_v53 = vpop.f32.mrf.mxu2 }
 0x3fe   :  { %v4612_v43 = vpop.f32.mrf.mxu2 }
 0x3ff   :  { %v4613_v8 = vadd.f32 %v4612_v43, %v4600_v63 }
 0x406   :  { %v4614_v45 = vpop.f32.mrf.mxu2 }
 0x43f   :  { %v4573_v50 = vpop.f32.mrf.mxu3 }
 0x440   :  { %v4574_v62 = vadd.f32 %v4573_v50, %v4561_v15 }
 0x442   :  { %v4631_v29 = vmul.f32 0.01, %v4574_v62  ;;  %vm4629_vm8 = vcmp.ge.f32.partialorder %v4574_v62, 0.0 }
 0x444   :  { %v4633_v3 = vsel %vm4629_vm8, %v4574_v62, %v4631_v29 }
 0x447   :  { %v4575_v58 = vpop.f32.mrf.mxu3 }
 0x44f   :  { %v4625_v0 = vpop.f32.mrf.mxu3 }
 0x450   :  { %v4626_v1 = vadd.f32 %v4625_v0, %v4613_v8 }
 0x452   :  { %vm4630_vm9 = vcmp.ge.f32.partialorder %v4626_v1, 0.0  ;;  %v4632_v47 = vmul.f32 0.01, %v4626_v1 }
 0x454   :  { %v4634_v38 = vsel %vm4630_vm9, %v4626_v1, %v4632_v47 }
 0x455   :  { %v4635_v2 = vmax.f32 %v4633_v3, %v4634_v38 }
 0x457   :  { %v4636_v5 = vpack.c.bf16 %v4635_v2, %v4635_v2  ;;  %v4627_v7 = vpop.f32.mrf.mxu3 }
 0x459   :  { %4713 = vmatmul.bf16.vlgmr.msra.gmra.mxu0 %v4636_v5 }
 0x4d6   :  { %v4714_v54 = vpop.f32.mrf.mxu0 }
 0x4d7   :  { %v4715_v13 = vadd.f32 %v7788_v12, %v4714_v54 }
 0x4d9   :  { %vm4718_vm10 = vcmp.ge.f32.partialorder %v4715_v13, 0.0  ;;  %v4719_v16 = vmul.f32 0.01, %v4715_v13 }
 0x4db   :  { %v4720_v17 = vsel %vm4718_vm10, %v4715_v13, %v4719_v16 }
 0x4dc   :  { %v4721_v18 = vpack.c.bf16 %v4720_v17, %v4720_v17  ;;  %4803 = vst [vmem:[%s8270_s9] sm:$0xff] %v4720_v17 }
 0x4de   :  { %v4716_v9 = vpop.f32.mrf.mxu0  ;;  %4798 = vmatmul.bf16.vlgmr.msra.gmra.mxu1 %v4721_v18 }
 0x55b   :  { %v4799_v41 = vpop.f32.mrf.mxu1 }
 0x55c   :  { %v4800_v23 = vadd.f32 %v7789_v19, %v4799_v41 }
 0x55e   :  { %4804 = vst [vmem:[%s8270_s9 + $0x8] sm:$0xff] %v4800_v23 }
 0x563   :  { %v4801_v25 = vpop.f32.mrf.mxu1 }
 0x564   :  { %4809 = vsyncpa [#allocation3], 1 }
 0x565   :  { %4810 = vsyncpa [#allocation5], 1 }
 0x566   :  { %4811 = vsyncpa [#allocation8], 1 }
 0x567   :  { %4812 = vsyncpa [#allocation11], 1 }
 0x568   :  { %4813 = vsyncpa [#allocation14], 1 }

</bundles_post_ra>
